<compile_context>
chip_gen: v7x
topology: tpu7x:2x2x1
jax: 0.10.0
libtpu: 0.0.40
codegen_flags: <defaults>
</compile_context>

<pallas_src>
import math

import jax
import jax.numpy as jnp
from jax.experimental import pallas as pl
from jax.experimental.pallas import tpu as pltpu

# Small, module-consistent shapes.
B, S, D = 2, 8, 32          # batch, sequence, hidden
H = 4                       # attention heads
DH = D // H                 # per-head dim
FF = 64                     # feed-forward hidden dim
NUM_LAYERS = 3              # number of (weight-shared) layers
EPS = 1e-5                  # LayerNorm eps (PyTorch default)

BS = B * S

# Rows of the packed parameter-vector table (width = 3*D, zero padded).
_ROW_BQKV, _ROW_BO, _ROW_B1, _ROW_B2 = 0, 1, 2, 3
_ROW_LN1G, _ROW_LN1B, _ROW_LN2G, _ROW_LN2B = 4, 5, 6, 7


def _layer_norm(y, g, b):
    mu = jnp.mean(y, axis=-1, keepdims=True)
    var = jnp.mean((y - mu) ** 2, axis=-1, keepdims=True)
    return (y - mu) * jax.lax.rsqrt(var + EPS) * g + b


def transformer_encoder_kernel(x_ref, wqkv_ref, wo_ref, w1_ref, w2_ref,
                               vec_ref, o_ref):
    # Load every parameter once, before the layer loop (weights are shared).
    wqkv = wqkv_ref[...]                      # (D, 3D)
    wo = wo_ref[...]                          # (D, D)
    w1 = w1_ref[...]                          # (D, FF)
    w2 = w2_ref[...]                          # (FF, D)
    vec = vec_ref[...]                        # (8, 3D) packed small vectors

    bqkv = vec[_ROW_BQKV:_ROW_BQKV + 1, :]            # (1, 3D)
    bo = vec[_ROW_BO:_ROW_BO + 1, :D]                 # (1, D)
    b1 = vec[_ROW_B1:_ROW_B1 + 1, :FF]                # (1, FF)
    b2 = vec[_ROW_B2:_ROW_B2 + 1, :D]                 # (1, D)
    ln1g = vec[_ROW_LN1G:_ROW_LN1G + 1, :D]
    ln1b = vec[_ROW_LN1B:_ROW_LN1B + 1, :D]
    ln2g = vec[_ROW_LN2G:_ROW_LN2G + 1, :D]
    ln2b = vec[_ROW_LN2B:_ROW_LN2B + 1, :D]

    x = x_ref[...].astype(jnp.float32)                # (BS, D)
    scale = 1.0 / math.sqrt(DH)

    for _ in range(NUM_LAYERS):                       # shared weights, unrolled
        # --- Multi-head self-attention: fused QKV projection on the MXU ---
        qkv = jnp.dot(x, wqkv, preferred_element_type=jnp.float32) + bqkv
        qkv3 = qkv.reshape(B, S, 3 * D)               # split leading dim only

        attn = jnp.zeros((BS, D), jnp.float32)
        for h in range(H):                            # static unroll over heads
            lo = h * DH
            qh = qkv3[:, :, lo:lo + DH]               # (B, S, DH)
            kh = qkv3[:, :, D + lo:D + lo + DH]       # (B, S, DH)
            vh = qkv3[:, :, 2 * D + lo:2 * D + lo + DH]

            s = jnp.einsum('bqd,bkd->bqk', qh, kh,
                           preferred_element_type=jnp.float32) * scale
            s = s - jnp.max(s, axis=-1, keepdims=True)
            p = jnp.exp(s)
            p = p * pl.reciprocal(jnp.sum(p, axis=-1, keepdims=True),
                                  approx=True)
            oh = jnp.einsum('bqk,bkd->bqd', p, vh,
                            preferred_element_type=jnp.float32)   # (B, S, DH)

            # concat(heads) @ wo  ==  sum_h head_h @ wo[h*DH:(h+1)*DH, :]
            attn = attn + jnp.dot(oh.reshape(BS, DH), wo[lo:lo + DH, :],
                                  preferred_element_type=jnp.float32)
        attn = attn + bo

        # --- Residual + LayerNorm 1 ---
        y = _layer_norm(x + attn, ln1g, ln1b)

        # --- Feed-forward (ReLU) ---
        hdn = jnp.maximum(
            jnp.dot(y, w1, preferred_element_type=jnp.float32) + b1, 0.0)
        f = jnp.dot(hdn, w2, preferred_element_type=jnp.float32) + b2

        # --- Residual + LayerNorm 2 ---
        x = _layer_norm(y + f, ln2g, ln2b)

    o_ref[...] = x.astype(o_ref.dtype)


@jax.jit
def transformer_encoder(x, params):
    """Full weight-shared NUM_LAYERS encoder stack in one kernel invocation."""
    wqkv, wo, w1, w2, vec = params
    x2 = x.reshape(BS, D)                             # lane-friendly 2-D slab

    vmem = pl.BlockSpec(memory_space=pltpu.MemorySpace.VMEM)
    out2 = pl.pallas_call(
        transformer_encoder_kernel,
        out_shape=jax.ShapeDtypeStruct((BS, D), x.dtype),
        in_specs=[vmem] * 6,
        out_specs=vmem,
    )(x2, wqkv, wo, w1, w2, vec)
    return out2.reshape(B, S, D)


def transformer_encoder_ref(x, params):
    """Pure-JAX reference (exact softmax) for correctness validation."""
    wqkv, wo, w1, w2, vec = params
    bqkv = vec[_ROW_BQKV]
    bo = vec[_ROW_BO, :D]
    b1 = vec[_ROW_B1, :FF]
    b2 = vec[_ROW_B2, :D]
    ln1g, ln1b = vec[_ROW_LN1G, :D], vec[_ROW_LN1B, :D]
    ln2g, ln2b = vec[_ROW_LN2G, :D], vec[_ROW_LN2B, :D]

    def ln(y, g, b):
        mu = jnp.mean(y, axis=-1, keepdims=True)
        var = jnp.mean((y - mu) ** 2, axis=-1, keepdims=True)
        return (y - mu) / jnp.sqrt(var + EPS) * g + b

    h = x.astype(jnp.float32)
    for _ in range(NUM_LAYERS):
        qkv = h @ wqkv + bqkv                                   # (B, S, 3D)
        q, k, v = jnp.split(qkv, 3, axis=-1)
        q = q.reshape(B, S, H, DH).transpose(0, 2, 1, 3)
        k = k.reshape(B, S, H, DH).transpose(0, 2, 1, 3)
        v = v.reshape(B, S, H, DH).transpose(0, 2, 1, 3)
        s = jnp.einsum('bhqd,bhkd->bhqk', q, k) / math.sqrt(DH)
        p = jax.nn.softmax(s, axis=-1)
        o = jnp.einsum('bhqk,bhkd->bhqd', p, v)
        o = o.transpose(0, 2, 1, 3).reshape(B, S, D)
        attn = o @ wo + bo
        y = ln(h + attn, ln1g, ln1b)
        f = jnp.maximum(y @ w1 + b1, 0.0) @ w2 + b2
        h = ln(y + f, ln2g, ln2b)
    return h


def init_params(key):
    ks = jax.random.split(key, 12)

    def lin_w(k, din, dout):
        return (jax.random.normal(k, (din, dout), jnp.float32)
                * (1.0 / math.sqrt(din)))

    wq = lin_w(ks[0], D, D)
    wk = lin_w(ks[1], D, D)
    wv = lin_w(ks[2], D, D)
    wqkv = jnp.concatenate([wq, wk, wv], axis=1)      # (D, 3D) fused QKV
    wo = lin_w(ks[3], D, D)
    w1 = lin_w(ks[4], D, FF)
    w2 = lin_w(ks[5], FF, D)

    # Packed table of all small vectors (non-trivial so the reference check
    # exercises every parameter path).
    vec = jnp.zeros((8, 3 * D), jnp.float32)
    vec = vec.at[_ROW_BQKV, :].set(
        0.1 * jax.random.normal(ks[6], (3 * D,), jnp.float32))
    vec = vec.at[_ROW_BO, :D].set(
        0.1 * jax.random.normal(ks[7], (D,), jnp.float32))
    vec = vec.at[_ROW_B1, :FF].set(
        0.1 * jax.random.normal(ks[8], (FF,), jnp.float32))
    vec = vec.at[_ROW_B2, :D].set(
        0.1 * jax.random.normal(ks[9], (D,), jnp.float32))
    vec = vec.at[_ROW_LN1G, :D].set(
        1.0 + 0.1 * jax.random.normal(ks[10], (D,), jnp.float32))
    vec = vec.at[_ROW_LN1B, :D].set(0.05)
    vec = vec.at[_ROW_LN2G, :D].set(
        1.0 + 0.1 * jax.random.normal(ks[11], (D,), jnp.float32))
    vec = vec.at[_ROW_LN2B, :D].set(-0.05)

    return (wqkv, wo, w1, w2, vec)


if __name__ == "__main__":
    x = jax.random.normal(jax.random.PRNGKey(0), (B, S, D), jnp.float32)
    params = init_params(jax.random.PRNGKey(42))

    out = jax.block_until_ready(transformer_encoder(x, params))
    ref = jax.block_until_ready(transformer_encoder_ref(x, params))

    assert out.shape == (B, S, D)
    assert jnp.all(jnp.isfinite(out))
    # approx=True softmax reciprocal -> loose-but-meaningful tolerance.
    assert jnp.allclose(out, ref, atol=3e-2, rtol=3e-2), \
        float(jnp.max(jnp.abs(out - ref)))
    print("KERNEL_OK")
</pallas_src>

<mosaic_0001>
module attributes {stable_mosaic.version = 11 : i64} {
  func.func @transformer_encoder_kernel(%arg0: memref<16x32xf32, #tpu.memory_space<vmem>>, %arg1: memref<32x96xf32, #tpu.memory_space<vmem>>, %arg2: memref<32x32xf32, #tpu.memory_space<vmem>>, %arg3: memref<32x64xf32, #tpu.memory_space<vmem>>, %arg4: memref<64x32xf32, #tpu.memory_space<vmem>>, %arg5: memref<8x96xf32, #tpu.memory_space<vmem>>, %arg6: memref<16x32xf32, #tpu.memory_space<vmem>>) attributes {dimension_semantics = [], scalar_prefetch = 0 : i64, scratch_operands = 0 : i64, tpu.core_type = #tpu.core_type<tc>} {
    %c0 = arith.constant 0 : index
    %c0_0 = arith.constant 0 : index
    %0 = vector.load %arg1[%c0, %c0_0] : memref<32x96xf32, #tpu.memory_space<vmem>>, vector<32x96xf32>
    %c0_1 = arith.constant 0 : index
    %c0_2 = arith.constant 0 : index
    %1 = vector.load %arg2[%c0_1, %c0_2] : memref<32x32xf32, #tpu.memory_space<vmem>>, vector<32x32xf32>
    %c0_3 = arith.constant 0 : index
    %c0_4 = arith.constant 0 : index
    %2 = vector.load %arg3[%c0_3, %c0_4] : memref<32x64xf32, #tpu.memory_space<vmem>>, vector<32x64xf32>
    %c0_5 = arith.constant 0 : index
    %c0_6 = arith.constant 0 : index
    %3 = vector.load %arg4[%c0_5, %c0_6] : memref<64x32xf32, #tpu.memory_space<vmem>>, vector<64x32xf32>
    %c0_7 = arith.constant 0 : index
    %c0_8 = arith.constant 0 : index
    %4 = vector.load %arg5[%c0_7, %c0_8] : memref<8x96xf32, #tpu.memory_space<vmem>>, vector<8x96xf32>
    %5 = vector.extract_strided_slice %4 {offsets = [0, 0], sizes = [1, 96], strides = [1, 1]} : vector<8x96xf32> to vector<1x96xf32>
    %6 = vector.extract_strided_slice %4 {offsets = [1, 0], sizes = [1, 32], strides = [1, 1]} : vector<8x96xf32> to vector<1x32xf32>
    %7 = vector.extract_strided_slice %4 {offsets = [2, 0], sizes = [1, 64], strides = [1, 1]} : vector<8x96xf32> to vector<1x64xf32>
    %8 = vector.extract_strided_slice %4 {offsets = [3, 0], sizes = [1, 32], strides = [1, 1]} : vector<8x96xf32> to vector<1x32xf32>
    %9 = vector.extract_strided_slice %4 {offsets = [4, 0], sizes = [1, 32], strides = [1, 1]} : vector<8x96xf32> to vector<1x32xf32>
    %10 = vector.extract_strided_slice %4 {offsets = [5, 0], sizes = [1, 32], strides = [1, 1]} : vector<8x96xf32> to vector<1x32xf32>
    %11 = vector.extract_strided_slice %4 {offsets = [6, 0], sizes = [1, 32], strides = [1, 1]} : vector<8x96xf32> to vector<1x32xf32>
    %12 = vector.extract_strided_slice %4 {offsets = [7, 0], sizes = [1, 32], strides = [1, 1]} : vector<8x96xf32> to vector<1x32xf32>
    %c0_9 = arith.constant 0 : index
    %c0_10 = arith.constant 0 : index
    %13 = vector.load %arg0[%c0_9, %c0_10] : memref<16x32xf32, #tpu.memory_space<vmem>>, vector<16x32xf32>
    %cst = arith.constant dense<0.000000e+00> : vector<16x96xf32>
    %14 = tpu.matmul %13, %0, %cst {dimension_numbers = #tpu.dot_dimension_numbers<[1], [0], [0], [1], [0, 0, 1, 1], [], []>} : vector<16x32xf32>, vector<32x96xf32>, vector<16x96xf32> -> vector<16x96xf32>
    %15 = vector.broadcast %5 : vector<1x96xf32> to vector<16x96xf32>
    %16 = arith.addf %14, %15 : vector<16x96xf32>
    %17 = vector.shape_cast %16 : vector<16x96xf32> to vector<2x8x96xf32>
    %cst_11 = arith.constant 0.000000e+00 : f32
    %18 = vector.broadcast %cst_11 : f32 to vector<16x32xf32>
    %19 = vector.extract_strided_slice %17 {offsets = [0, 0, 0], sizes = [2, 8, 8], strides = [1, 1, 1]} : vector<2x8x96xf32> to vector<2x8x8xf32>
    %20 = vector.extract_strided_slice %17 {offsets = [0, 0, 32], sizes = [2, 8, 8], strides = [1, 1, 1]} : vector<2x8x96xf32> to vector<2x8x8xf32>
    %21 = vector.extract_strided_slice %17 {offsets = [0, 0, 64], sizes = [2, 8, 8], strides = [1, 1, 1]} : vector<2x8x96xf32> to vector<2x8x8xf32>
    "tpu.trace_start"() <{level = 10 : i32, message = "bqd,bkd->bqk"}> : () -> ()
    %cst_12 = arith.constant dense<0.000000e+00> : vector<2x8x8xf32>
    %22 = tpu.matmul %19, %20, %cst_12 {dimension_numbers = #tpu.dot_dimension_numbers<[2], [2], [1], [1], [0, 0, 0, 1, 1, 1], [0], [0]>} : vector<2x8x8xf32>, vector<2x8x8xf32>, vector<2x8x8xf32> -> vector<2x8x8xf32>
    "tpu.trace_stop"() : () -> ()
    %cst_13 = arith.constant 0.353553385 : f32
    %23 = vector.broadcast %cst_13 : f32 to vector<2x8x8xf32>
    %24 = arith.mulf %22, %23 : vector<2x8x8xf32>
    %cst_14 = arith.constant dense<0xFF800000> : vector<2x8xf32>
    %25 = vector.multi_reduction <maximumf>, %24, %cst_14 [2] : vector<2x8x8xf32> to vector<2x8xf32>
    %26 = vector.shape_cast %25 : vector<2x8xf32> to vector<2x8x1xf32>
    %27 = vector.broadcast %26 : vector<2x8x1xf32> to vector<2x8x8xf32>
    %28 = arith.subf %24, %27 : vector<2x8x8xf32>
    %29 = math.exp %28 : vector<2x8x8xf32>
    %cst_15 = arith.constant dense<0.000000e+00> : vector<2x8xf32>
    %30 = vector.multi_reduction <add>, %29, %cst_15 [2] : vector<2x8x8xf32> to vector<2x8xf32>
    %31 = vector.shape_cast %30 : vector<2x8xf32> to vector<2x8x1xf32>
    %32 = tpu.reciprocal %31 {approx = true} : vector<2x8x1xf32> -> vector<2x8x1xf32>
    %33 = vector.broadcast %32 : vector<2x8x1xf32> to vector<2x8x8xf32>
    %34 = arith.mulf %29, %33 : vector<2x8x8xf32>
    "tpu.trace_start"() <{level = 10 : i32, message = "bqk,bkd->bqd"}> : () -> ()
    %cst_16 = arith.constant dense<0.000000e+00> : vector<2x8x8xf32>
    %35 = tpu.matmul %34, %21, %cst_16 {dimension_numbers = #tpu.dot_dimension_numbers<[2], [1], [1], [2], [0, 0, 0, 1, 1, 2], [0], [0]>} : vector<2x8x8xf32>, vector<2x8x8xf32>, vector<2x8x8xf32> -> vector<2x8x8xf32>
    "tpu.trace_stop"() : () -> ()
    %36 = vector.shape_cast %35 : vector<2x8x8xf32> to vector<16x8xf32>
    %37 = vector.extract_strided_slice %1 {offsets = [0, 0], sizes = [8, 32], strides = [1, 1]} : vector<32x32xf32> to vector<8x32xf32>
    %cst_17 = arith.constant dense<0.000000e+00> : vector<16x32xf32>
    %38 = tpu.matmul %36, %37, %cst_17 {dimension_numbers = #tpu.dot_dimension_numbers<[1], [0], [0], [1], [0, 0, 1, 1], [], []>} : vector<16x8xf32>, vector<8x32xf32>, vector<16x32xf32> -> vector<16x32xf32>
    %39 = arith.addf %18, %38 : vector<16x32xf32>
    %40 = vector.extract_strided_slice %17 {offsets = [0, 0, 8], sizes = [2, 8, 8], strides = [1, 1, 1]} : vector<2x8x96xf32> to vector<2x8x8xf32>
    %41 = vector.extract_strided_slice %17 {offsets = [0, 0, 40], sizes = [2, 8, 8], strides = [1, 1, 1]} : vector<2x8x96xf32> to vector<2x8x8xf32>
    %42 = vector.extract_strided_slice %17 {offsets = [0, 0, 72], sizes = [2, 8, 8], strides = [1, 1, 1]} : vector<2x8x96xf32> to vector<2x8x8xf32>
    "tpu.trace_start"() <{level = 10 : i32, message = "bqd,bkd->bqk"}> : () -> ()
    %cst_18 = arith.constant dense<0.000000e+00> : vector<2x8x8xf32>
    %43 = tpu.matmul %40, %41, %cst_18 {dimension_numbers = #tpu.dot_dimension_numbers<[2], [2], [1], [1], [0, 0, 0, 1, 1, 1], [0], [0]>} : vector<2x8x8xf32>, vector<2x8x8xf32>, vector<2x8x8xf32> -> vector<2x8x8xf32>
    "tpu.trace_stop"() : () -> ()
    %cst_19 = arith.constant 0.353553385 : f32
    %44 = vector.broadcast %cst_19 : f32 to vector<2x8x8xf32>
    %45 = arith.mulf %43, %44 : vector<2x8x8xf32>
    %cst_20 = arith.constant dense<0xFF800000> : vector<2x8xf32>
    %46 = vector.multi_reduction <maximumf>, %45, %cst_20 [2] : vector<2x8x8xf32> to vector<2x8xf32>
    %47 = vector.shape_cast %46 : vector<2x8xf32> to vector<2x8x1xf32>
    %48 = vector.broadcast %47 : vector<2x8x1xf32> to vector<2x8x8xf32>
    %49 = arith.subf %45, %48 : vector<2x8x8xf32>
    %50 = math.exp %49 : vector<2x8x8xf32>
    %cst_21 = arith.constant dense<0.000000e+00> : vector<2x8xf32>
    %51 = vector.multi_reduction <add>, %50, %cst_21 [2] : vector<2x8x8xf32> to vector<2x8xf32>
    %52 = vector.shape_cast %51 : vector<2x8xf32> to vector<2x8x1xf32>
    %53 = tpu.reciprocal %52 {approx = true} : vector<2x8x1xf32> -> vector<2x8x1xf32>
    %54 = vector.broadcast %53 : vector<2x8x1xf32> to vector<2x8x8xf32>
    %55 = arith.mulf %50, %54 : vector<2x8x8xf32>
    "tpu.trace_start"() <{level = 10 : i32, message = "bqk,bkd->bqd"}> : () -> ()
    %cst_22 = arith.constant dense<0.000000e+00> : vector<2x8x8xf32>
    %56 = tpu.matmul %55, %42, %cst_22 {dimension_numbers = #tpu.dot_dimension_numbers<[2], [1], [1], [2], [0, 0, 0, 1, 1, 2], [0], [0]>} : vector<2x8x8xf32>, vector<2x8x8xf32>, vector<2x8x8xf32> -> vector<2x8x8xf32>
    "tpu.trace_stop"() : () -> ()
    %57 = vector.shape_cast %56 : vector<2x8x8xf32> to vector<16x8xf32>
    %58 = vector.extract_strided_slice %1 {offsets = [8, 0], sizes = [8, 32], strides = [1, 1]} : vector<32x32xf32> to vector<8x32xf32>
    %cst_23 = arith.constant dense<0.000000e+00> : vector<16x32xf32>
    %59 = tpu.matmul %57, %58, %cst_23 {dimension_numbers = #tpu.dot_dimension_numbers<[1], [0], [0], [1], [0, 0, 1, 1], [], []>} : vector<16x8xf32>, vector<8x32xf32>, vector<16x32xf32> -> vector<16x32xf32>
    %60 = arith.addf %39, %59 : vector<16x32xf32>
    %61 = vector.extract_strided_slice %17 {offsets = [0, 0, 16], sizes = [2, 8, 8], strides = [1, 1, 1]} : vector<2x8x96xf32> to vector<2x8x8xf32>
    %62 = vector.extract_strided_slice %17 {offsets = [0, 0, 48], sizes = [2, 8, 8], strides = [1, 1, 1]} : vector<2x8x96xf32> to vector<2x8x8xf32>
    %63 = vector.extract_strided_slice %17 {offsets = [0, 0, 80], sizes = [2, 8, 8], strides = [1, 1, 1]} : vector<2x8x96xf32> to vector<2x8x8xf32>
    "tpu.trace_start"() <{level = 10 : i32, message = "bqd,bkd->bqk"}> : () -> ()
    %cst_24 = arith.constant dense<0.000000e+00> : vector<2x8x8xf32>
    %64 = tpu.matmul %61, %62, %cst_24 {dimension_numbers = #tpu.dot_dimension_numbers<[2], [2], [1], [1], [0, 0, 0, 1, 1, 1], [0], [0]>} : vector<2x8x8xf32>, vector<2x8x8xf32>, vector<2x8x8xf32> -> vector<2x8x8xf32>
    "tpu.trace_stop"() : () -> ()
    %cst_25 = arith.constant 0.353553385 : f32
    %65 = vector.broadcast %cst_25 : f32 to vector<2x8x8xf32>
    %66 = arith.mulf %64, %65 : vector<2x8x8xf32>
    %cst_26 = arith.constant dense<0xFF800000> : vector<2x8xf32>
    %67 = vector.multi_reduction <maximumf>, %66, %cst_26 [2] : vector<2x8x8xf32> to vector<2x8xf32>
    %68 = vector.shape_cast %67 : vector<2x8xf32> to vector<2x8x1xf32>
    %69 = vector.broadcast %68 : vector<2x8x1xf32> to vector<2x8x8xf32>
    %70 = arith.subf %66, %69 : vector<2x8x8xf32>
    %71 = math.exp %70 : vector<2x8x8xf32>
    %cst_27 = arith.constant dense<0.000000e+00> : vector<2x8xf32>
    %72 = vector.multi_reduction <add>, %71, %cst_27 [2] : vector<2x8x8xf32> to vector<2x8xf32>
    %73 = vector.shape_cast %72 : vector<2x8xf32> to vector<2x8x1xf32>
    %74 = tpu.reciprocal %73 {approx = true} : vector<2x8x1xf32> -> vector<2x8x1xf32>
    %75 = vector.broadcast %74 : vector<2x8x1xf32> to vector<2x8x8xf32>
    %76 = arith.mulf %71, %75 : vector<2x8x8xf32>
    "tpu.trace_start"() <{level = 10 : i32, message = "bqk,bkd->bqd"}> : () -> ()
    %cst_28 = arith.constant dense<0.000000e+00> : vector<2x8x8xf32>
    %77 = tpu.matmul %76, %63, %cst_28 {dimension_numbers = #tpu.dot_dimension_numbers<[2], [1], [1], [2], [0, 0, 0, 1, 1, 2], [0], [0]>} : vector<2x8x8xf32>, vector<2x8x8xf32>, vector<2x8x8xf32> -> vector<2x8x8xf32>
    "tpu.trace_stop"() : () -> ()
    %78 = vector.shape_cast %77 : vector<2x8x8xf32> to vector<16x8xf32>
    %79 = vector.extract_strided_slice %1 {offsets = [16, 0], sizes = [8, 32], strides = [1, 1]} : vector<32x32xf32> to vector<8x32xf32>
    %cst_29 = arith.constant dense<0.000000e+00> : vector<16x32xf32>
    %80 = tpu.matmul %78, %79, %cst_29 {dimension_numbers = #tpu.dot_dimension_numbers<[1], [0], [0], [1], [0, 0, 1, 1], [], []>} : vector<16x8xf32>, vector<8x32xf32>, vector<16x32xf32> -> vector<16x32xf32>
    %81 = arith.addf %60, %80 : vector<16x32xf32>
    %82 = vector.extract_strided_slice %17 {offsets = [0, 0, 24], sizes = [2, 8, 8], strides = [1, 1, 1]} : vector<2x8x96xf32> to vector<2x8x8xf32>
    %83 = vector.extract_strided_slice %17 {offsets = [0, 0, 56], sizes = [2, 8, 8], strides = [1, 1, 1]} : vector<2x8x96xf32> to vector<2x8x8xf32>
    %84 = vector.extract_strided_slice %17 {offsets = [0, 0, 88], sizes = [2, 8, 8], strides = [1, 1, 1]} : vector<2x8x96xf32> to vector<2x8x8xf32>
    "tpu.trace_start"() <{level = 10 : i32, message = "bqd,bkd->bqk"}> : () -> ()
    %cst_30 = arith.constant dense<0.000000e+00> : vector<2x8x8xf32>
    %85 = tpu.matmul %82, %83, %cst_30 {dimension_numbers = #tpu.dot_dimension_numbers<[2], [2], [1], [1], [0, 0, 0, 1, 1, 1], [0], [0]>} : vector<2x8x8xf32>, vector<2x8x8xf32>, vector<2x8x8xf32> -> vector<2x8x8xf32>
    "tpu.trace_stop"() : () -> ()
    %cst_31 = arith.constant 0.353553385 : f32
    %86 = vector.broadcast %cst_31 : f32 to vector<2x8x8xf32>
    %87 = arith.mulf %85, %86 : vector<2x8x8xf32>
    %cst_32 = arith.constant dense<0xFF800000> : vector<2x8xf32>
    %88 = vector.multi_reduction <maximumf>, %87, %cst_32 [2] : vector<2x8x8xf32> to vector<2x8xf32>
    %89 = vector.shape_cast %88 : vector<2x8xf32> to vector<2x8x1xf32>
    %90 = vector.broadcast %89 : vector<2x8x1xf32> to vector<2x8x8xf32>
    %91 = arith.subf %87, %90 : vector<2x8x8xf32>
    %92 = math.exp %91 : vector<2x8x8xf32>
    %cst_33 = arith.constant dense<0.000000e+00> : vector<2x8xf32>
    %93 = vector.multi_reduction <add>, %92, %cst_33 [2] : vector<2x8x8xf32> to vector<2x8xf32>
    %94 = vector.shape_cast %93 : vector<2x8xf32> to vector<2x8x1xf32>
    %95 = tpu.reciprocal %94 {approx = true} : vector<2x8x1xf32> -> vector<2x8x1xf32>
    %96 = vector.broadcast %95 : vector<2x8x1xf32> to vector<2x8x8xf32>
    %97 = arith.mulf %92, %96 : vector<2x8x8xf32>
    "tpu.trace_start"() <{level = 10 : i32, message = "bqk,bkd->bqd"}> : () -> ()
    %cst_34 = arith.constant dense<0.000000e+00> : vector<2x8x8xf32>
    %98 = tpu.matmul %97, %84, %cst_34 {dimension_numbers = #tpu.dot_dimension_numbers<[2], [1], [1], [2], [0, 0, 0, 1, 1, 2], [0], [0]>} : vector<2x8x8xf32>, vector<2x8x8xf32>, vector<2x8x8xf32> -> vector<2x8x8xf32>
    "tpu.trace_stop"() : () -> ()
    %99 = vector.shape_cast %98 : vector<2x8x8xf32> to vector<16x8xf32>
    %100 = vector.extract_strided_slice %1 {offsets = [24, 0], sizes = [8, 32], strides = [1, 1]} : vector<32x32xf32> to vector<8x32xf32>
    %cst_35 = arith.constant dense<0.000000e+00> : vector<16x32xf32>
    %101 = tpu.matmul %99, %100, %cst_35 {dimension_numbers = #tpu.dot_dimension_numbers<[1], [0], [0], [1], [0, 0, 1, 1], [], []>} : vector<16x8xf32>, vector<8x32xf32>, vector<16x32xf32> -> vector<16x32xf32>
    %102 = arith.addf %81, %101 : vector<16x32xf32>
    %103 = vector.broadcast %6 : vector<1x32xf32> to vector<16x32xf32>
    %104 = arith.addf %102, %103 : vector<16x32xf32>
    %105 = arith.addf %13, %104 : vector<16x32xf32>
    %cst_36 = arith.constant dense<0.000000e+00> : vector<16xf32>
    %106 = vector.multi_reduction <add>, %105, %cst_36 [1] : vector<16x32xf32> to vector<16xf32>
    %107 = vector.shape_cast %106 : vector<16xf32> to vector<16x1xf32>
    %cst_37 = arith.constant 3.200000e+01 : f32
    %108 = vector.broadcast %cst_37 : f32 to vector<16x1xf32>
    %109 = arith.divf %107, %108 : vector<16x1xf32>
    %110 = vector.broadcast %109 : vector<16x1xf32> to vector<16x32xf32>
    %111 = arith.subf %105, %110 : vector<16x32xf32>
    %112 = arith.mulf %111, %111 : vector<16x32xf32>
    %cst_38 = arith.constant dense<0.000000e+00> : vector<16xf32>
    %113 = vector.multi_reduction <add>, %112, %cst_38 [1] : vector<16x32xf32> to vector<16xf32>
    %114 = vector.shape_cast %113 : vector<16xf32> to vector<16x1xf32>
    %cst_39 = arith.constant 3.200000e+01 : f32
    %115 = vector.broadcast %cst_39 : f32 to vector<16x1xf32>
    %116 = arith.divf %114, %115 : vector<16x1xf32>
    %117 = vector.broadcast %109 : vector<16x1xf32> to vector<16x32xf32>
    %118 = arith.subf %105, %117 : vector<16x32xf32>
    %cst_40 = arith.constant 9.99999974E-6 : f32
    %119 = vector.broadcast %cst_40 : f32 to vector<16x1xf32>
    %120 = arith.addf %116, %119 : vector<16x1xf32>
    %121 = math.rsqrt %120 : vector<16x1xf32>
    %122 = vector.broadcast %121 : vector<16x1xf32> to vector<16x32xf32>
    %123 = arith.mulf %118, %122 : vector<16x32xf32>
    %124 = vector.broadcast %9 : vector<1x32xf32> to vector<16x32xf32>
    %125 = arith.mulf %123, %124 : vector<16x32xf32>
    %126 = vector.broadcast %10 : vector<1x32xf32> to vector<16x32xf32>
    %127 = arith.addf %125, %126 : vector<16x32xf32>
    %cst_41 = arith.constant dense<0.000000e+00> : vector<16x64xf32>
    %128 = tpu.matmul %127, %2, %cst_41 {dimension_numbers = #tpu.dot_dimension_numbers<[1], [0], [0], [1], [0, 0, 1, 1], [], []>} : vector<16x32xf32>, vector<32x64xf32>, vector<16x64xf32> -> vector<16x64xf32>
    %129 = vector.broadcast %7 : vector<1x64xf32> to vector<16x64xf32>
    %130 = arith.addf %128, %129 : vector<16x64xf32>
    %cst_42 = arith.constant 0.000000e+00 : f32
    %131 = vector.broadcast %cst_42 : f32 to vector<16x64xf32>
    %132 = arith.maximumf %130, %131 : vector<16x64xf32>
    %cst_43 = arith.constant dense<0.000000e+00> : vector<16x32xf32>
    %133 = tpu.matmul %132, %3, %cst_43 {dimension_numbers = #tpu.dot_dimension_numbers<[1], [0], [0], [1], [0, 0, 1, 1], [], []>} : vector<16x64xf32>, vector<64x32xf32>, vector<16x32xf32> -> vector<16x32xf32>
    %134 = vector.broadcast %8 : vector<1x32xf32> to vector<16x32xf32>
    %135 = arith.addf %133, %134 : vector<16x32xf32>
    %136 = arith.addf %127, %135 : vector<16x32xf32>
    %cst_44 = arith.constant dense<0.000000e+00> : vector<16xf32>
    %137 = vector.multi_reduction <add>, %136, %cst_44 [1] : vector<16x32xf32> to vector<16xf32>
    %138 = vector.shape_cast %137 : vector<16xf32> to vector<16x1xf32>
    %cst_45 = arith.constant 3.200000e+01 : f32
    %139 = vector.broadcast %cst_45 : f32 to vector<16x1xf32>
    %140 = arith.divf %138, %139 : vector<16x1xf32>
    %141 = vector.broadcast %140 : vector<16x1xf32> to vector<16x32xf32>
    %142 = arith.subf %136, %141 : vector<16x32xf32>
    %143 = arith.mulf %142, %142 : vector<16x32xf32>
    %cst_46 = arith.constant dense<0.000000e+00> : vector<16xf32>
    %144 = vector.multi_reduction <add>, %143, %cst_46 [1] : vector<16x32xf32> to vector<16xf32>
    %145 = vector.shape_cast %144 : vector<16xf32> to vector<16x1xf32>
    %cst_47 = arith.constant 3.200000e+01 : f32
    %146 = vector.broadcast %cst_47 : f32 to vector<16x1xf32>
    %147 = arith.divf %145, %146 : vector<16x1xf32>
    %148 = vector.broadcast %140 : vector<16x1xf32> to vector<16x32xf32>
    %149 = arith.subf %136, %148 : vector<16x32xf32>
    %cst_48 = arith.constant 9.99999974E-6 : f32
    %150 = vector.broadcast %cst_48 : f32 to vector<16x1xf32>
    %151 = arith.addf %147, %150 : vector<16x1xf32>
    %152 = math.rsqrt %151 : vector<16x1xf32>
    %153 = vector.broadcast %152 : vector<16x1xf32> to vector<16x32xf32>
    %154 = arith.mulf %149, %153 : vector<16x32xf32>
    %155 = vector.broadcast %11 : vector<1x32xf32> to vector<16x32xf32>
    %156 = arith.mulf %154, %155 : vector<16x32xf32>
    %157 = vector.broadcast %12 : vector<1x32xf32> to vector<16x32xf32>
    %158 = arith.addf %156, %157 : vector<16x32xf32>
    %cst_49 = arith.constant dense<0.000000e+00> : vector<16x96xf32>
    %159 = tpu.matmul %158, %0, %cst_49 {dimension_numbers = #tpu.dot_dimension_numbers<[1], [0], [0], [1], [0, 0, 1, 1], [], []>} : vector<16x32xf32>, vector<32x96xf32>, vector<16x96xf32> -> vector<16x96xf32>
    %160 = vector.broadcast %5 : vector<1x96xf32> to vector<16x96xf32>
    %161 = arith.addf %159, %160 : vector<16x96xf32>
    %162 = vector.shape_cast %161 : vector<16x96xf32> to vector<2x8x96xf32>
    %cst_50 = arith.constant 0.000000e+00 : f32
    %163 = vector.broadcast %cst_50 : f32 to vector<16x32xf32>
    %164 = vector.extract_strided_slice %162 {offsets = [0, 0, 0], sizes = [2, 8, 8], strides = [1, 1, 1]} : vector<2x8x96xf32> to vector<2x8x8xf32>
    %165 = vector.extract_strided_slice %162 {offsets = [0, 0, 32], sizes = [2, 8, 8], strides = [1, 1, 1]} : vector<2x8x96xf32> to vector<2x8x8xf32>
    %166 = vector.extract_strided_slice %162 {offsets = [0, 0, 64], sizes = [2, 8, 8], strides = [1, 1, 1]} : vector<2x8x96xf32> to vector<2x8x8xf32>
    "tpu.trace_start"() <{level = 10 : i32, message = "bqd,bkd->bqk"}> : () -> ()
    %cst_51 = arith.constant dense<0.000000e+00> : vector<2x8x8xf32>
    %167 = tpu.matmul %164, %165, %cst_51 {dimension_numbers = #tpu.dot_dimension_numbers<[2], [2], [1], [1], [0, 0, 0, 1, 1, 1], [0], [0]>} : vector<2x8x8xf32>, vector<2x8x8xf32>, vector<2x8x8xf32> -> vector<2x8x8xf32>
    "tpu.trace_stop"() : () -> ()
    %cst_52 = arith.constant 0.353553385 : f32
    %168 = vector.broadcast %cst_52 : f32 to vector<2x8x8xf32>
    %169 = arith.mulf %167, %168 : vector<2x8x8xf32>
    %cst_53 = arith.constant dense<0xFF800000> : vector<2x8xf32>
    %170 = vector.multi_reduction <maximumf>, %169, %cst_53 [2] : vector<2x8x8xf32> to vector<2x8xf32>
    %171 = vector.shape_cast %170 : vector<2x8xf32> to vector<2x8x1xf32>
    %172 = vector.broadcast %171 : vector<2x8x1xf32> to vector<2x8x8xf32>
    %173 = arith.subf %169, %172 : vector<2x8x8xf32>
    %174 = math.exp %173 : vector<2x8x8xf32>
    %cst_54 = arith.constant dense<0.000000e+00> : vector<2x8xf32>
    %175 = vector.multi_reduction <add>, %174, %cst_54 [2] : vector<2x8x8xf32> to vector<2x8xf32>
    %176 = vector.shape_cast %175 : vector<2x8xf32> to vector<2x8x1xf32>
    %177 = tpu.reciprocal %176 {approx = true} : vector<2x8x1xf32> -> vector<2x8x1xf32>
    %178 = vector.broadcast %177 : vector<2x8x1xf32> to vector<2x8x8xf32>
    %179 = arith.mulf %174, %178 : vector<2x8x8xf32>
    "tpu.trace_start"() <{level = 10 : i32, message = "bqk,bkd->bqd"}> : () -> ()
    %cst_55 = arith.constant dense<0.000000e+00> : vector<2x8x8xf32>
    %180 = tpu.matmul %179, %166, %cst_55 {dimension_numbers = #tpu.dot_dimension_numbers<[2], [1], [1], [2], [0, 0, 0, 1, 1, 2], [0], [0]>} : vector<2x8x8xf32>, vector<2x8x8xf32>, vector<2x8x8xf32> -> vector<2x8x8xf32>
    "tpu.trace_stop"() : () -> ()
    %181 = vector.shape_cast %180 : vector<2x8x8xf32> to vector<16x8xf32>
    %182 = vector.extract_strided_slice %1 {offsets = [0, 0], sizes = [8, 32], strides = [1, 1]} : vector<32x32xf32> to vector<8x32xf32>
    %cst_56 = arith.constant dense<0.000000e+00> : vector<16x32xf32>
    %183 = tpu.matmul %181, %182, %cst_56 {dimension_numbers = #tpu.dot_dimension_numbers<[1], [0], [0], [1], [0, 0, 1, 1], [], []>} : vector<16x8xf32>, vector<8x32xf32>, vector<16x32xf32> -> vector<16x32xf32>
    %184 = arith.addf %163, %183 : vector<16x32xf32>
    %185 = vector.extract_strided_slice %162 {offsets = [0, 0, 8], sizes = [2, 8, 8], strides = [1, 1, 1]} : vector<2x8x96xf32> to vector<2x8x8xf32>
    %186 = vector.extract_strided_slice %162 {offsets = [0, 0, 40], sizes = [2, 8, 8], strides = [1, 1, 1]} : vector<2x8x96xf32> to vector<2x8x8xf32>
    %187 = vector.extract_strided_slice %162 {offsets = [0, 0, 72], sizes = [2, 8, 8], strides = [1, 1, 1]} : vector<2x8x96xf32> to vector<2x8x8xf32>
    "tpu.trace_start"() <{level = 10 : i32, message = "bqd,bkd->bqk"}> : () -> ()
    %cst_57 = arith.constant dense<0.000000e+00> : vector<2x8x8xf32>
    %188 = tpu.matmul %185, %186, %cst_57 {dimension_numbers = #tpu.dot_dimension_numbers<[2], [2], [1], [1], [0, 0, 0, 1, 1, 1], [0], [0]>} : vector<2x8x8xf32>, vector<2x8x8xf32>, vector<2x8x8xf32> -> vector<2x8x8xf32>
    "tpu.trace_stop"() : () -> ()
    %cst_58 = arith.constant 0.353553385 : f32
    %189 = vector.broadcast %cst_58 : f32 to vector<2x8x8xf32>
    %190 = arith.mulf %188, %189 : vector<2x8x8xf32>
    %cst_59 = arith.constant dense<0xFF800000> : vector<2x8xf32>
    %191 = vector.multi_reduction <maximumf>, %190, %cst_59 [2] : vector<2x8x8xf32> to vector<2x8xf32>
    %192 = vector.shape_cast %191 : vector<2x8xf32> to vector<2x8x1xf32>
    %193 = vector.broadcast %192 : vector<2x8x1xf32> to vector<2x8x8xf32>
    %194 = arith.subf %190, %193 : vector<2x8x8xf32>
    %195 = math.exp %194 : vector<2x8x8xf32>
    %cst_60 = arith.constant dense<0.000000e+00> : vector<2x8xf32>
    %196 = vector.multi_reduction <add>, %195, %cst_60 [2] : vector<2x8x8xf32> to vector<2x8xf32>
    %197 = vector.shape_cast %196 : vector<2x8xf32> to vector<2x8x1xf32>
    %198 = tpu.reciprocal %197 {approx = true} : vector<2x8x1xf32> -> vector<2x8x1xf32>
    %199 = vector.broadcast %198 : vector<2x8x1xf32> to vector<2x8x8xf32>
    %200 = arith.mulf %195, %199 : vector<2x8x8xf32>
    "tpu.trace_start"() <{level = 10 : i32, message = "bqk,bkd->bqd"}> : () -> ()
    %cst_61 = arith.constant dense<0.000000e+00> : vector<2x8x8xf32>
    %201 = tpu.matmul %200, %187, %cst_61 {dimension_numbers = #tpu.dot_dimension_numbers<[2], [1], [1], [2], [0, 0, 0, 1, 1, 2], [0], [0]>} : vector<2x8x8xf32>, vector<2x8x8xf32>, vector<2x8x8xf32> -> vector<2x8x8xf32>
    "tpu.trace_stop"() : () -> ()
    %202 = vector.shape_cast %201 : vector<2x8x8xf32> to vector<16x8xf32>
    %203 = vector.extract_strided_slice %1 {offsets = [8, 0], sizes = [8, 32], strides = [1, 1]} : vector<32x32xf32> to vector<8x32xf32>
    %cst_62 = arith.constant dense<0.000000e+00> : vector<16x32xf32>
    %204 = tpu.matmul %202, %203, %cst_62 {dimension_numbers = #tpu.dot_dimension_numbers<[1], [0], [0], [1], [0, 0, 1, 1], [], []>} : vector<16x8xf32>, vector<8x32xf32>, vector<16x32xf32> -> vector<16x32xf32>
    %205 = arith.addf %184, %204 : vector<16x32xf32>
    %206 = vector.extract_strided_slice %162 {offsets = [0, 0, 16], sizes = [2, 8, 8], strides = [1, 1, 1]} : vector<2x8x96xf32> to vector<2x8x8xf32>
    %207 = vector.extract_strided_slice %162 {offsets = [0, 0, 48], sizes = [2, 8, 8], strides = [1, 1, 1]} : vector<2x8x96xf32> to vector<2x8x8xf32>
    %208 = vector.extract_strided_slice %162 {offsets = [0, 0, 80], sizes = [2, 8, 8], strides = [1, 1, 1]} : vector<2x8x96xf32> to vector<2x8x8xf32>
    "tpu.trace_start"() <{level = 10 : i32, message = "bqd,bkd->bqk"}> : () -> ()
    %cst_63 = arith.constant dense<0.000000e+00> : vector<2x8x8xf32>
    %209 = tpu.matmul %206, %207, %cst_63 {dimension_numbers = #tpu.dot_dimension_numbers<[2], [2], [1], [1], [0, 0, 0, 1, 1, 1], [0], [0]>} : vector<2x8x8xf32>, vector<2x8x8xf32>, vector<2x8x8xf32> -> vector<2x8x8xf32>
    "tpu.trace_stop"() : () -> ()
    %cst_64 = arith.constant 0.353553385 : f32
    %210 = vector.broadcast %cst_64 : f32 to vector<2x8x8xf32>
    %211 = arith.mulf %209, %210 : vector<2x8x8xf32>
    %cst_65 = arith.constant dense<0xFF800000> : vector<2x8xf32>
    %212 = vector.multi_reduction <maximumf>, %211, %cst_65 [2] : vector<2x8x8xf32> to vector<2x8xf32>
    %213 = vector.shape_cast %212 : vector<2x8xf32> to vector<2x8x1xf32>
    %214 = vector.broadcast %213 : vector<2x8x1xf32> to vector<2x8x8xf32>
    %215 = arith.subf %211, %214 : vector<2x8x8xf32>
    %216 = math.exp %215 : vector<2x8x8xf32>
    %cst_66 = arith.constant dense<0.000000e+00> : vector<2x8xf32>
    %217 = vector.multi_reduction <add>, %216, %cst_66 [2] : vector<2x8x8xf32> to vector<2x8xf32>
    %218 = vector.shape_cast %217 : vector<2x8xf32> to vector<2x8x1xf32>
    %219 = tpu.reciprocal %218 {approx = true} : vector<2x8x1xf32> -> vector<2x8x1xf32>
    %220 = vector.broadcast %219 : vector<2x8x1xf32> to vector<2x8x8xf32>
    %221 = arith.mulf %216, %220 : vector<2x8x8xf32>
    "tpu.trace_start"() <{level = 10 : i32, message = "bqk,bkd->bqd"}> : () -> ()
    %cst_67 = arith.constant dense<0.000000e+00> : vector<2x8x8xf32>
    %222 = tpu.matmul %221, %208, %cst_67 {dimension_numbers = #tpu.dot_dimension_numbers<[2], [1], [1], [2], [0, 0, 0, 1, 1, 2], [0], [0]>} : vector<2x8x8xf32>, vector<2x8x8xf32>, vector<2x8x8xf32> -> vector<2x8x8xf32>
    "tpu.trace_stop"() : () -> ()
    %223 = vector.shape_cast %222 : vector<2x8x8xf32> to vector<16x8xf32>
    %224 = vector.extract_strided_slice %1 {offsets = [16, 0], sizes = [8, 32], strides = [1, 1]} : vector<32x32xf32> to vector<8x32xf32>
    %cst_68 = arith.constant dense<0.000000e+00> : vector<16x32xf32>
    %225 = tpu.matmul %223, %224, %cst_68 {dimension_numbers = #tpu.dot_dimension_numbers<[1], [0], [0], [1], [0, 0, 1, 1], [], []>} : vector<16x8xf32>, vector<8x32xf32>, vector<16x32xf32> -> vector<16x32xf32>
    %226 = arith.addf %205, %225 : vector<16x32xf32>
    %227 = vector.extract_strided_slice %162 {offsets = [0, 0, 24], sizes = [2, 8, 8], strides = [1, 1, 1]} : vector<2x8x96xf32> to vector<2x8x8xf32>
    %228 = vector.extract_strided_slice %162 {offsets = [0, 0, 56], sizes = [2, 8, 8], strides = [1, 1, 1]} : vector<2x8x96xf32> to vector<2x8x8xf32>
    %229 = vector.extract_strided_slice %162 {offsets = [0, 0, 88], sizes = [2, 8, 8], strides = [1, 1, 1]} : vector<2x8x96xf32> to vector<2x8x8xf32>
    "tpu.trace_start"() <{level = 10 : i32, message = "bqd,bkd->bqk"}> : () -> ()
    %cst_69 = arith.constant dense<0.000000e+00> : vector<2x8x8xf32>
    %230 = tpu.matmul %227, %228, %cst_69 {dimension_numbers = #tpu.dot_dimension_numbers<[2], [2], [1], [1], [0, 0, 0, 1, 1, 1], [0], [0]>} : vector<2x8x8xf32>, vector<2x8x8xf32>, vector<2x8x8xf32> -> vector<2x8x8xf32>
    "tpu.trace_stop"() : () -> ()
    %cst_70 = arith.constant 0.353553385 : f32
    %231 = vector.broadcast %cst_70 : f32 to vector<2x8x8xf32>
    %232 = arith.mulf %230, %231 : vector<2x8x8xf32>
    %cst_71 = arith.constant dense<0xFF800000> : vector<2x8xf32>
    %233 = vector.multi_reduction <maximumf>, %232, %cst_71 [2] : vector<2x8x8xf32> to vector<2x8xf32>
    %234 = vector.shape_cast %233 : vector<2x8xf32> to vector<2x8x1xf32>
    %235 = vector.broadcast %234 : vector<2x8x1xf32> to vector<2x8x8xf32>
    %236 = arith.subf %232, %235 : vector<2x8x8xf32>
    %237 = math.exp %236 : vector<2x8x8xf32>
    %cst_72 = arith.constant dense<0.000000e+00> : vector<2x8xf32>
    %238 = vector.multi_reduction <add>, %237, %cst_72 [2] : vector<2x8x8xf32> to vector<2x8xf32>
    %239 = vector.shape_cast %238 : vector<2x8xf32> to vector<2x8x1xf32>
    %240 = tpu.reciprocal %239 {approx = true} : vector<2x8x1xf32> -> vector<2x8x1xf32>
    %241 = vector.broadcast %240 : vector<2x8x1xf32> to vector<2x8x8xf32>
    %242 = arith.mulf %237, %241 : vector<2x8x8xf32>
    "tpu.trace_start"() <{level = 10 : i32, message = "bqk,bkd->bqd"}> : () -> ()
    %cst_73 = arith.constant dense<0.000000e+00> : vector<2x8x8xf32>
    %243 = tpu.matmul %242, %229, %cst_73 {dimension_numbers = #tpu.dot_dimension_numbers<[2], [1], [1], [2], [0, 0, 0, 1, 1, 2], [0], [0]>} : vector<2x8x8xf32>, vector<2x8x8xf32>, vector<2x8x8xf32> -> vector<2x8x8xf32>
    "tpu.trace_stop"() : () -> ()
    %244 = vector.shape_cast %243 : vector<2x8x8xf32> to vector<16x8xf32>
    %245 = vector.extract_strided_slice %1 {offsets = [24, 0], sizes = [8, 32], strides = [1, 1]} : vector<32x32xf32> to vector<8x32xf32>
    %cst_74 = arith.constant dense<0.000000e+00> : vector<16x32xf32>
    %246 = tpu.matmul %244, %245, %cst_74 {dimension_numbers = #tpu.dot_dimension_numbers<[1], [0], [0], [1], [0, 0, 1, 1], [], []>} : vector<16x8xf32>, vector<8x32xf32>, vector<16x32xf32> -> vector<16x32xf32>
    %247 = arith.addf %226, %246 : vector<16x32xf32>
    %248 = vector.broadcast %6 : vector<1x32xf32> to vector<16x32xf32>
    %249 = arith.addf %247, %248 : vector<16x32xf32>
    %250 = arith.addf %158, %249 : vector<16x32xf32>
    %cst_75 = arith.constant dense<0.000000e+00> : vector<16xf32>
    %251 = vector.multi_reduction <add>, %250, %cst_75 [1] : vector<16x32xf32> to vector<16xf32>
    %252 = vector.shape_cast %251 : vector<16xf32> to vector<16x1xf32>
    %cst_76 = arith.constant 3.200000e+01 : f32
    %253 = vector.broadcast %cst_76 : f32 to vector<16x1xf32>
    %254 = arith.divf %252, %253 : vector<16x1xf32>
    %255 = vector.broadcast %254 : vector<16x1xf32> to vector<16x32xf32>
    %256 = arith.subf %250, %255 : vector<16x32xf32>
    %257 = arith.mulf %256, %256 : vector<16x32xf32>
    %cst_77 = arith.constant dense<0.000000e+00> : vector<16xf32>
    %258 = vector.multi_reduction <add>, %257, %cst_77 [1] : vector<16x32xf32> to vector<16xf32>
    %259 = vector.shape_cast %258 : vector<16xf32> to vector<16x1xf32>
    %cst_78 = arith.constant 3.200000e+01 : f32
    %260 = vector.broadcast %cst_78 : f32 to vector<16x1xf32>
    %261 = arith.divf %259, %260 : vector<16x1xf32>
    %262 = vector.broadcast %254 : vector<16x1xf32> to vector<16x32xf32>
    %263 = arith.subf %250, %262 : vector<16x32xf32>
    %cst_79 = arith.constant 9.99999974E-6 : f32
    %264 = vector.broadcast %cst_79 : f32 to vector<16x1xf32>
    %265 = arith.addf %261, %264 : vector<16x1xf32>
    %266 = math.rsqrt %265 : vector<16x1xf32>
    %267 = vector.broadcast %266 : vector<16x1xf32> to vector<16x32xf32>
    %268 = arith.mulf %263, %267 : vector<16x32xf32>
    %269 = vector.broadcast %9 : vector<1x32xf32> to vector<16x32xf32>
    %270 = arith.mulf %268, %269 : vector<16x32xf32>
    %271 = vector.broadcast %10 : vector<1x32xf32> to vector<16x32xf32>
    %272 = arith.addf %270, %271 : vector<16x32xf32>
    %cst_80 = arith.constant dense<0.000000e+00> : vector<16x64xf32>
    %273 = tpu.matmul %272, %2, %cst_80 {dimension_numbers = #tpu.dot_dimension_numbers<[1], [0], [0], [1], [0, 0, 1, 1], [], []>} : vector<16x32xf32>, vector<32x64xf32>, vector<16x64xf32> -> vector<16x64xf32>
    %274 = vector.broadcast %7 : vector<1x64xf32> to vector<16x64xf32>
    %275 = arith.addf %273, %274 : vector<16x64xf32>
    %cst_81 = arith.constant 0.000000e+00 : f32
    %276 = vector.broadcast %cst_81 : f32 to vector<16x64xf32>
    %277 = arith.maximumf %275, %276 : vector<16x64xf32>
    %cst_82 = arith.constant dense<0.000000e+00> : vector<16x32xf32>
    %278 = tpu.matmul %277, %3, %cst_82 {dimension_numbers = #tpu.dot_dimension_numbers<[1], [0], [0], [1], [0, 0, 1, 1], [], []>} : vector<16x64xf32>, vector<64x32xf32>, vector<16x32xf32> -> vector<16x32xf32>
    %279 = vector.broadcast %8 : vector<1x32xf32> to vector<16x32xf32>
    %280 = arith.addf %278, %279 : vector<16x32xf32>
    %281 = arith.addf %272, %280 : vector<16x32xf32>
    %cst_83 = arith.constant dense<0.000000e+00> : vector<16xf32>
    %282 = vector.multi_reduction <add>, %281, %cst_83 [1] : vector<16x32xf32> to vector<16xf32>
    %283 = vector.shape_cast %282 : vector<16xf32> to vector<16x1xf32>
    %cst_84 = arith.constant 3.200000e+01 : f32
    %284 = vector.broadcast %cst_84 : f32 to vector<16x1xf32>
    %285 = arith.divf %283, %284 : vector<16x1xf32>
    %286 = vector.broadcast %285 : vector<16x1xf32> to vector<16x32xf32>
    %287 = arith.subf %281, %286 : vector<16x32xf32>
    %288 = arith.mulf %287, %287 : vector<16x32xf32>
    %cst_85 = arith.constant dense<0.000000e+00> : vector<16xf32>
    %289 = vector.multi_reduction <add>, %288, %cst_85 [1] : vector<16x32xf32> to vector<16xf32>
    %290 = vector.shape_cast %289 : vector<16xf32> to vector<16x1xf32>
    %cst_86 = arith.constant 3.200000e+01 : f32
    %291 = vector.broadcast %cst_86 : f32 to vector<16x1xf32>
    %292 = arith.divf %290, %291 : vector<16x1xf32>
    %293 = vector.broadcast %285 : vector<16x1xf32> to vector<16x32xf32>
    %294 = arith.subf %281, %293 : vector<16x32xf32>
    %cst_87 = arith.constant 9.99999974E-6 : f32
    %295 = vector.broadcast %cst_87 : f32 to vector<16x1xf32>
    %296 = arith.addf %292, %295 : vector<16x1xf32>
    %297 = math.rsqrt %296 : vector<16x1xf32>
    %298 = vector.broadcast %297 : vector<16x1xf32> to vector<16x32xf32>
    %299 = arith.mulf %294, %298 : vector<16x32xf32>
    %300 = vector.broadcast %11 : vector<1x32xf32> to vector<16x32xf32>
    %301 = arith.mulf %299, %300 : vector<16x32xf32>
    %302 = vector.broadcast %12 : vector<1x32xf32> to vector<16x32xf32>
    %303 = arith.addf %301, %302 : vector<16x32xf32>
    %cst_88 = arith.constant dense<0.000000e+00> : vector<16x96xf32>
    %304 = tpu.matmul %303, %0, %cst_88 {dimension_numbers = #tpu.dot_dimension_numbers<[1], [0], [0], [1], [0, 0, 1, 1], [], []>} : vector<16x32xf32>, vector<32x96xf32>, vector<16x96xf32> -> vector<16x96xf32>
    %305 = vector.broadcast %5 : vector<1x96xf32> to vector<16x96xf32>
    %306 = arith.addf %304, %305 : vector<16x96xf32>
    %307 = vector.shape_cast %306 : vector<16x96xf32> to vector<2x8x96xf32>
    %cst_89 = arith.constant 0.000000e+00 : f32
    %308 = vector.broadcast %cst_89 : f32 to vector<16x32xf32>
    %309 = vector.extract_strided_slice %307 {offsets = [0, 0, 0], sizes = [2, 8, 8], strides = [1, 1, 1]} : vector<2x8x96xf32> to vector<2x8x8xf32>
    %310 = vector.extract_strided_slice %307 {offsets = [0, 0, 32], sizes = [2, 8, 8], strides = [1, 1, 1]} : vector<2x8x96xf32> to vector<2x8x8xf32>
    %311 = vector.extract_strided_slice %307 {offsets = [0, 0, 64], sizes = [2, 8, 8], strides = [1, 1, 1]} : vector<2x8x96xf32> to vector<2x8x8xf32>
    "tpu.trace_start"() <{level = 10 : i32, message = "bqd,bkd->bqk"}> : () -> ()
    %cst_90 = arith.constant dense<0.000000e+00> : vector<2x8x8xf32>
    %312 = tpu.matmul %309, %310, %cst_90 {dimension_numbers = #tpu.dot_dimension_numbers<[2], [2], [1], [1], [0, 0, 0, 1, 1, 1], [0], [0]>} : vector<2x8x8xf32>, vector<2x8x8xf32>, vector<2x8x8xf32> -> vector<2x8x8xf32>
    "tpu.trace_stop"() : () -> ()
    %cst_91 = arith.constant 0.353553385 : f32
    %313 = vector.broadcast %cst_91 : f32 to vector<2x8x8xf32>
    %314 = arith.mulf %312, %313 : vector<2x8x8xf32>
    %cst_92 = arith.constant dense<0xFF800000> : vector<2x8xf32>
    %315 = vector.multi_reduction <maximumf>, %314, %cst_92 [2] : vector<2x8x8xf32> to vector<2x8xf32>
    %316 = vector.shape_cast %315 : vector<2x8xf32> to vector<2x8x1xf32>
    %317 = vector.broadcast %316 : vector<2x8x1xf32> to vector<2x8x8xf32>
    %318 = arith.subf %314, %317 : vector<2x8x8xf32>
    %319 = math.exp %318 : vector<2x8x8xf32>
    %cst_93 = arith.constant dense<0.000000e+00> : vector<2x8xf32>
    %320 = vector.multi_reduction <add>, %319, %cst_93 [2] : vector<2x8x8xf32> to vector<2x8xf32>
    %321 = vector.shape_cast %320 : vector<2x8xf32> to vector<2x8x1xf32>
    %322 = tpu.reciprocal %321 {approx = true} : vector<2x8x1xf32> -> vector<2x8x1xf32>
    %323 = vector.broadcast %322 : vector<2x8x1xf32> to vector<2x8x8xf32>
    %324 = arith.mulf %319, %323 : vector<2x8x8xf32>
    "tpu.trace_start"() <{level = 10 : i32, message = "bqk,bkd->bqd"}> : () -> ()
    %cst_94 = arith.constant dense<0.000000e+00> : vector<2x8x8xf32>
    %325 = tpu.matmul %324, %311, %cst_94 {dimension_numbers = #tpu.dot_dimension_numbers<[2], [1], [1], [2], [0, 0, 0, 1, 1, 2], [0], [0]>} : vector<2x8x8xf32>, vector<2x8x8xf32>, vector<2x8x8xf32> -> vector<2x8x8xf32>
    "tpu.trace_stop"() : () -> ()
    %326 = vector.shape_cast %325 : vector<2x8x8xf32> to vector<16x8xf32>
    %327 = vector.extract_strided_slice %1 {offsets = [0, 0], sizes = [8, 32], strides = [1, 1]} : vector<32x32xf32> to vector<8x32xf32>
    %cst_95 = arith.constant dense<0.000000e+00> : vector<16x32xf32>
    %328 = tpu.matmul %326, %327, %cst_95 {dimension_numbers = #tpu.dot_dimension_numbers<[1], [0], [0], [1], [0, 0, 1, 1], [], []>} : vector<16x8xf32>, vector<8x32xf32>, vector<16x32xf32> -> vector<16x32xf32>
    %329 = arith.addf %308, %328 : vector<16x32xf32>
    %330 = vector.extract_strided_slice %307 {offsets = [0, 0, 8], sizes = [2, 8, 8], strides = [1, 1, 1]} : vector<2x8x96xf32> to vector<2x8x8xf32>
    %331 = vector.extract_strided_slice %307 {offsets = [0, 0, 40], sizes = [2, 8, 8], strides = [1, 1, 1]} : vector<2x8x96xf32> to vector<2x8x8xf32>
    %332 = vector.extract_strided_slice %307 {offsets = [0, 0, 72], sizes = [2, 8, 8], strides = [1, 1, 1]} : vector<2x8x96xf32> to vector<2x8x8xf32>
    "tpu.trace_start"() <{level = 10 : i32, message = "bqd,bkd->bqk"}> : () -> ()
    %cst_96 = arith.constant dense<0.000000e+00> : vector<2x8x8xf32>
    %333 = tpu.matmul %330, %331, %cst_96 {dimension_numbers = #tpu.dot_dimension_numbers<[2], [2], [1], [1], [0, 0, 0, 1, 1, 1], [0], [0]>} : vector<2x8x8xf32>, vector<2x8x8xf32>, vector<2x8x8xf32> -> vector<2x8x8xf32>
    "tpu.trace_stop"() : () -> ()
    %cst_97 = arith.constant 0.353553385 : f32
    %334 = vector.broadcast %cst_97 : f32 to vector<2x8x8xf32>
    %335 = arith.mulf %333, %334 : vector<2x8x8xf32>
    %cst_98 = arith.constant dense<0xFF800000> : vector<2x8xf32>
    %336 = vector.multi_reduction <maximumf>, %335, %cst_98 [2] : vector<2x8x8xf32> to vector<2x8xf32>
    %337 = vector.shape_cast %336 : vector<2x8xf32> to vector<2x8x1xf32>
    %338 = vector.broadcast %337 : vector<2x8x1xf32> to vector<2x8x8xf32>
    %339 = arith.subf %335, %338 : vector<2x8x8xf32>
    %340 = math.exp %339 : vector<2x8x8xf32>
    %cst_99 = arith.constant dense<0.000000e+00> : vector<2x8xf32>
    %341 = vector.multi_reduction <add>, %340, %cst_99 [2] : vector<2x8x8xf32> to vector<2x8xf32>
    %342 = vector.shape_cast %341 : vector<2x8xf32> to vector<2x8x1xf32>
    %343 = tpu.reciprocal %342 {approx = true} : vector<2x8x1xf32> -> vector<2x8x1xf32>
    %344 = vector.broadcast %343 : vector<2x8x1xf32> to vector<2x8x8xf32>
    %345 = arith.mulf %340, %344 : vector<2x8x8xf32>
    "tpu.trace_start"() <{level = 10 : i32, message = "bqk,bkd->bqd"}> : () -> ()
    %cst_100 = arith.constant dense<0.000000e+00> : vector<2x8x8xf32>
    %346 = tpu.matmul %345, %332, %cst_100 {dimension_numbers = #tpu.dot_dimension_numbers<[2], [1], [1], [2], [0, 0, 0, 1, 1, 2], [0], [0]>} : vector<2x8x8xf32>, vector<2x8x8xf32>, vector<2x8x8xf32> -> vector<2x8x8xf32>
    "tpu.trace_stop"() : () -> ()
    %347 = vector.shape_cast %346 : vector<2x8x8xf32> to vector<16x8xf32>
    %348 = vector.extract_strided_slice %1 {offsets = [8, 0], sizes = [8, 32], strides = [1, 1]} : vector<32x32xf32> to vector<8x32xf32>
    %cst_101 = arith.constant dense<0.000000e+00> : vector<16x32xf32>
    %349 = tpu.matmul %347, %348, %cst_101 {dimension_numbers = #tpu.dot_dimension_numbers<[1], [0], [0], [1], [0, 0, 1, 1], [], []>} : vector<16x8xf32>, vector<8x32xf32>, vector<16x32xf32> -> vector<16x32xf32>
    %350 = arith.addf %329, %349 : vector<16x32xf32>
    %351 = vector.extract_strided_slice %307 {offsets = [0, 0, 16], sizes = [2, 8, 8], strides = [1, 1, 1]} : vector<2x8x96xf32> to vector<2x8x8xf32>
    %352 = vector.extract_strided_slice %307 {offsets = [0, 0, 48], sizes = [2, 8, 8], strides = [1, 1, 1]} : vector<2x8x96xf32> to vector<2x8x8xf32>
    %353 = vector.extract_strided_slice %307 {offsets = [0, 0, 80], sizes = [2, 8, 8], strides = [1, 1, 1]} : vector<2x8x96xf32> to vector<2x8x8xf32>
    "tpu.trace_start"() <{level = 10 : i32, message = "bqd,bkd->bqk"}> : () -> ()
    %cst_102 = arith.constant dense<0.000000e+00> : vector<2x8x8xf32>
    %354 = tpu.matmul %351, %352, %cst_102 {dimension_numbers = #tpu.dot_dimension_numbers<[2], [2], [1], [1], [0, 0, 0, 1, 1, 1], [0], [0]>} : vector<2x8x8xf32>, vector<2x8x8xf32>, vector<2x8x8xf32> -> vector<2x8x8xf32>
    "tpu.trace_stop"() : () -> ()
    %cst_103 = arith.constant 0.353553385 : f32
    %355 = vector.broadcast %cst_103 : f32 to vector<2x8x8xf32>
    %356 = arith.mulf %354, %355 : vector<2x8x8xf32>
    %cst_104 = arith.constant dense<0xFF800000> : vector<2x8xf32>
    %357 = vector.multi_reduction <maximumf>, %356, %cst_104 [2] : vector<2x8x8xf32> to vector<2x8xf32>
    %358 = vector.shape_cast %357 : vector<2x8xf32> to vector<2x8x1xf32>
    %359 = vector.broadcast %358 : vector<2x8x1xf32> to vector<2x8x8xf32>
    %360 = arith.subf %356, %359 : vector<2x8x8xf32>
    %361 = math.exp %360 : vector<2x8x8xf32>
    %cst_105 = arith.constant dense<0.000000e+00> : vector<2x8xf32>
    %362 = vector.multi_reduction <add>, %361, %cst_105 [2] : vector<2x8x8xf32> to vector<2x8xf32>
    %363 = vector.shape_cast %362 : vector<2x8xf32> to vector<2x8x1xf32>
    %364 = tpu.reciprocal %363 {approx = true} : vector<2x8x1xf32> -> vector<2x8x1xf32>
    %365 = vector.broadcast %364 : vector<2x8x1xf32> to vector<2x8x8xf32>
    %366 = arith.mulf %361, %365 : vector<2x8x8xf32>
    "tpu.trace_start"() <{level = 10 : i32, message = "bqk,bkd->bqd"}> : () -> ()
    %cst_106 = arith.constant dense<0.000000e+00> : vector<2x8x8xf32>
    %367 = tpu.matmul %366, %353, %cst_106 {dimension_numbers = #tpu.dot_dimension_numbers<[2], [1], [1], [2], [0, 0, 0, 1, 1, 2], [0], [0]>} : vector<2x8x8xf32>, vector<2x8x8xf32>, vector<2x8x8xf32> -> vector<2x8x8xf32>
    "tpu.trace_stop"() : () -> ()
    %368 = vector.shape_cast %367 : vector<2x8x8xf32> to vector<16x8xf32>
    %369 = vector.extract_strided_slice %1 {offsets = [16, 0], sizes = [8, 32], strides = [1, 1]} : vector<32x32xf32> to vector<8x32xf32>
    %cst_107 = arith.constant dense<0.000000e+00> : vector<16x32xf32>
    %370 = tpu.matmul %368, %369, %cst_107 {dimension_numbers = #tpu.dot_dimension_numbers<[1], [0], [0], [1], [0, 0, 1, 1], [], []>} : vector<16x8xf32>, vector<8x32xf32>, vector<16x32xf32> -> vector<16x32xf32>
    %371 = arith.addf %350, %370 : vector<16x32xf32>
    %372 = vector.extract_strided_slice %307 {offsets = [0, 0, 24], sizes = [2, 8, 8], strides = [1, 1, 1]} : vector<2x8x96xf32> to vector<2x8x8xf32>
    %373 = vector.extract_strided_slice %307 {offsets = [0, 0, 56], sizes = [2, 8, 8], strides = [1, 1, 1]} : vector<2x8x96xf32> to vector<2x8x8xf32>
    %374 = vector.extract_strided_slice %307 {offsets = [0, 0, 88], sizes = [2, 8, 8], strides = [1, 1, 1]} : vector<2x8x96xf32> to vector<2x8x8xf32>
    "tpu.trace_start"() <{level = 10 : i32, message = "bqd,bkd->bqk"}> : () -> ()
    %cst_108 = arith.constant dense<0.000000e+00> : vector<2x8x8xf32>
    %375 = tpu.matmul %372, %373, %cst_108 {dimension_numbers = #tpu.dot_dimension_numbers<[2], [2], [1], [1], [0, 0, 0, 1, 1, 1], [0], [0]>} : vector<2x8x8xf32>, vector<2x8x8xf32>, vector<2x8x8xf32> -> vector<2x8x8xf32>
    "tpu.trace_stop"() : () -> ()
    %cst_109 = arith.constant 0.353553385 : f32
    %376 = vector.broadcast %cst_109 : f32 to vector<2x8x8xf32>
    %377 = arith.mulf %375, %376 : vector<2x8x8xf32>
    %cst_110 = arith.constant dense<0xFF800000> : vector<2x8xf32>
    %378 = vector.multi_reduction <maximumf>, %377, %cst_110 [2] : vector<2x8x8xf32> to vector<2x8xf32>
    %379 = vector.shape_cast %378 : vector<2x8xf32> to vector<2x8x1xf32>
    %380 = vector.broadcast %379 : vector<2x8x1xf32> to vector<2x8x8xf32>
    %381 = arith.subf %377, %380 : vector<2x8x8xf32>
    %382 = math.exp %381 : vector<2x8x8xf32>
    %cst_111 = arith.constant dense<0.000000e+00> : vector<2x8xf32>
    %383 = vector.multi_reduction <add>, %382, %cst_111 [2] : vector<2x8x8xf32> to vector<2x8xf32>
    %384 = vector.shape_cast %383 : vector<2x8xf32> to vector<2x8x1xf32>
    %385 = tpu.reciprocal %384 {approx = true} : vector<2x8x1xf32> -> vector<2x8x1xf32>
    %386 = vector.broadcast %385 : vector<2x8x1xf32> to vector<2x8x8xf32>
    %387 = arith.mulf %382, %386 : vector<2x8x8xf32>
    "tpu.trace_start"() <{level = 10 : i32, message = "bqk,bkd->bqd"}> : () -> ()
    %cst_112 = arith.constant dense<0.000000e+00> : vector<2x8x8xf32>
    %388 = tpu.matmul %387, %374, %cst_112 {dimension_numbers = #tpu.dot_dimension_numbers<[2], [1], [1], [2], [0, 0, 0, 1, 1, 2], [0], [0]>} : vector<2x8x8xf32>, vector<2x8x8xf32>, vector<2x8x8xf32> -> vector<2x8x8xf32>
    "tpu.trace_stop"() : () -> ()
    %389 = vector.shape_cast %388 : vector<2x8x8xf32> to vector<16x8xf32>
    %390 = vector.extract_strided_slice %1 {offsets = [24, 0], sizes = [8, 32], strides = [1, 1]} : vector<32x32xf32> to vector<8x32xf32>
    %cst_113 = arith.constant dense<0.000000e+00> : vector<16x32xf32>
    %391 = tpu.matmul %389, %390, %cst_113 {dimension_numbers = #tpu.dot_dimension_numbers<[1], [0], [0], [1], [0, 0, 1, 1], [], []>} : vector<16x8xf32>, vector<8x32xf32>, vector<16x32xf32> -> vector<16x32xf32>
    %392 = arith.addf %371, %391 : vector<16x32xf32>
    %393 = vector.broadcast %6 : vector<1x32xf32> to vector<16x32xf32>
    %394 = arith.addf %392, %393 : vector<16x32xf32>
    %395 = arith.addf %303, %394 : vector<16x32xf32>
    %cst_114 = arith.constant dense<0.000000e+00> : vector<16xf32>
    %396 = vector.multi_reduction <add>, %395, %cst_114 [1] : vector<16x32xf32> to vector<16xf32>
    %397 = vector.shape_cast %396 : vector<16xf32> to vector<16x1xf32>
    %cst_115 = arith.constant 3.200000e+01 : f32
    %398 = vector.broadcast %cst_115 : f32 to vector<16x1xf32>
    %399 = arith.divf %397, %398 : vector<16x1xf32>
    %400 = vector.broadcast %399 : vector<16x1xf32> to vector<16x32xf32>
    %401 = arith.subf %395, %400 : vector<16x32xf32>
    %402 = arith.mulf %401, %401 : vector<16x32xf32>
    %cst_116 = arith.constant dense<0.000000e+00> : vector<16xf32>
    %403 = vector.multi_reduction <add>, %402, %cst_116 [1] : vector<16x32xf32> to vector<16xf32>
    %404 = vector.shape_cast %403 : vector<16xf32> to vector<16x1xf32>
    %cst_117 = arith.constant 3.200000e+01 : f32
    %405 = vector.broadcast %cst_117 : f32 to vector<16x1xf32>
    %406 = arith.divf %404, %405 : vector<16x1xf32>
    %407 = vector.broadcast %399 : vector<16x1xf32> to vector<16x32xf32>
    %408 = arith.subf %395, %407 : vector<16x32xf32>
    %cst_118 = arith.constant 9.99999974E-6 : f32
    %409 = vector.broadcast %cst_118 : f32 to vector<16x1xf32>
    %410 = arith.addf %406, %409 : vector<16x1xf32>
    %411 = math.rsqrt %410 : vector<16x1xf32>
    %412 = vector.broadcast %411 : vector<16x1xf32> to vector<16x32xf32>
    %413 = arith.mulf %408, %412 : vector<16x32xf32>
    %414 = vector.broadcast %9 : vector<1x32xf32> to vector<16x32xf32>
    %415 = arith.mulf %413, %414 : vector<16x32xf32>
    %416 = vector.broadcast %10 : vector<1x32xf32> to vector<16x32xf32>
    %417 = arith.addf %415, %416 : vector<16x32xf32>
    %cst_119 = arith.constant dense<0.000000e+00> : vector<16x64xf32>
    %418 = tpu.matmul %417, %2, %cst_119 {dimension_numbers = #tpu.dot_dimension_numbers<[1], [0], [0], [1], [0, 0, 1, 1], [], []>} : vector<16x32xf32>, vector<32x64xf32>, vector<16x64xf32> -> vector<16x64xf32>
    %419 = vector.broadcast %7 : vector<1x64xf32> to vector<16x64xf32>
    %420 = arith.addf %418, %419 : vector<16x64xf32>
    %cst_120 = arith.constant 0.000000e+00 : f32
    %421 = vector.broadcast %cst_120 : f32 to vector<16x64xf32>
    %422 = arith.maximumf %420, %421 : vector<16x64xf32>
    %cst_121 = arith.constant dense<0.000000e+00> : vector<16x32xf32>
    %423 = tpu.matmul %422, %3, %cst_121 {dimension_numbers = #tpu.dot_dimension_numbers<[1], [0], [0], [1], [0, 0, 1, 1], [], []>} : vector<16x64xf32>, vector<64x32xf32>, vector<16x32xf32> -> vector<16x32xf32>
    %424 = vector.broadcast %8 : vector<1x32xf32> to vector<16x32xf32>
    %425 = arith.addf %423, %424 : vector<16x32xf32>
    %426 = arith.addf %417, %425 : vector<16x32xf32>
    %cst_122 = arith.constant dense<0.000000e+00> : vector<16xf32>
    %427 = vector.multi_reduction <add>, %426, %cst_122 [1] : vector<16x32xf32> to vector<16xf32>
    %428 = vector.shape_cast %427 : vector<16xf32> to vector<16x1xf32>
    %cst_123 = arith.constant 3.200000e+01 : f32
    %429 = vector.broadcast %cst_123 : f32 to vector<16x1xf32>
    %430 = arith.divf %428, %429 : vector<16x1xf32>
    %431 = vector.broadcast %430 : vector<16x1xf32> to vector<16x32xf32>
    %432 = arith.subf %426, %431 : vector<16x32xf32>
    %433 = arith.mulf %432, %432 : vector<16x32xf32>
    %cst_124 = arith.constant dense<0.000000e+00> : vector<16xf32>
    %434 = vector.multi_reduction <add>, %433, %cst_124 [1] : vector<16x32xf32> to vector<16xf32>
    %435 = vector.shape_cast %434 : vector<16xf32> to vector<16x1xf32>
    %cst_125 = arith.constant 3.200000e+01 : f32
    %436 = vector.broadcast %cst_125 : f32 to vector<16x1xf32>
    %437 = arith.divf %435, %436 : vector<16x1xf32>
    %438 = vector.broadcast %430 : vector<16x1xf32> to vector<16x32xf32>
    %439 = arith.subf %426, %438 : vector<16x32xf32>
    %cst_126 = arith.constant 9.99999974E-6 : f32
    %440 = vector.broadcast %cst_126 : f32 to vector<16x1xf32>
    %441 = arith.addf %437, %440 : vector<16x1xf32>
    %442 = math.rsqrt %441 : vector<16x1xf32>
    %443 = vector.broadcast %442 : vector<16x1xf32> to vector<16x32xf32>
    %444 = arith.mulf %439, %443 : vector<16x32xf32>
    %445 = vector.broadcast %11 : vector<1x32xf32> to vector<16x32xf32>
    %446 = arith.mulf %444, %445 : vector<16x32xf32>
    %447 = vector.broadcast %12 : vector<1x32xf32> to vector<16x32xf32>
    %448 = arith.addf %446, %447 : vector<16x32xf32>
    %c0_127 = arith.constant 0 : index
    %c0_128 = arith.constant 0 : index
    %449 = vector.load %arg6[%c0_127, %c0_128] : memref<16x32xf32, #tpu.memory_space<vmem>>, vector<16x32xf32>
    tpu.vector_store %arg6[%c0_127, %c0_128], %448 {strides = array<i32>} : memref<16x32xf32, #tpu.memory_space<vmem>>, vector<16x32xf32>,
    return
  }
}

</mosaic_0001>

<bundles_post_ra>
// kernel: transformer_encoder.1
= control target key start
LH: loop header
LB: loop body
LE: loop exit
PB: predicated region body
PF: predicated region fallthrough
CT: control target
= control target key end

     0   :  { %11 = vsyncpa [#allocation3], 0  ;;  %s7902_s0 = inlined_call_operand.hbm [shape: f32[16,32], index: 0, kind: input, shape index: {}]   ;;  %s7903_s1 = inlined_call_operand.vmem [shape: f32[32,96], index: 1, kind: input, shape index: {}]   ;;  %s7904_s2 = inlined_call_operand.vmem [shape: f32[32,32], index: 2, kind: input, shape index: {}]   ;;  %s7905_s3 = inlined_call_operand.vmem [shape: f32[32,64], index: 3, kind: input, shape index: {}]   ;;  %s7906_s4 = inlined_call_operand.vmem [shape: f32[64,32], index: 4, kind: input, shape index: {}]   ;;  %s7907_s5 = inlined_call_operand.vmem [shape: f32[8,96], index: 5, kind: input, shape index: {}]   ;;  %s7908_s6 = inlined_call_operand.hbm [shape: f32[16,32], index: 6, kind: output, shape index: {}]  }
   0x1   :  { %12 = vsyncpa [#allocation4], 0  ;;  %s7049_s21 = smov [#allocation2]   ;;  %s7001_s25 = scalar_lea.hbm %s7902_s0, 256 }
   0x2   :  { %s18_s22 = sshll.u32 %s7049_s21, 4  ;;  %p7002_p0 = scmp.ne.s32.totalorder %s7902_s0, %s7001_s25  ;;  %s19_s22 = int_to_ptr.vmem [resolvable:$true] %s18_s22 }
   0x3   :  { %p7005_p1 = scmp.lt.u32.totalorder %s7001_s25, %s7902_s0 }
   0x5   :  { %p7007_p2 = pnand %p7005_p1, %p7002_p0 }
   0x7   :  { %7010 = shalt.err (!%p7007_p2)
}
   0x8   :  { %s7011_s30 = scalar_lea.vmem %s19_s22, 256  ;;  %p7016_p4 = scmp.lt.s32.totalorder %s19_s22, %s19_s22 }
   0x9   :  { %p7012_p3 = scmp.ne.s32.totalorder %s19_s22, %s7011_s30  ;;  %p7017_p5 = scmp.lt.s32.totalorder %s7011_s30, %s7011_s30 }
   0xb   :  { %p7018_p6 = por %p7017_p5, %p7016_p4 }
   0xd   :  { %p7019_p7 = pnand %p7018_p6, %p7012_p3 }
   0xf   :  { %7022 = shalt.err (!%p7019_p7)
}
  0x10   :  { %s7050_s7 = smov 128   ;;  %s7051_s8 = smov 8  }
  0x11   :  { %24 = dma.hbm_to_vmem [thread:$0]  %s7902_s0, 256, %s19_s22, [#allocation3], %s7050_s7, %s7050_s7, %s7051_s8  }
  0x12   :  { %7045 = dma.done.wait [#allocation3], 256  }
  0x13   :  { %7046 = vsyncadd [#allocation3], 4294967040  ;;  %vm65_vm0 = vcmask 261120   ;;  %v38_v0 = vld [vmem:[%s7903_s1] sm:$0xff]  ;;  %v39_v1 = vld [vmem:[%s7903_s1 + $0x8] sm:$0xff]  ;;  %v7052_v8 = vmov 0.0   ;;  %v61_v9 = vlaneseq }
  0x14   :  { %v40_v2 = vld [vmem:[%s7903_s1 + $0x10] sm:$0xff]  ;;  %v7125_v3 = vpack.c.bf16 %v39_v1, %v38_v0  ;;  %v41_v4 = vld [vmem:[%s7903_s1 + $0x18] sm:$0xff]  ;;  %v7130_v5 = vld [vmem:[#allocation2] sm:$0xff]  ;;  %6344 = vmatprep.subr.mxu0 %v7052_v8  ;;  %vm7053_vm1 = vmmov 0   ;;  %s7054_s19 = smov 96   ;;  %s7056_s20 = smov 120  }
  0x15   :  { %v7132_v6 = vpack.c.bf16 %v41_v4, %v40_v2  ;;  %6331 = vmatprep.mubr.msk.f32.mxu1 %vm65_vm0, %v7130_v5  ;;  %v7140_v7 = vld [vmem:[#allocation2 + $0x8] sm:$0xff]  ;;  %v7146_v10 = vshrl.u32 %v61_v9, 7  ;;  %6346 = vmatprep.mubr.msk.f32.mxu0 %vm7053_vm1, %v7052_v8  ;;  %v7156_v12 = vld [vmem:[%s7907_s5] sm:$0xff]  ;;  %s7055_s5 = smov 64   ;;  %vm150_vm2 = vcmask 64512   ;;  %s7057_s21 = smov 88  }
  0x16   :  { %6747 = vmatprep.subr.bf16.mxu1 %v7125_v3  ;;  %s7058_s22 = smov 80   ;;  %s7059_s23 = smov 56   ;;  %vm1940_vm3 = vcmask 523264  }
  0x17   :  { %6749 = vmatpush3.bf16.msra.mxu1 %v7125_v3  ;;  %v63_v11 = vsub.s32 0, %v7146_v10  ;;  %s7060_s24 = smov 112   ;;  %s7061_s25 = smov 48  }
  0x18   :  { %6751 = vmatprep.subr.bf16.mxu1 %v7132_v6  ;;  %s7062_s26 = smov 72   ;;  %s7063_s27 = smov 104  }
  0x19   :  { %v7159_v13 = vrot.slane %v7156_v12, %v63_v11  ;;  %s7064_s12 = smov 40  }
  0x1b   :  { %6753 = vmatpush3.bf16.msra.mxu1 %v7132_v6 }
  0x1c   :  { %6334 = vmatprep.subr.mxu1 %v7052_v8 }
  0x1e   :  { %6332 = vmatmul.mubr.msk.f32.vlgmr.msra.gmra.mrb[0].mxu1 %vm65_vm0, %v7140_v7 }
  0x1f   :  { %6336 = vmatprep.mubr.msk.f32.mxu1 %vm7053_vm1, %v7052_v8 }
  0xf1   :  { %v6333_v14 = vpop.f32.mrb[0].mxu1 }
  0xf2   :  { %v138_v15 = vpop.f32.mrb[1].mxu1  ;;  %v7167_v17 = vadd.f32 %v6333_v14, %v7159_v13 }
  0xf3   :  { %v7162_v16 = vadd.f32 %v138_v15, %v7159_v13 }
  0xf5   :  { %148 = vrot.lane.b32.xlu0 %v7162_v16, %s7054_s19 }
  0xf9   :  { %226 = vrot.lane.b32.xlu0 %v7167_v17, %s7054_s19 }
  0xfd   :  { %402 = vrot.lane.b32.xlu0 %v7167_v17, %s7055_s5 }
 0x101   :  { %556 = vrot.lane.b32.xlu0 %v7167_v17, %s7056_s20 }
 0x167   :  { %v149_v18 = vpop.permute.xlu0 %148 }
 0x168   :  { %6335 = vmatpush3.xpose.msk.msra.mxu1 %vm150_vm2, %v149_v18 }
 0x169   :  { %6339 = vmatprep.subr.mxu1 %v7052_v8 }
 0x16b   :  { %6337 = vmatmul.mubr.msk.f32.vlgmr.msra.gmra.mrb[2].mxu1 %vm150_vm2, %v7162_v16  ;;  %v227_v19 = vpop.permute.xlu0 %226 }
 0x16c   :  { %6340 = vmatpush3.xpose.msk.msra.mxu1 %vm150_vm2, %v227_v19  ;;  %6341 = vmatprep.mubr.msk.f32.mxu1 %vm7053_vm1, %v7052_v8 }
 0x16d   :  { %6349 = vmatprep.subr.mxu1 %v7052_v8 }
 0x16f   :  { %6342 = vmatmul.mubr.msk.f32.vlgmr.msra.gmra.mrb[4].mxu1 %vm150_vm2, %v7167_v17  ;;  %v403_v20 = vpop.permute.xlu0 %402 }
 0x170   :  { %6350 = vmatpush3.msra.mxu1 %v403_v20  ;;  %6351 = vmatprep.mubr.msk.f32.mxu1 %vm7053_vm1, %v7052_v8 }
 0x171   :  { %6359 = vmatprep.subr.mxu1 %v7052_v8 }
 0x173   :  { %v557_v29 = vpop.permute.xlu0 %556 }
 0x23e   :  { %v221_v21 = vpop.f32.mrb[2].mxu1 }
 0x23f   :  { %v302_v22 = vmul.f32 0.35355338, %v221_v21  ;;  %v6338_v23 = vpop.f32.mrb[3].mxu1 }
 0x241   :  { %v304_v24 = vsel %vm150_vm2, %v302_v22, -inf }
 0x242   :  { %305 = vmax.xlane.f32.xlu0 %v304_v24  ;;  %v298_v25 = vpop.f32.mrb[4].mxu1 }
 0x243   :  { %v303_v26 = vmul.f32 0.35355338, %v298_v25  ;;  %v6343_v27 = vpop.f32.mrb[5].mxu1 }
 0x245   :  { %v307_v28 = vsel %vm150_vm2, %v303_v26, -inf }
 0x246   :  { %308 = vmax.xlane.f32.xlu1 %v307_v28 }
 0x258   :  { %326 = vrot.lane.b32.xlu0 %v7162_v16, %s7055_s5 }
 0x25c   :  { %478 = vrot.lane.b32.xlu0 %v7162_v16, %s7056_s20 }
 0x2cf   :  { %v306_v30 = vpop.xlane.xlu0 %305 }
 0x2d0   :  { %v310_v37 = vsub.f32 %v302_v22, %v306_v30  ;;  %v7265_v30 = vld [vmem:[%s7904_s2 + $0x8] sm:$0xff] }
 0x2d2   :  { %v312_v38 = vmul.f32 1.442695, %v310_v37 }
 0x2d3   :  { %v309_v31 = vpop.xlane.xlu1 %308  ;;  %v327_v32 = vpop.permute.xlu0 %326 }
 0x2d4   :  { %v311_v33 = vsub.f32 %v303_v26, %v309_v31  ;;  %6345 = vmatpush3.msra.mxu0 %v327_v32  ;;  %v7272_v31 = vld [vmem:[%s7904_s2] sm:$0xff] }
 0x2d5   :  { %6354 = vmatprep.subr.mxu0 %v7052_v8 }
 0x2d6   :  { %v314_v34 = vmul.f32 1.442695, %v311_v33 }
 0x2d7   :  { %v479_v49 = vpop.permute.xlu0 %478 }
 0x2d8   :  { %6877 = vpow2.f32 %v314_v34 }
 0x2d9   :  { %6879 = vpow2.f32 %v312_v38 }
 0x2e2   :  { %v6878_v35 = vpop.eup %6877 }
 0x2e3   :  { %v319_v36 = vsel %vm150_vm2, %v6878_v35, 0.0  ;;  %v6880_v39 = vpop.eup %6879 }
 0x2e4   :  { %320 = vadd.xlane.f32.xlu1 %v319_v36  ;;  %v316_v40 = vsel %vm150_vm2, %v6880_v39, 0.0 }
 0x2f5   :  { %558 = vrot.lane.b32.xlu1 %v7167_v17, %s7057_s21 }
 0x319   :  { %317 = vadd.xlane.f32.xlu1 %v316_v40 }
 0x32a   :  { %480 = vrot.lane.b32.xlu1 %v7162_v16, %s7057_s21 }
 0x32e   :  { %974 = vrot.lane.b32.xlu1 %v7162_v16, %s7058_s22 }
 0x371   :  { %v321_v41 = vpop.xlane.xlu1 %320 }
 0x372   :  { %6881 = vrcp.f32 %v321_v41 }
 0x375   :  { %v559_v44 = vpop.permute.xlu1 %558 }
 0x37c   :  { %v6882_v42 = vpop.eup %6881 }
 0x37d   :  { %v325_v43 = vmul.f32 %v6882_v42, %v6878_v35 }
 0x37f   :  { %6352 = vmatmul.mubr.msk.f32.vlgmr.msra.gmra.mrb[6].mxu1 %vm150_vm2, %v325_v43 }
 0x380   :  { %6360 = vmatpush3.xpose.msk.msra.mxu1 %vm150_vm2, %v559_v44  ;;  %6361 = vmatprep.mubr.msk.f32.mxu1 %vm7053_vm1, %v7052_v8 }
 0x381   :  { %6369 = vmatprep.subr.mxu1 %v7052_v8 }
 0x383   :  { %6362 = vmatmul.mubr.msk.f32.vlgmr.msra.gmra.mrb[8].mxu1 %vm150_vm2, %v557_v29 }
 0x384   :  { %6371 = vmatprep.mubr.msk.f32.mxu1 %vm7053_vm1, %v7052_v8 }
 0x3a6   :  { %v318_v45 = vpop.xlane.xlu1 %317 }
 0x3a7   :  { %6883 = vrcp.f32 %v318_v45 }
 0x3aa   :  { %v481_v48 = vpop.permute.xlu1 %480 }
 0x3ae   :  { %v975_v22 = vpop.permute.xlu1 %974 }
 0x3b1   :  { %v6884_v46 = vpop.eup %6883 }
 0x3b2   :  { %v324_v47 = vmul.f32 %v6884_v46, %v6880_v39 }
 0x3b4   :  { %6347 = vmatmul.mubr.msk.f32.vlgmr.msra.gmra.mrb[0].mxu0 %vm150_vm2, %v324_v47 }
 0x3b5   :  { %6355 = vmatpush3.xpose.msk.msra.mxu0 %vm150_vm2, %v481_v48  ;;  %6356 = vmatprep.mubr.msk.f32.mxu0 %vm7053_vm1, %v7052_v8 }
 0x3b6   :  { %6364 = vmatprep.subr.mxu0 %v7052_v8 }
 0x3b8   :  { %6357 = vmatmul.mubr.msk.f32.vlgmr.msra.gmra.mrb[2].mxu0 %vm150_vm2, %v479_v49 }
 0x3b9   :  { %6366 = vmatprep.mubr.msk.f32.mxu0 %vm7053_vm1, %v7052_v8 }
 0x452   :  { %v7219_v50 = vpop.f32.mrb[6].mxu1 }
 0x453   :  { %v6353_v51 = vpop.f32.mrb[7].mxu1 }
 0x456   :  { %v630_v52 = vpop.f32.mrb[8].mxu1 }
 0x457   :  { %v635_v53 = vmul.f32 0.35355338, %v630_v52  ;;  %v6363_v54 = vpop.f32.mrb[9].mxu1 }
 0x459   :  { %v639_v55 = vsel %vm150_vm2, %v635_v53, -inf }
 0x45a   :  { %640 = vmax.xlane.f32.xlu0 %v639_v55 }
 0x470   :  { %734 = vrot.lane.b32.xlu0 %v7167_v17, %s7059_s23 }
 0x474   :  { %972 = vrot.lane.b32.xlu0 %v7162_v16, %s7060_s24 }
 0x478   :  { %1052 = vrot.lane.b32.xlu0 %v7167_v17, %s7058_s22 }
 0x487   :  { %v7228_v56 = vpop.f32.mrb[0].mxu0 }
 0x488   :  { %v6348_v57 = vpop.f32.mrb[1].mxu0 }
 0x48b   :  { %v552_v58 = vpop.f32.mrb[2].mxu0 }
 0x48c   :  { %v6358_v59 = vpop.f32.mrb[3].mxu0  ;;  %v634_v60 = vmul.f32 0.35355338, %v552_v58 }
 0x48e   :  { %v636_v61 = vsel %vm150_vm2, %v634_v60, -inf }
 0x497   :  { %637 = vmax.xlane.f32.xlu0 %v636_v61 }
 0x4ad   :  { %658 = vrot.lane.b32.xlu0 %v7162_v16, %s7059_s23 }
 0x4b1   :  { %1152 = vrot.lane.b32.xlu0 %v7162_v16, %s7061_s25 }
 0x4b5   :  { %1389 = vrot.lane.b32.xlu0 %v7162_v16, %s7062_s26 }
 0x4b9   :  { %1467 = vrot.lane.b32.xlu0 %v7167_v17, %s7062_s26 }
 0x4bd   :  { %1387 = vrot.lane.b32.xlu0 %v7162_v16, %s7063_s27 }
 0x4c1   :  { %1465 = vrot.lane.b32.xlu0 %v7167_v17, %s7063_s27 }
 0x4e7   :  { %v641_v62 = vpop.xlane.xlu0 %640 }
 0x4e8   :  { %v643_v63 = vsub.f32 %v635_v53, %v641_v62 }
 0x4ea   :  { %v646_v0 = vmul.f32 1.442695, %v643_v63 }
 0x4eb   :  { %v735_v1 = vpop.permute.xlu0 %734 }
 0x4ec   :  { %6885 = vpow2.f32 %v646_v0  ;;  %6370 = vmatpush3.msra.mxu1 %v735_v1 }
 0x4ed   :  { %6384 = vmatprep.subr.mxu1 %v7052_v8 }
 0x4ef   :  { %v973_v9 = vpop.permute.xlu0 %972 }
 0x4f3   :  { %v1053_v11 = vpop.permute.xlu0 %1052 }
 0x4f6   :  { %v6886_v2 = vpop.eup %6885 }
 0x4f7   :  { %v651_v4 = vsel %vm150_vm2, %v6886_v2, 0.0 }
 0x4f8   :  { %652 = vadd.xlane.f32.xlu1 %v651_v4 }
 0x509   :  { %1050 = vrot.lane.b32.xlu1 %v7167_v17, %s7060_s24 }
 0x524   :  { %v638_v14 = vpop.xlane.xlu0 %637 }
 0x525   :  { %v642_v15 = vsub.f32 %v634_v60, %v638_v14 }
 0x527   :  { %v644_v18 = vmul.f32 1.442695, %v642_v15 }
 0x528   :  { %v659_v19 = vpop.permute.xlu0 %658 }
 0x529   :  { %6887 = vpow2.f32 %v644_v18  ;;  %6365 = vmatpush3.msra.mxu0 %v659_v19 }
 0x52a   :  { %6374 = vmatprep.subr.mxu0 %v7265_v30 }
 0x52c   :  { %v1153_v44 = vpop.permute.xlu0 %1152 }
 0x530   :  { %v1390_v59 = vpop.permute.xlu0 %1389 }
 0x533   :  { %v6888_v20 = vpop.eup %6887 }
 0x534   :  { %v648_v21 = vsel %vm150_vm2, %v6888_v20, 0.0  ;;  %v1468_v63 = vpop.permute.xlu0 %1467 }
 0x535   :  { %649 = vadd.xlane.f32.xlu1 %v648_v21 }
 0x538   :  { %v1388_v1 = vpop.permute.xlu0 %1387 }
 0x53c   :  { %v1466_v14 = vpop.permute.xlu0 %1465 }
 0x585   :  { %v653_v23 = vpop.xlane.xlu1 %652 }
 0x586   :  { %6889 = vrcp.f32 %v653_v23 }
 0x589   :  { %v1051_v26 = vpop.permute.xlu1 %1050 }
 0x590   :  { %v6890_v24 = vpop.eup %6889 }
 0x591   :  { %v657_v25 = vmul.f32 %v6890_v24, %v6886_v2 }
 0x593   :  { %6372 = vmatmul.mubr.msk.f32.vlgmr.msra.gmra.mrb[10].mxu1 %vm150_vm2, %v657_v25 }
 0x594   :  { %6385 = vmatpush3.xpose.msk.msra.mxu1 %vm150_vm2, %v975_v22  ;;  %6386 = vmatprep.mubr.msk.f32.mxu1 %vm7053_vm1, %v7052_v8 }
 0x595   :  { %6389 = vmatprep.subr.mxu1 %v7052_v8 }
 0x597   :  { %6387 = vmatmul.mubr.msk.f32.vlgmr.msra.gmra.mrb[12].mxu1 %vm150_vm2, %v973_v9 }
 0x598   :  { %6390 = vmatpush3.xpose.msk.msra.mxu1 %vm150_vm2, %v1053_v11  ;;  %6391 = vmatprep.mubr.msk.f32.mxu1 %vm7053_vm1, %v7052_v8 }
 0x599   :  { %6399 = vmatprep.subr.mxu1 %v7052_v8 }
 0x59b   :  { %6392 = vmatmul.mubr.msk.f32.vlgmr.msra.gmra.mrb[14].mxu1 %vm150_vm2, %v1051_v26 }
 0x59c   :  { %6401 = vmatprep.mubr.msk.f32.mxu1 %vm7053_vm1, %v7052_v8 }
 0x5c2   :  { %v650_v27 = vpop.xlane.xlu1 %649 }
 0x5c3   :  { %6891 = vrcp.f32 %v650_v27 }
 0x5cd   :  { %v6892_v28 = vpop.eup %6891 }
 0x5ce   :  { %v656_v29 = vmul.f32 %v6892_v28, %v6888_v20 }
 0x5d0   :  { %6367 = vmatmul.mubr.msk.f32.vlgmr.msra.gmra.mrb[4].mxu0 %vm150_vm2, %v656_v29 }
 0x5d1   :  { %6375 = vmatpush3.msra.mxu0 %v7265_v30 }
 0x5d2   :  { %6379 = vmatprep.subr.mxu0 %v7272_v31 }
 0x666   :  { %v806_v32 = vpop.f32.mrb[10].mxu1 }
 0x667   :  { %v6373_v33 = vpop.f32.mrb[11].mxu1 }
 0x66a   :  { %v1046_v34 = vpop.f32.mrb[12].mxu1 }
 0x66b   :  { %v1128_v35 = vmul.f32 0.35355338, %v1046_v34  ;;  %v6388_v36 = vpop.f32.mrb[13].mxu1 }
 0x66d   :  { %v1130_v37 = vsel %vm150_vm2, %v1128_v35, -inf }
 0x66e   :  { %v1124_v38 = vpop.f32.mrb[14].mxu1  ;;  %1131 = vmax.xlane.f32.xlu1 %v1130_v37 }
 0x66f   :  { %v1129_v39 = vmul.f32 0.35355338, %v1124_v38  ;;  %v6393_v40 = vpop.f32.mrb[15].mxu1 }
 0x671   :  { %v1133_v41 = vsel %vm150_vm2, %v1129_v39, -inf }
 0x672   :  { %1134 = vmax.xlane.f32.xlu1 %v1133_v41  ;;  %v7330_v41 = vld [vmem:[%s7904_s2 + $0x18] sm:$0xff] }
 0x6a3   :  { %v730_v42 = vpop.f32.mrb[4].mxu0 }
 0x6a4   :  { %v6368_v43 = vpop.f32.mrb[5].mxu0  ;;  %6376 = vmatprep.mubr.msk.f32.mxu0 %vm150_vm2, %v730_v42 }
 0x6a5   :  { %6377 = vmatmul.mubr.msk.f32.vlgmr.msra.gmra.mrb[6].mxu0 %vm150_vm2, %v806_v32 }
 0x6a6   :  { %6381 = vmatprep.mubr.msk.f32.mxu0 %vm150_vm2, %v7228_v56  ;;  %6380 = vmatpush3.msra.mxu0 %v7272_v31 }
 0x6a7   :  { %6394 = vmatprep.subr.mxu0 %v7052_v8 }
 0x6ad   :  { %6382 = vmatmul.mubr.msk.f32.vlgmr.msra.gmra.mrb[6].mxu0 %vm150_vm2, %v7219_v50  ;;  %v7294_v50 = vld [vmem:[%s7904_s2 + $0x10] sm:$0xff] }
 0x6ae   :  { %6395 = vmatpush3.msra.mxu0 %v1153_v44  ;;  %6396 = vmatprep.mubr.msk.f32.mxu0 %vm7053_vm1, %v7052_v8 }
 0x6af   :  { %6404 = vmatprep.subr.mxu0 %v7294_v50 }
 0x6fb   :  { %v1132_v45 = vpop.xlane.xlu1 %1131 }
 0x6fc   :  { %v1136_v46 = vsub.f32 %v1128_v35, %v1132_v45 }
 0x6fe   :  { %v1138_v47 = vmul.f32 1.442695, %v1136_v46 }
 0x6ff   :  { %v1135_v48 = vpop.xlane.xlu1 %1134 }
 0x700   :  { %6893 = vpow2.f32 %v1138_v47  ;;  %v1137_v49 = vsub.f32 %v1129_v39, %v1135_v48  ;;  %v1804_v48 = vsub.s32 1, %v7146_v10 }
 0x702   :  { %v1140_v51 = vmul.f32 1.442695, %v1137_v49  ;;  %v7339_v49 = vrot.slane %v7156_v12, %v1804_v48  ;;  %v57_v48 = vld [vmem:[%s7906_s4 + $0x38] sm:$0xff] }
 0x704   :  { %6895 = vpow2.f32 %v1140_v51 }
 0x70a   :  { %v6894_v52 = vpop.eup %6893 }
 0x70b   :  { %v1142_v53 = vsel %vm150_vm2, %v6894_v52, 0.0 }
 0x70c   :  { %1143 = vadd.xlane.f32.xlu1 %v1142_v53 }
 0x70e   :  { %v6896_v54 = vpop.eup %6895 }
 0x70f   :  { %v1145_v55 = vsel %vm150_vm2, %v6896_v54, 0.0 }
 0x710   :  { %1146 = vadd.xlane.f32.xlu1 %v1145_v55 }
 0x721   :  { %1228 = vrot.lane.b32.xlu1 %v7167_v17, %s7061_s25 }
 0x799   :  { %v1144_v56 = vpop.xlane.xlu1 %1143 }
 0x79a   :  { %6897 = vrcp.f32 %v1144_v56 }
 0x79d   :  { %v1147_v57 = vpop.xlane.xlu1 %1146 }
 0x79e   :  { %6899 = vrcp.f32 %v1147_v57 }
 0x7a1   :  { %v1229_v58 = vpop.permute.xlu1 %1228 }
 0x7a2   :  { %6400 = vmatpush3.msra.mxu1 %v1229_v58 }
 0x7a3   :  { %6409 = vmatprep.subr.mxu1 %v7052_v8 }
 0x7a4   :  { %v6898_v60 = vpop.eup %6897 }
 0x7a5   :  { %v1150_v61 = vmul.f32 %v6898_v60, %v6894_v52 }
 0x7a7   :  { %6397 = vmatmul.mubr.msk.f32.vlgmr.msra.gmra.mrb[8].mxu0 %vm150_vm2, %v1150_v61 }
 0x7a8   :  { %v6900_v62 = vpop.eup %6899  ;;  %6405 = vmatpush3.msra.mxu0 %v7294_v50 }
 0x7a9   :  { %v1151_v0 = vmul.f32 %v6900_v62, %v6896_v54  ;;  %6414 = vmatprep.subr.mxu0 %v7052_v8 }
 0x7ab   :  { %6402 = vmatmul.mubr.msk.f32.vlgmr.msra.gmra.mrb[16].mxu1 %vm150_vm2, %v1151_v0 }
 0x7ac   :  { %6410 = vmatpush3.xpose.msk.msra.mxu1 %vm150_vm2, %v1390_v59  ;;  %6411 = vmatprep.mubr.msk.f32.mxu1 %vm7053_vm1, %v7052_v8 }
 0x7ad   :  { %6419 = vmatprep.subr.mxu1 %v7052_v8 }
 0x7af   :  { %6412 = vmatmul.mubr.msk.f32.vlgmr.msra.gmra.mrb[18].mxu1 %vm150_vm2, %v1388_v1 }
 0x7b0   :  { %6421 = vmatprep.mubr.msk.f32.mxu1 %vm7053_vm1, %v7052_v8 }
 0x87a   :  { %v1224_v2 = vpop.f32.mrb[8].mxu0 }
 0x87b   :  { %v6398_v4 = vpop.f32.mrb[9].mxu0  ;;  %6406 = vmatprep.mubr.msk.f32.mxu0 %vm150_vm2, %v1224_v2 }
 0x87e   :  { %v1300_v9 = vpop.f32.mrb[16].mxu1 }
 0x87f   :  { %v6403_v11 = vpop.f32.mrb[17].mxu1  ;;  %6407 = vmatmul.mubr.msk.f32.vlgmr.msra.gmra.mrb[6].mxu0 %vm150_vm2, %v1300_v9  ;;  %v47_v9 = vld [vmem:[%s7905_s3 + $0x8] sm:$0xff] }
 0x880   :  { %6415 = vmatpush3.xpose.msk.msra.mxu0 %vm150_vm2, %v1468_v63  ;;  %6416 = vmatprep.mubr.msk.f32.mxu0 %vm7053_vm1, %v7052_v8 }
 0x881   :  { %6424 = vmatprep.subr.mxu0 %v7052_v8 }
 0x882   :  { %v1461_v15 = vpop.f32.mrb[18].mxu1 }
 0x883   :  { %v1543_v18 = vmul.f32 0.35355338, %v1461_v15  ;;  %v6413_v19 = vpop.f32.mrb[19].mxu1  ;;  %6417 = vmatmul.mubr.msk.f32.vlgmr.msra.gmra.mrb[10].mxu0 %vm150_vm2, %v1466_v14  ;;  %v48_v14 = vld [vmem:[%s7905_s3 + $0x10] sm:$0xff]  ;;  %v49_v15 = vld [vmem:[%s7905_s3 + $0x18] sm:$0xff] }
 0x884   :  { %6426 = vmatprep.mubr.msk.f32.mxu0 %vm7053_vm1, %v7052_v8  ;;  %v50_v19 = vld [vmem:[%s7906_s4] sm:$0xff] }
 0x885   :  { %v1545_v20 = vsel %vm150_vm2, %v1543_v18, -inf }
 0x886   :  { %1546 = vmax.xlane.f32.xlu1 %v1545_v20  ;;  %v51_v20 = vld [vmem:[%s7906_s4 + $0x8] sm:$0xff] }
 0x913   :  { %v1547_v21 = vpop.xlane.xlu1 %1546 }
 0x914   :  { %v1551_v22 = vsub.f32 %v1543_v18, %v1547_v21  ;;  %v7364_v18 = vpack.c.bf16 %v49_v15, %v48_v14  ;;  %v52_v21 = vld [vmem:[%s7906_s4 + $0x10] sm:$0xff] }
 0x916   :  { %v1553_v23 = vmul.f32 1.442695, %v1551_v22  ;;  %v7379_v22 = vpack.c.bf16 %v51_v20, %v50_v19 }
 0x918   :  { %6901 = vpow2.f32 %v1553_v23  ;;  %v53_v23 = vld [vmem:[%s7906_s4 + $0x18] sm:$0xff] }
 0x922   :  { %v6902_v28 = vpop.eup %6901 }
 0x923   :  { %v1557_v29 = vsel %vm150_vm2, %v6902_v28, 0.0 }
 0x956   :  { %v1539_v24 = vpop.f32.mrb[10].mxu0 }
 0x957   :  { %v1544_v25 = vmul.f32 0.35355338, %v1539_v24  ;;  %v6418_v26 = vpop.f32.mrb[11].mxu0  ;;  %v7384_v24 = vpack.c.bf16 %v53_v23, %v52_v21 }
 0x958   :  { %v55_v26 = vld [vmem:[%s7906_s4 + $0x28] sm:$0xff] }
 0x959   :  { %v1548_v27 = vsel %vm150_vm2, %v1544_v25, -inf }
 0x95a   :  { %1549 = vmax.xlane.f32.xlu0 %v1548_v27 }
 0x95e   :  { %1558 = vadd.xlane.f32.xlu0 %v1557_v29 }
 0x974   :  { %1567 = vrot.lane.b32.xlu0 %v7162_v16, %s7064_s12 }
 0x9e7   :  { %v1550_v32 = vpop.xlane.xlu0 %1549 }
 0x9e8   :  { %v1552_v33 = vsub.f32 %v1544_v25, %v1550_v32  ;;  %v54_v25 = vld [vmem:[%s7906_s4 + $0x20] sm:$0xff] }
 0x9e9   :  { %v7395_v27 = vpack.c.bf16 %v55_v26, %v54_v25 }
 0x9ea   :  { %v1555_v34 = vmul.f32 1.442695, %v1552_v33 }
 0x9eb   :  { %v1559_v35 = vpop.xlane.xlu0 %1558 }
 0x9ec   :  { %6903 = vpow2.f32 %v1555_v34 }
 0x9ed   :  { %6905 = vrcp.f32 %v1559_v35 }
 0x9ef   :  { %v1568_v36 = vpop.permute.xlu0 %1567 }
 0x9f0   :  { %6420 = vmatpush3.msra.mxu1 %v1568_v36  ;;  %v1839_v36 = vsub.s32 4, %v7146_v10 }
 0x9f6   :  { %v6904_v37 = vpop.eup %6903 }
 0x9f7   :  { %v6906_v38 = vpop.eup %6905  ;;  %v1560_v39 = vsel %vm150_vm2, %v6904_v37, 0.0 }
 0x9f8   :  { %1561 = vadd.xlane.f32.xlu1 %v1560_v39  ;;  %v1565_v40 = vmul.f32 %v6906_v38, %v6902_v28  ;;  %v7403_v38 = vrot.slane %v7156_v12, %v1839_v36 }
 0x9fa   :  { %6422 = vmatmul.mubr.msk.f32.vlgmr.msra.gmra.mrb[20].mxu1 %vm150_vm2, %v1565_v40 }
 0xa09   :  { %1643 = vrot.lane.b32.xlu1 %v7167_v17, %s7064_s12 }
 0xa85   :  { %v1562_v16 = vpop.xlane.xlu1 %1561 }
 0xa86   :  { %6907 = vrcp.f32 %v1562_v16 }
 0xa89   :  { %v1644_v42 = vpop.permute.xlu1 %1643 }
 0xa8a   :  { %6425 = vmatpush3.msra.mxu0 %v1644_v42 }
 0xa8b   :  { %6429 = vmatprep.subr.mxu0 %v7330_v41 }
 0xa90   :  { %v6908_v43 = vpop.eup %6907 }
 0xa91   :  { %v1566_v44 = vmul.f32 %v6908_v43, %v6904_v37  ;;  %v1845_v37 = vsub.s32 5, %v7146_v10 }
 0xa93   :  { %6427 = vmatmul.mubr.msk.f32.vlgmr.msra.gmra.mrb[12].mxu0 %vm150_vm2, %v1566_v44  ;;  %v7406_v43 = vrot.slane %v7156_v12, %v1845_v37  ;;  %v2052_v37 = vsub.s32 6, %v7146_v10 }
 0xa94   :  { %6430 = vmatpush3.msra.mxu0 %v7330_v41 }
 0xa95   :  { %6763 = vmatprep.subr.bf16.mxu0 %v7379_v22 }
 0xacd   :  { %v1639_v45 = vpop.f32.mrb[20].mxu1 }
 0xace   :  { %v6423_v46 = vpop.f32.mrb[21].mxu1  ;;  %6431 = vmatprep.mubr.msk.f32.mxu0 %vm150_vm2, %v1639_v45 }
 0xb66   :  { %v1715_v17 = vpop.f32.mrb[12].mxu0 }
 0xb67   :  { %v6428_v47 = vpop.f32.mrb[13].mxu0  ;;  %6432 = vmatmul.mubr.msk.f32.vlgmr.msra.gmra.mrb[6].mxu0 %vm150_vm2, %v1715_v17 }
 0xb68   :  { %6765 = vmatpush3.bf16.msra.mxu0 %v7379_v22  ;;  %v56_v47 = vld [vmem:[%s7906_s4 + $0x30] sm:$0xff] }
 0xb69   :  { %6767 = vmatprep.subr.bf16.mxu0 %v7384_v24 }
 0xb6c   :  { %6769 = vmatpush3.bf16.msra.mxu0 %v7384_v24 }
 0xb6d   :  { %6771 = vmatprep.subr.bf16.mxu0 %v7395_v27 }
 0xb70   :  { %6773 = vmatpush3.bf16.msra.mxu0 %v7395_v27 }
 0xc3a   :  { %v6433_v51 = vpop.f32.mrb[6].mxu0 }
 0xc3b   :  { %v1807_v52 = vadd.f32 %v6433_v51, %v7339_v49  ;;  %v1791_v53 = vpop.f32.mrb[7].mxu0  ;;  %v7424_v51 = vpack.c.bf16 %v57_v48, %v56_v47 }
 0xc3c   :  { %v1806_v54 = vadd.f32 %v7339_v49, %v1791_v53 }
 0xc3d   :  { %v1809_v55 = vadd.f32 %v1807_v52, %v7140_v7  ;;  %6775 = vmatprep.subr.bf16.mxu0 %v7424_v51  ;;  %v1851_v52 = vsub.s32 2, %v7146_v10 }
 0xc3e   :  { %v1808_v56 = vadd.f32 %v1806_v54, %v7130_v5  ;;  %v46_v5 = vld [vmem:[%s7905_s3] sm:$0xff]  ;;  %6777 = vmatpush3.bf16.msra.mxu0 %v7424_v51 }
 0xc3f   :  { %v1813_v57 = vsel %vm65_vm0, %v1809_v55, 0.0  ;;  %v7355_v11 = vpack.c.bf16 %v47_v9, %v46_v5  ;;  %6485 = vmatprep.subr.mxu0 %v7052_v8  ;;  %v7431_v53 = vrot.slane %v7156_v12, %v1851_v52 }
 0xc40   :  { %1814 = vadd.xlane.f32.xlu0 %v1813_v57  ;;  %v1810_v58 = vsel %vm65_vm0, %v1808_v56, 0.0 }
 0xc41   :  { %1811 = vadd.xlane.f32.xlu1 %v1810_v58  ;;  %6755 = vmatprep.subr.bf16.mxu1 %v7355_v11 }
 0xc42   :  { %6757 = vmatpush3.bf16.msra.mxu1 %v7355_v11 }
 0xc43   :  { %6759 = vmatprep.subr.bf16.mxu1 %v7364_v18 }
 0xc46   :  { %6761 = vmatpush3.bf16.msra.mxu1 %v7364_v18 }
 0xc47   :  { %6779 = vmatprep.subr.bf16.mxu1 %v7125_v3 }
 0xccd   :  { %v1815_v59 = vpop.xlane.xlu0 %1814 }
 0xcce   :  { %v1818_v60 = vmul.f32 0.03125, %v1815_v59  ;;  %v1812_v61 = vpop.xlane.xlu1 %1811 }
 0xccf   :  { %v1817_v62 = vmul.f32 0.03125, %v1812_v61 }
 0xcd0   :  { %v1820_v63 = vsub.f32 %v1809_v55, %v1818_v60  ;;  %v1938_v60 = vsub.s32 3, %v7146_v10 }
 0xcd1   :  { %v1819_v0 = vsub.f32 %v1808_v56, %v1817_v62 }
 0xcd2   :  { %v1822_v1 = vmul.f32 %v1820_v63, %v1820_v63  ;;  %v7441_v61 = vrot.slane %v7156_v12, %v1938_v60 }
 0xcd3   :  { %v1821_v2 = vmul.f32 %v1819_v0, %v1819_v0 }
 0xcd4   :  { %v1826_v4 = vsel %vm65_vm0, %v1822_v1, 0.0 }
 0xcd5   :  { %1827 = vadd.xlane.f32.xlu1 %v1826_v4  ;;  %v1823_v7 = vsel %vm65_vm0, %v1821_v2, 0.0 }
 0xcd6   :  { %1824 = vadd.xlane.f32.xlu0 %v1823_v7 }
 0xd62   :  { %v1828_v28 = vpop.xlane.xlu1 %1827 }
 0xd63   :  { %v1830_v29 = vmul.f32 0.03125, %v1828_v28  ;;  %v1825_v32 = vpop.xlane.xlu0 %1824 }
 0xd64   :  { %v1829_v33 = vmul.f32 0.03125, %v1825_v32 }
 0xd65   :  { %v1832_v34 = vadd.f32 1e-05, %v1830_v29 }
 0xd66   :  { %v1831_v35 = vadd.f32 1e-05, %v1829_v33 }
 0xd67   :  { %6909 = vrsqrt.f32 %v1832_v34 }
 0xd68   :  { %6911 = vrsqrt.f32 %v1831_v35 }
 0xd71   :  { %v6910_v39 = vpop.eup %6909 }
 0xd72   :  { %v6912_v40 = vpop.eup %6911  ;;  %v1836_v16 = vmul.f32 %v6910_v39, %v1820_v63  ;;  %v2058_v39 = vsub.s32 7, %v7146_v10 }
 0xd73   :  { %v1835_v42 = vmul.f32 %v6912_v40, %v1819_v0  ;;  %v7452_v40 = vrot.slane %v7156_v12, %v2052_v37 }
 0xd74   :  { %v1842_v44 = vmul.f32 %v7403_v38, %v1836_v16 }
 0xd75   :  { %v1841_v45 = vmul.f32 %v7403_v38, %v1835_v42 }
 0xd76   :  { %v1848_v17 = vadd.f32 %v7406_v43, %v1842_v44 }
 0xd77   :  { %v1847_v46 = vadd.f32 %v7406_v43, %v1841_v45 }
 0xd79   :  { %6442 = vmatprep.mubr.msk.f32.mxu1 %vm65_vm0, %v1847_v46 }
 0xd7a   :  { %6443 = vmatmul.mubr.msk.f32.vlgmr.msra.gmra.mrb[22].mxu1 %vm65_vm0, %v1848_v17 }
 0xd7b   :  { %6781 = vmatpush3.bf16.msra.mxu1 %v7125_v3 }
 0xd7c   :  { %6783 = vmatprep.subr.bf16.mxu1 %v7132_v6 }
 0xd7f   :  { %6785 = vmatpush3.bf16.msra.mxu1 %v7132_v6 }
 0xd80   :  { %6475 = vmatprep.subr.mxu1 %v7052_v8 }
 0xe4d   :  { %v6444_v54 = vpop.f32.mrb[22].mxu1 }
 0xe4e   :  { %v1931_v55 = vadd.f32 %v6444_v54, %v7431_v53  ;;  %v1925_v56 = vpop.f32.mrb[23].mxu1 }
 0xe4f   :  { %v1926_v57 = vadd.f32 %v1925_v56, %v7431_v53 }
 0xe50   :  { %v1935_v59 = vmax.f32 %v1931_v55, 0.0 }
 0xe51   :  { %v1934_v58 = vmax.f32 %v1926_v57, 0.0 }
 0xe53   :  { %6461 = vmatprep.mubr.msk.f32.mxu0 %vm1940_vm3, %v1934_v58 }
 0xe54   :  { %6462 = vmatmul.mubr.msk.f32.vlgmr.msra.gmra.mrb[14].mxu0 %vm1940_vm3, %v1935_v59 }
 0xe55   :  { %6487 = vmatprep.mubr.msk.f32.mxu0 %vm7053_vm1, %v7052_v8 }
 0xf27   :  { %v6463_v62 = vpop.f32.mrb[14].mxu0 }
 0xf28   :  { %v2019_v63 = vadd.f32 %v6463_v62, %v7441_v61  ;;  %v2013_v0 = vpop.f32.mrb[15].mxu0 }
 0xf29   :  { %v2014_v1 = vadd.f32 %v2013_v0, %v7441_v61 }
 0xf2a   :  { %v2023_v2 = vadd.f32 %v2019_v63, %v1848_v17 }
 0xf2b   :  { %v2022_v4 = vadd.f32 %v2014_v1, %v1847_v46  ;;  %v7455_v46 = vrot.slane %v7156_v12, %v2058_v39 }
 0xf2c   :  { %v2027_v7 = vsel %vm65_vm0, %v2023_v2, 0.0 }
 0xf2d   :  { %2028 = vadd.xlane.f32.xlu1 %v2027_v7  ;;  %v2024_v5 = vsel %vm65_vm0, %v2022_v4, 0.0 }
 0xf2e   :  { %2025 = vadd.xlane.f32.xlu0 %v2024_v5 }
 0xfba   :  { %v2029_v9 = vpop.xlane.xlu1 %2028 }
 0xfbb   :  { %v2031_v14 = vmul.f32 0.03125, %v2029_v9  ;;  %v2026_v15 = vpop.xlane.xlu0 %2025 }
 0xfbc   :  { %v2030_v19 = vmul.f32 0.03125, %v2026_v15 }
 0xfbd   :  { %v2033_v20 = vsub.f32 %v2023_v2, %v2031_v14 }
 0xfbe   :  { %v2032_v21 = vsub.f32 %v2022_v4, %v2030_v19 }
 0xfbf   :  { %v2035_v23 = vmul.f32 %v2033_v20, %v2033_v20 }
 0xfc0   :  { %v2034_v25 = vmul.f32 %v2032_v21, %v2032_v21 }
 0xfc1   :  { %v2039_v26 = vsel %vm65_vm0, %v2035_v23, 0.0 }
 0xfc2   :  { %2040 = vadd.xlane.f32.xlu1 %v2039_v26  ;;  %v2036_v28 = vsel %vm65_vm0, %v2034_v25, 0.0 }
 0xfc3   :  { %2037 = vadd.xlane.f32.xlu0 %v2036_v28 }
0x104f   :  { %v2041_v29 = vpop.xlane.xlu1 %2040 }
0x1050   :  { %v2043_v32 = vmul.f32 0.03125, %v2041_v29  ;;  %v2038_v33 = vpop.xlane.xlu0 %2037 }
0x1051   :  { %v2042_v34 = vmul.f32 0.03125, %v2038_v33 }
0x1052   :  { %v2045_v35 = vadd.f32 1e-05, %v2043_v32 }
0x1053   :  { %v2044_v36 = vadd.f32 1e-05, %v2042_v34 }
0x1054   :  { %6913 = vrsqrt.f32 %v2045_v35 }
0x1055   :  { %6915 = vrsqrt.f32 %v2044_v36 }
0x105e   :  { %v6914_v16 = vpop.eup %6913 }
0x105f   :  { %v6916_v42 = vpop.eup %6915  ;;  %v2049_v44 = vmul.f32 %v6914_v16, %v2033_v20 }
0x1060   :  { %v2048_v45 = vmul.f32 %v6916_v42, %v2032_v21 }
0x1061   :  { %v2055_v17 = vmul.f32 %v7452_v40, %v2049_v44 }
0x1062   :  { %v2054_v47 = vmul.f32 %v7452_v40, %v2048_v45 }
0x1063   :  { %v7463_v52 = vadd.f32 %v7455_v46, %v2055_v17 }
0x1064   :  { %v7460_v48 = vadd.f32 %v7455_v46, %v2054_v47 }
0x1066   :  { %6472 = vmatprep.mubr.msk.f32.mxu1 %vm65_vm0, %v7460_v48 }
0x1067   :  { %6473 = vmatmul.mubr.msk.f32.vlgmr.msra.gmra.mrb[24].mxu1 %vm65_vm0, %v7463_v52 }
0x1068   :  { %6477 = vmatprep.mubr.msk.f32.mxu1 %vm7053_vm1, %v7052_v8 }
0x113a   :  { %v6474_v10 = vpop.f32.mrb[24].mxu1 }
0x113b   :  { %v7472_v12 = vadd.f32 %v6474_v10, %v7159_v13  ;;  %v2134_v54 = vpop.f32.mrb[25].mxu1 }
0x113c   :  { %v7475_v55 = vadd.f32 %v2134_v54, %v7159_v13 }
0x113d   :  { %2221 = vrot.lane.b32.xlu1 %v7472_v12, %s7054_s19 }
0x113e   :  { %2144 = vrot.lane.b32.xlu0 %v7475_v55, %s7054_s19 }
0x11af   :  { %v2222_v57 = vpop.permute.xlu1 %2221 }
0x11b0   :  { %v2145_v56 = vpop.permute.xlu0 %2144 }
0x11b1   :  { %6476 = vmatpush3.xpose.msk.msra.mxu1 %vm150_vm2, %v2145_v56 }
0x11b2   :  { %6480 = vmatprep.subr.mxu1 %v7052_v8 }
0x11b4   :  { %6478 = vmatmul.mubr.msk.f32.vlgmr.msra.gmra.mrb[26].mxu1 %vm150_vm2, %v7475_v55 }
0x11b5   :  { %6481 = vmatpush3.xpose.msk.msra.mxu1 %vm150_vm2, %v2222_v57  ;;  %6482 = vmatprep.mubr.msk.f32.mxu1 %vm7053_vm1, %v7052_v8 }
0x11b6   :  { %6490 = vmatprep.subr.mxu1 %v7052_v8 }
0x11b8   :  { %6483 = vmatmul.mubr.msk.f32.vlgmr.msra.gmra.mrb[28].mxu1 %vm150_vm2, %v7472_v12 }
0x11b9   :  { %6492 = vmatprep.mubr.msk.f32.mxu1 %vm7053_vm1, %v7052_v8 }
0x1287   :  { %v2216_v58 = vpop.f32.mrb[26].mxu1 }
0x1288   :  { %v6479_v59 = vpop.f32.mrb[27].mxu1  ;;  %v2297_v9 = vmul.f32 0.35355338, %v2216_v58 }
0x128a   :  { %v2299_v14 = vsel %vm150_vm2, %v2297_v9, -inf }
0x128b   :  { %v2293_v60 = vpop.f32.mrb[28].mxu1 }
0x128c   :  { %v2298_v62 = vmul.f32 0.35355338, %v2293_v60  ;;  %v6484_v63 = vpop.f32.mrb[29].mxu1 }
0x128e   :  { %v2302_v0 = vsel %vm150_vm2, %v2298_v62, -inf }
0x128f   :  { %2303 = vmax.xlane.f32.xlu1 %v2302_v0 }
0x12a0   :  { %2553 = vrot.lane.b32.xlu1 %v7472_v12, %s7057_s21 }
0x12a4   :  { %2551 = vrot.lane.b32.xlu1 %v7472_v12, %s7056_s20 }
0x131c   :  { %v2304_v1 = vpop.xlane.xlu1 %2303 }
0x131d   :  { %v2306_v2 = vsub.f32 %v2298_v62, %v2304_v1 }
0x131f   :  { %v2309_v4 = vmul.f32 1.442695, %v2306_v2 }
0x1320   :  { %v2554_v21 = vpop.permute.xlu1 %2553 }
0x1321   :  { %6917 = vpow2.f32 %v2309_v4 }
0x1324   :  { %v2552_v25 = vpop.permute.xlu1 %2551 }
0x132b   :  { %v6918_v7 = vpop.eup %6917 }
0x132c   :  { %v2314_v5 = vsel %vm150_vm2, %v6918_v7, 0.0 }
0x132d   :  { %2315 = vadd.xlane.f32.xlu0 %v2314_v5 }
0x1343   :  { %2397 = vrot.lane.b32.xlu0 %v7472_v12, %s7055_s5 }
0x1362   :  { %2300 = vmax.xlane.f32.xlu0 %v2299_v14 }
0x1378   :  { %2321 = vrot.lane.b32.xlu0 %v7475_v55, %s7055_s5 }
0x137c   :  { %2473 = vrot.lane.b32.xlu0 %v7475_v55, %s7056_s20 }
0x13ba   :  { %v2316_v15 = vpop.xlane.xlu0 %2315 }
0x13bb   :  { %6919 = vrcp.f32 %v2316_v15 }
0x13be   :  { %v2398_v19 = vpop.permute.xlu0 %2397 }
0x13bf   :  { %6491 = vmatpush3.msra.mxu1 %v2398_v19 }
0x13c0   :  { %6500 = vmatprep.subr.mxu1 %v7052_v8 }
0x13c5   :  { %v6920_v20 = vpop.eup %6919 }
0x13c6   :  { %v2320_v23 = vmul.f32 %v6920_v20, %v6918_v7 }
0x13c8   :  { %6493 = vmatmul.mubr.msk.f32.vlgmr.msra.gmra.mrb[30].mxu1 %vm150_vm2, %v2320_v23 }
0x13c9   :  { %6501 = vmatpush3.xpose.msk.msra.mxu1 %vm150_vm2, %v2554_v21  ;;  %6502 = vmatprep.mubr.msk.f32.mxu1 %vm7053_vm1, %v7052_v8 }
0x13ca   :  { %6510 = vmatprep.subr.mxu1 %v7052_v8 }
0x13cc   :  { %6503 = vmatmul.mubr.msk.f32.vlgmr.msra.gmra.mrb[32].mxu1 %vm150_vm2, %v2552_v25 }
0x13cd   :  { %6512 = vmatprep.mubr.msk.f32.mxu1 %vm7053_vm1, %v7052_v8 }
0x13ef   :  { %v2301_v26 = vpop.xlane.xlu0 %2300 }
0x13f0   :  { %v2305_v28 = vsub.f32 %v2297_v9, %v2301_v26 }
0x13f2   :  { %v2307_v29 = vmul.f32 1.442695, %v2305_v28 }
0x13f3   :  { %v2322_v32 = vpop.permute.xlu0 %2321 }
0x13f4   :  { %6921 = vpow2.f32 %v2307_v29  ;;  %6486 = vmatpush3.msra.mxu0 %v2322_v32 }
0x13f5   :  { %6495 = vmatprep.subr.mxu0 %v7052_v8 }
0x13f7   :  { %v2474_v44 = vpop.permute.xlu0 %2473 }
0x13fe   :  { %v6922_v33 = vpop.eup %6921 }
0x13ff   :  { %v2311_v34 = vsel %vm150_vm2, %v6922_v33, 0.0 }
0x1400   :  { %2312 = vadd.xlane.f32.xlu1 %v2311_v34 }
0x1411   :  { %2475 = vrot.lane.b32.xlu1 %v7475_v55, %s7057_s21 }
0x148d   :  { %v2313_v35 = vpop.xlane.xlu1 %2312 }
0x148e   :  { %6923 = vrcp.f32 %v2313_v35 }
0x1491   :  { %v2476_v39 = vpop.permute.xlu1 %2475 }
0x1498   :  { %v6924_v36 = vpop.eup %6923 }
0x1499   :  { %v2319_v37 = vmul.f32 %v6924_v36, %v6922_v33 }
0x149b   :  { %6488 = vmatmul.mubr.msk.f32.vlgmr.msra.gmra.mrb[16].mxu0 %vm150_vm2, %v2319_v37  ;;  %v7520_v16 = vpop.f32.mrb[30].mxu1 }
0x149c   :  { %6496 = vmatpush3.xpose.msk.msra.mxu0 %vm150_vm2, %v2476_v39  ;;  %v6494_v42 = vpop.f32.mrb[31].mxu1  ;;  %6497 = vmatprep.mubr.msk.f32.mxu0 %vm7053_vm1, %v7052_v8 }
0x149d   :  { %6505 = vmatprep.subr.mxu0 %v7052_v8 }
0x149f   :  { %6498 = vmatmul.mubr.msk.f32.vlgmr.msra.gmra.mrb[18].mxu0 %vm150_vm2, %v2474_v44  ;;  %v2625_v45 = vpop.f32.mrb[32].mxu1 }
0x14a0   :  { %v2630_v17 = vmul.f32 0.35355338, %v2625_v45  ;;  %v6504_v47 = vpop.f32.mrb[33].mxu1  ;;  %6507 = vmatprep.mubr.msk.f32.mxu0 %vm7053_vm1, %v7052_v8 }
0x14a2   :  { %v2634_v10 = vsel %vm150_vm2, %v2630_v17, -inf }
0x14a3   :  { %2635 = vmax.xlane.f32.xlu1 %v2634_v10 }
0x14b4   :  { %2969 = vrot.lane.b32.xlu1 %v7475_v55, %s7058_s22 }
0x14b8   :  { %2967 = vrot.lane.b32.xlu1 %v7475_v55, %s7060_s24 }
0x14bc   :  { %3045 = vrot.lane.b32.xlu1 %v7472_v12, %s7060_s24 }
0x1530   :  { %v2636_v54 = vpop.xlane.xlu1 %2635 }
0x1531   :  { %v2638_v56 = vsub.f32 %v2630_v17, %v2636_v54 }
0x1533   :  { %v2641_v57 = vmul.f32 1.442695, %v2638_v56 }
0x1534   :  { %v2970_v5 = vpop.permute.xlu1 %2969 }
0x1535   :  { %6925 = vpow2.f32 %v2641_v57 }
0x1538   :  { %v2968_v15 = vpop.permute.xlu1 %2967 }
0x153c   :  { %v3046_v20 = vpop.permute.xlu1 %3045 }
0x153f   :  { %v6926_v58 = vpop.eup %6925 }
0x1540   :  { %v2646_v59 = vsel %vm150_vm2, %v6926_v58, 0.0 }
0x1541   :  { %2647 = vadd.xlane.f32.xlu0 %v2646_v59 }
0x1557   :  { %2729 = vrot.lane.b32.xlu0 %v7472_v12, %s7059_s23 }
0x155b   :  { %3047 = vrot.lane.b32.xlu0 %v7472_v12, %s7058_s22 }
0x156e   :  { %v7541_v60 = vpop.f32.mrb[16].mxu0 }
0x156f   :  { %v6489_v62 = vpop.f32.mrb[17].mxu0 }
0x1572   :  { %v2547_v63 = vpop.f32.mrb[18].mxu0 }
0x1573   :  { %v6499_v0 = vpop.f32.mrb[19].mxu0  ;;  %v2629_v1 = vmul.f32 0.35355338, %v2547_v63 }
0x1575   :  { %v2631_v2 = vsel %vm150_vm2, %v2629_v1, -inf }
0x157a   :  { %2632 = vmax.xlane.f32.xlu0 %v2631_v2 }
0x1590   :  { %2653 = vrot.lane.b32.xlu0 %v7475_v55, %s7059_s23 }
0x1594   :  { %3147 = vrot.lane.b32.xlu0 %v7475_v55, %s7061_s25 }
0x1598   :  { %3384 = vrot.lane.b32.xlu0 %v7475_v55, %s7062_s26 }
0x159c   :  { %3462 = vrot.lane.b32.xlu0 %v7472_v12, %s7062_s26 }
0x15a0   :  { %3382 = vrot.lane.b32.xlu0 %v7475_v55, %s7063_s27 }
0x15a4   :  { %3460 = vrot.lane.b32.xlu0 %v7472_v12, %s7063_s27 }
0x15ce   :  { %v2648_v4 = vpop.xlane.xlu0 %2647 }
0x15cf   :  { %6927 = vrcp.f32 %v2648_v4 }
0x15d2   :  { %v2730_v7 = vpop.permute.xlu0 %2729 }
0x15d3   :  { %6511 = vmatpush3.msra.mxu1 %v2730_v7 }
0x15d4   :  { %6525 = vmatprep.subr.mxu1 %v7052_v8 }
0x15d6   :  { %v3048_v19 = vpop.permute.xlu0 %3047 }
0x15d9   :  { %v6928_v9 = vpop.eup %6927 }
0x15da   :  { %v2652_v14 = vmul.f32 %v6928_v9, %v6926_v58 }
0x15dc   :  { %6513 = vmatmul.mubr.msk.f32.vlgmr.msra.gmra.mrb[34].mxu1 %vm150_vm2, %v2652_v14 }
0x15dd   :  { %6526 = vmatpush3.xpose.msk.msra.mxu1 %vm150_vm2, %v2970_v5  ;;  %6527 = vmatprep.mubr.msk.f32.mxu1 %vm7053_vm1, %v7052_v8 }
0x15de   :  { %6530 = vmatprep.subr.mxu1 %v7052_v8 }
0x15e0   :  { %6528 = vmatmul.mubr.msk.f32.vlgmr.msra.gmra.mrb[36].mxu1 %vm150_vm2, %v2968_v15 }
0x15e1   :  { %6531 = vmatpush3.xpose.msk.msra.mxu1 %vm150_vm2, %v3048_v19  ;;  %6532 = vmatprep.mubr.msk.f32.mxu1 %vm7053_vm1, %v7052_v8 }
0x15e2   :  { %6540 = vmatprep.subr.mxu1 %v7052_v8 }
0x15e4   :  { %6533 = vmatmul.mubr.msk.f32.vlgmr.msra.gmra.mrb[38].mxu1 %vm150_vm2, %v3046_v20 }
0x15e5   :  { %6542 = vmatprep.mubr.msk.f32.mxu1 %vm7053_vm1, %v7052_v8 }
0x1607   :  { %v2633_v21 = vpop.xlane.xlu0 %2632 }
0x1608   :  { %v2637_v23 = vsub.f32 %v2629_v1, %v2633_v21 }
0x160a   :  { %v2639_v25 = vmul.f32 1.442695, %v2637_v23 }
0x160b   :  { %v2654_v26 = vpop.permute.xlu0 %2653 }
0x160c   :  { %6929 = vpow2.f32 %v2639_v25  ;;  %6506 = vmatpush3.msra.mxu0 %v2654_v26 }
0x160d   :  { %6515 = vmatprep.subr.mxu0 %v7265_v30 }
0x160f   :  { %v3148_v7 = vpop.permute.xlu0 %3147 }
0x1616   :  { %v6930_v28 = vpop.eup %6929 }
0x1617   :  { %v2643_v29 = vsel %vm150_vm2, %v6930_v28, 0.0 }
0x1618   :  { %2644 = vadd.xlane.f32.xlu1 %v2643_v29 }
0x16a5   :  { %v2645_v32 = vpop.xlane.xlu1 %2644 }
0x16a6   :  { %6931 = vrcp.f32 %v2645_v32 }
0x16af   :  { %v2801_v33 = vpop.f32.mrb[34].mxu1 }
0x16b0   :  { %v6932_v34 = vpop.eup %6931  ;;  %v6514_v35 = vpop.f32.mrb[35].mxu1 }
0x16b1   :  { %v2651_v36 = vmul.f32 %v6932_v34, %v6930_v28 }
0x16b3   :  { %6508 = vmatmul.mubr.msk.f32.vlgmr.msra.gmra.mrb[20].mxu0 %vm150_vm2, %v2651_v36  ;;  %v3041_v37 = vpop.f32.mrb[36].mxu1 }
0x16b4   :  { %v3123_v39 = vmul.f32 0.35355338, %v3041_v37  ;;  %v6529_v42 = vpop.f32.mrb[37].mxu1  ;;  %6516 = vmatpush3.msra.mxu0 %v7265_v30 }
0x16b5   :  { %6520 = vmatprep.subr.mxu0 %v7272_v31 }
0x16b6   :  { %v3125_v44 = vsel %vm150_vm2, %v3123_v39, -inf }
0x16b7   :  { %3126 = vmax.xlane.f32.xlu1 %v3125_v44  ;;  %v3119_v45 = vpop.f32.mrb[38].mxu1 }
0x16b8   :  { %v3124_v17 = vmul.f32 0.35355338, %v3119_v45  ;;  %v6534_v47 = vpop.f32.mrb[39].mxu1 }
0x16ba   :  { %v3128_v10 = vsel %vm150_vm2, %v3124_v17, -inf }
0x16bb   :  { %3129 = vmax.xlane.f32.xlu1 %v3128_v10 }
0x1744   :  { %v3127_v54 = vpop.xlane.xlu1 %3126 }
0x1745   :  { %v3131_v56 = vsub.f32 %v3123_v39, %v3127_v54 }
0x1747   :  { %v3133_v57 = vmul.f32 1.442695, %v3131_v56 }
0x1748   :  { %v3130_v58 = vpop.xlane.xlu1 %3129 }
0x1749   :  { %6933 = vpow2.f32 %v3133_v57  ;;  %v3132_v59 = vsub.f32 %v3124_v17, %v3130_v58 }
0x174b   :  { %v3135_v62 = vmul.f32 1.442695, %v3132_v59 }
0x174d   :  { %6935 = vpow2.f32 %v3135_v62 }
0x1753   :  { %v6934_v30 = vpop.eup %6933 }
0x1754   :  { %v3137_v63 = vsel %vm150_vm2, %v6934_v30, 0.0 }
0x1755   :  { %3138 = vadd.xlane.f32.xlu1 %v3137_v63 }
0x1757   :  { %v6936_v0 = vpop.eup %6935 }
0x1758   :  { %v3140_v1 = vsel %vm150_vm2, %v6936_v0, 0.0 }
0x1759   :  { %3141 = vadd.xlane.f32.xlu1 %v3140_v1 }
0x176a   :  { %3223 = vrot.lane.b32.xlu1 %v7472_v12, %s7061_s25 }
0x1786   :  { %v2725_v2 = vpop.f32.mrb[20].mxu0 }
0x1787   :  { %v6509_v4 = vpop.f32.mrb[21].mxu0  ;;  %6517 = vmatprep.mubr.msk.f32.mxu0 %vm150_vm2, %v2725_v2 }
0x1788   :  { %6518 = vmatmul.mubr.msk.f32.vlgmr.msra.gmra.mrb[22].mxu0 %vm150_vm2, %v2801_v33 }
0x1789   :  { %6522 = vmatprep.mubr.msk.f32.mxu0 %vm150_vm2, %v7541_v60  ;;  %6521 = vmatpush3.msra.mxu0 %v7272_v31  ;;  %v3385_v60 = vpop.permute.xlu0 %3384 }
0x178a   :  { %6535 = vmatprep.subr.mxu0 %v7052_v8 }
0x178d   :  { %v3463_v19 = vpop.permute.xlu0 %3462 }
0x1790   :  { %6523 = vmatmul.mubr.msk.f32.vlgmr.msra.gmra.mrb[22].mxu0 %vm150_vm2, %v7520_v16 }
0x1791   :  { %6536 = vmatpush3.msra.mxu0 %v3148_v7  ;;  %6537 = vmatprep.mubr.msk.f32.mxu0 %vm7053_vm1, %v7052_v8  ;;  %v3383_v21 = vpop.permute.xlu0 %3382 }
0x1792   :  { %6545 = vmatprep.subr.mxu0 %v7294_v50 }
0x1795   :  { %v3461_v28 = vpop.permute.xlu0 %3460 }
0x17e2   :  { %v3139_v5 = vpop.xlane.xlu1 %3138 }
0x17e3   :  { %6937 = vrcp.f32 %v3139_v5 }
0x17e6   :  { %v3142_v9 = vpop.xlane.xlu1 %3141 }
0x17e7   :  { %6939 = vrcp.f32 %v3142_v9 }
0x17ea   :  { %v3224_v14 = vpop.permute.xlu1 %3223 }
0x17eb   :  { %6541 = vmatpush3.msra.mxu1 %v3224_v14 }
0x17ec   :  { %6550 = vmatprep.subr.mxu1 %v7052_v8 }
0x17ed   :  { %v6938_v31 = vpop.eup %6937 }
0x17ee   :  { %v3145_v15 = vmul.f32 %v6938_v31, %v6934_v30 }
0x17f0   :  { %6538 = vmatmul.mubr.msk.f32.vlgmr.msra.gmra.mrb[24].mxu0 %vm150_vm2, %v3145_v15 }
0x17f1   :  { %v6940_v16 = vpop.eup %6939  ;;  %6546 = vmatpush3.msra.mxu0 %v7294_v50 }
0x17f2   :  { %v3146_v20 = vmul.f32 %v6940_v16, %v6936_v0  ;;  %6555 = vmatprep.subr.mxu0 %v7052_v8 }
0x17f4   :  { %6543 = vmatmul.mubr.msk.f32.vlgmr.msra.gmra.mrb[40].mxu1 %vm150_vm2, %v3146_v20 }
0x17f5   :  { %6551 = vmatpush3.xpose.msk.msra.mxu1 %vm150_vm2, %v3385_v60  ;;  %6552 = vmatprep.mubr.msk.f32.mxu1 %vm7053_vm1, %v7052_v8 }
0x17f6   :  { %6560 = vmatprep.subr.mxu1 %v7052_v8 }
0x17f8   :  { %6553 = vmatmul.mubr.msk.f32.vlgmr.msra.gmra.mrb[42].mxu1 %vm150_vm2, %v3383_v21 }
0x17f9   :  { %6562 = vmatprep.mubr.msk.f32.mxu1 %vm7053_vm1, %v7052_v8 }
0x18c3   :  { %v3219_v23 = vpop.f32.mrb[24].mxu0 }
0x18c4   :  { %v6539_v50 = vpop.f32.mrb[25].mxu0  ;;  %6547 = vmatprep.mubr.msk.f32.mxu0 %vm150_vm2, %v3219_v23 }
0x18c7   :  { %v3295_v25 = vpop.f32.mrb[40].mxu1 }
0x18c8   :  { %v6544_v26 = vpop.f32.mrb[41].mxu1  ;;  %6548 = vmatmul.mubr.msk.f32.vlgmr.msra.gmra.mrb[22].mxu0 %vm150_vm2, %v3295_v25 }
0x18c9   :  { %6556 = vmatpush3.xpose.msk.msra.mxu0 %vm150_vm2, %v3463_v19  ;;  %6557 = vmatprep.mubr.msk.f32.mxu0 %vm7053_vm1, %v7052_v8 }
0x18ca   :  { %6565 = vmatprep.subr.mxu0 %v7052_v8 }
0x18cb   :  { %v3456_v29 = vpop.f32.mrb[42].mxu1 }
0x18cc   :  { %v3538_v32 = vmul.f32 0.35355338, %v3456_v29  ;;  %v6554_v33 = vpop.f32.mrb[43].mxu1  ;;  %6558 = vmatmul.mubr.msk.f32.vlgmr.msra.gmra.mrb[26].mxu0 %vm150_vm2, %v3461_v28 }
0x18cd   :  { %6567 = vmatprep.mubr.msk.f32.mxu0 %vm7053_vm1, %v7052_v8 }
0x18ce   :  { %v3540_v34 = vsel %vm150_vm2, %v3538_v32, -inf }
0x18cf   :  { %3541 = vmax.xlane.f32.xlu1 %v3540_v34 }
0x195c   :  { %v3542_v35 = vpop.xlane.xlu1 %3541 }
0x195d   :  { %v3546_v36 = vsub.f32 %v3538_v32, %v3542_v35 }
0x195f   :  { %v3548_v37 = vmul.f32 1.442695, %v3546_v36 }
0x1961   :  { %6941 = vpow2.f32 %v3548_v37 }
0x196b   :  { %v6942_v17 = vpop.eup %6941 }
0x196c   :  { %v3552_v47 = vsel %vm150_vm2, %v6942_v17, 0.0 }
0x199f   :  { %v3534_v39 = vpop.f32.mrb[26].mxu0 }
0x19a0   :  { %v3539_v42 = vmul.f32 0.35355338, %v3534_v39  ;;  %v6559_v44 = vpop.f32.mrb[27].mxu0 }
0x19a2   :  { %v3543_v45 = vsel %vm150_vm2, %v3539_v42, -inf }
0x19a3   :  { %3544 = vmax.xlane.f32.xlu0 %v3543_v45 }
0x19a7   :  { %3553 = vadd.xlane.f32.xlu0 %v3552_v47 }
0x19bd   :  { %3562 = vrot.lane.b32.xlu0 %v7475_v55, %s7064_s12 }
0x1a30   :  { %v3545_v10 = vpop.xlane.xlu0 %3544 }
0x1a31   :  { %v3547_v54 = vsub.f32 %v3539_v42, %v3545_v10 }
0x1a33   :  { %v3550_v56 = vmul.f32 1.442695, %v3547_v54 }
0x1a34   :  { %v3554_v57 = vpop.xlane.xlu0 %3553 }
0x1a35   :  { %6943 = vpow2.f32 %v3550_v56 }
0x1a36   :  { %6945 = vrcp.f32 %v3554_v57 }
0x1a38   :  { %v3563_v58 = vpop.permute.xlu0 %3562 }
0x1a39   :  { %6561 = vmatpush3.msra.mxu1 %v3563_v58 }
0x1a3a   :  { %6787 = vmatprep.subr.bf16.mxu1 %v7355_v11 }
0x1a3f   :  { %v6944_v59 = vpop.eup %6943 }
0x1a40   :  { %v6946_v62 = vpop.eup %6945  ;;  %v3555_v30 = vsel %vm150_vm2, %v6944_v59, 0.0 }
0x1a41   :  { %v3560_v63 = vmul.f32 %v6946_v62, %v6942_v17  ;;  %3556 = vadd.xlane.f32.xlu1 %v3555_v30 }
0x1a43   :  { %6563 = vmatmul.mubr.msk.f32.vlgmr.msra.gmra.mrb[44].mxu1 %vm150_vm2, %v3560_v63 }
0x1a44   :  { %6789 = vmatpush3.bf16.msra.mxu1 %v7355_v11 }
0x1a45   :  { %6791 = vmatprep.subr.bf16.mxu1 %v7364_v18 }
0x1a48   :  { %6793 = vmatpush3.bf16.msra.mxu1 %v7364_v18 }
0x1a49   :  { %6811 = vmatprep.subr.bf16.mxu1 %v7125_v3 }
0x1a52   :  { %3638 = vrot.lane.b32.xlu1 %v7472_v12, %s7064_s12 }
0x1ace   :  { %v3557_v55 = vpop.xlane.xlu1 %3556 }
0x1acf   :  { %6947 = vrcp.f32 %v3557_v55 }
0x1ad2   :  { %v3639_v0 = vpop.permute.xlu1 %3638 }
0x1ad3   :  { %6566 = vmatpush3.msra.mxu0 %v3639_v0 }
0x1ad4   :  { %6570 = vmatprep.subr.mxu0 %v7330_v41 }
0x1ad9   :  { %v6948_v1 = vpop.eup %6947 }
0x1ada   :  { %v3561_v2 = vmul.f32 %v6948_v1, %v6944_v59 }
0x1adc   :  { %6568 = vmatmul.mubr.msk.f32.vlgmr.msra.gmra.mrb[28].mxu0 %vm150_vm2, %v3561_v2 }
0x1add   :  { %6571 = vmatpush3.msra.mxu0 %v7330_v41 }
0x1ade   :  { %6795 = vmatprep.subr.bf16.mxu0 %v7379_v22 }
0x1b16   :  { %v3634_v4 = vpop.f32.mrb[44].mxu1 }
0x1b17   :  { %v6564_v7 = vpop.f32.mrb[45].mxu1  ;;  %6572 = vmatprep.mubr.msk.f32.mxu0 %vm150_vm2, %v3634_v4 }
0x1baf   :  { %v3710_v5 = vpop.f32.mrb[28].mxu0 }
0x1bb0   :  { %v6569_v12 = vpop.f32.mrb[29].mxu0  ;;  %6573 = vmatmul.mubr.msk.f32.vlgmr.msra.gmra.mrb[22].mxu0 %vm150_vm2, %v3710_v5 }
0x1bb1   :  { %6797 = vmatpush3.bf16.msra.mxu0 %v7379_v22 }
0x1bb2   :  { %6799 = vmatprep.subr.bf16.mxu0 %v7384_v24 }
0x1bb5   :  { %6801 = vmatpush3.bf16.msra.mxu0 %v7384_v24 }
0x1bb6   :  { %6803 = vmatprep.subr.bf16.mxu0 %v7395_v27 }
0x1bb9   :  { %6805 = vmatpush3.bf16.msra.mxu0 %v7395_v27 }
0x1bba   :  { %6807 = vmatprep.subr.bf16.mxu0 %v7424_v51 }
0x1bbd   :  { %6809 = vmatpush3.bf16.msra.mxu0 %v7424_v51 }
0x1bbe   :  { %6626 = vmatprep.subr.mxu0 %v7052_v8 }
0x1c83   :  { %v6574_v41 = vpop.f32.mrb[22].mxu0 }
0x1c84   :  { %v3798_v9 = vadd.f32 %v6574_v41, %v7339_v49  ;;  %v3786_v14 = vpop.f32.mrb[23].mxu0 }
0x1c85   :  { %v3797_v60 = vadd.f32 %v3786_v14, %v7339_v49 }
0x1c86   :  { %v3800_v31 = vadd.f32 %v3798_v9, %v7463_v52 }
0x1c87   :  { %v3799_v15 = vadd.f32 %v3797_v60, %v7460_v48 }
0x1c88   :  { %v3804_v16 = vsel %vm65_vm0, %v3800_v31, 0.0 }
0x1c89   :  { %3805 = vadd.xlane.f32.xlu0 %v3804_v16  ;;  %v3801_v19 = vsel %vm65_vm0, %v3799_v15, 0.0 }
0x1c8a   :  { %3802 = vadd.xlane.f32.xlu1 %v3801_v19 }
0x1d16   :  { %v3806_v20 = vpop.xlane.xlu0 %3805 }
0x1d17   :  { %v3808_v21 = vmul.f32 0.03125, %v3806_v20  ;;  %v3803_v23 = vpop.xlane.xlu1 %3802 }
0x1d18   :  { %v3807_v50 = vmul.f32 0.03125, %v3803_v23 }
0x1d19   :  { %v3810_v25 = vsub.f32 %v3800_v31, %v3808_v21 }
0x1d1a   :  { %v3809_v26 = vsub.f32 %v3799_v15, %v3807_v50 }
0x1d1b   :  { %v3812_v28 = vmul.f32 %v3810_v25, %v3810_v25 }
0x1d1c   :  { %v3811_v29 = vmul.f32 %v3809_v26, %v3809_v26 }
0x1d1d   :  { %v3816_v32 = vsel %vm65_vm0, %v3812_v28, 0.0 }
0x1d1e   :  { %3817 = vadd.xlane.f32.xlu1 %v3816_v32  ;;  %v3813_v52 = vsel %vm65_vm0, %v3811_v29, 0.0 }
0x1d1f   :  { %3814 = vadd.xlane.f32.xlu0 %v3813_v52 }
0x1dab   :  { %v3818_v48 = vpop.xlane.xlu1 %3817 }
0x1dac   :  { %v3820_v33 = vmul.f32 0.03125, %v3818_v48  ;;  %v3815_v34 = vpop.xlane.xlu0 %3814 }
0x1dad   :  { %v3819_v35 = vmul.f32 0.03125, %v3815_v34 }
0x1dae   :  { %v3822_v36 = vadd.f32 1e-05, %v3820_v33 }
0x1daf   :  { %v3821_v37 = vadd.f32 1e-05, %v3819_v35 }
0x1db0   :  { %6949 = vrsqrt.f32 %v3822_v36 }
0x1db1   :  { %6951 = vrsqrt.f32 %v3821_v37 }
0x1dba   :  { %v6950_v39 = vpop.eup %6949 }
0x1dbb   :  { %v6952_v42 = vpop.eup %6951  ;;  %v3826_v44 = vmul.f32 %v6950_v39, %v3810_v25 }
0x1dbc   :  { %v3825_v45 = vmul.f32 %v6952_v42, %v3809_v26 }
0x1dbd   :  { %v3828_v17 = vmul.f32 %v3826_v44, %v7403_v38 }
0x1dbe   :  { %v3827_v47 = vmul.f32 %v3825_v45, %v7403_v38 }
0x1dbf   :  { %v3830_v54 = vadd.f32 %v3828_v17, %v7406_v43 }
0x1dc0   :  { %v3829_v10 = vadd.f32 %v3827_v47, %v7406_v43 }
0x1dc2   :  { %6583 = vmatprep.mubr.msk.f32.mxu1 %vm65_vm0, %v3829_v10 }
0x1dc3   :  { %6584 = vmatmul.mubr.msk.f32.vlgmr.msra.gmra.mrb[46].mxu1 %vm65_vm0, %v3830_v54 }
0x1dc4   :  { %6813 = vmatpush3.bf16.msra.mxu1 %v7125_v3 }
0x1dc5   :  { %6815 = vmatprep.subr.bf16.mxu1 %v7132_v6 }
0x1dc8   :  { %6817 = vmatpush3.bf16.msra.mxu1 %v7132_v6 }
0x1dc9   :  { %6616 = vmatprep.subr.mxu1 %v7052_v8 }
0x1e96   :  { %v6585_v56 = vpop.f32.mrb[46].mxu1 }
0x1e97   :  { %v3909_v57 = vadd.f32 %v6585_v56, %v7431_v53  ;;  %v3903_v58 = vpop.f32.mrb[47].mxu1 }
0x1e98   :  { %v3904_v59 = vadd.f32 %v3903_v58, %v7431_v53 }
0x1e99   :  { %v3913_v30 = vmax.f32 %v3909_v57, 0.0 }
0x1e9a   :  { %v3912_v62 = vmax.f32 %v3904_v59, 0.0 }
0x1e9c   :  { %6602 = vmatprep.mubr.msk.f32.mxu0 %vm1940_vm3, %v3912_v62 }
0x1e9d   :  { %6603 = vmatmul.mubr.msk.f32.vlgmr.msra.gmra.mrb[30].mxu0 %vm1940_vm3, %v3913_v30 }
0x1e9e   :  { %6628 = vmatprep.mubr.msk.f32.mxu0 %vm7053_vm1, %v7052_v8 }
0x1f70   :  { %v6604_v3 = vpop.f32.mrb[30].mxu0 }
0x1f71   :  { %v3992_v6 = vadd.f32 %v6604_v3, %v7441_v61  ;;  %v3986_v63 = vpop.f32.mrb[31].mxu0 }
0x1f72   :  { %v3987_v55 = vadd.f32 %v3986_v63, %v7441_v61 }
0x1f73   :  { %v3996_v0 = vadd.f32 %v3992_v6, %v3830_v54 }
0x1f74   :  { %v3995_v1 = vadd.f32 %v3987_v55, %v3829_v10 }
0x1f75   :  { %v4000_v2 = vsel %vm65_vm0, %v3996_v0, 0.0 }
0x1f76   :  { %4001 = vadd.xlane.f32.xlu1 %v4000_v2  ;;  %v3997_v4 = vsel %vm65_vm0, %v3995_v1, 0.0 }
0x1f77   :  { %3998 = vadd.xlane.f32.xlu0 %v3997_v4 }
0x2003   :  { %v4002_v7 = vpop.xlane.xlu1 %4001 }
0x2004   :  { %v4004_v5 = vmul.f32 0.03125, %v4002_v7  ;;  %v3999_v12 = vpop.xlane.xlu0 %3998 }
0x2005   :  { %v4003_v41 = vmul.f32 0.03125, %v3999_v12 }
0x2006   :  { %v4006_v9 = vsub.f32 %v3996_v0, %v4004_v5 }
0x2007   :  { %v4005_v14 = vsub.f32 %v3995_v1, %v4003_v41 }
0x2008   :  { %v4008_v60 = vmul.f32 %v4006_v9, %v4006_v9 }
0x2009   :  { %v4007_v31 = vmul.f32 %v4005_v14, %v4005_v14 }
0x200a   :  { %v4012_v15 = vsel %vm65_vm0, %v4008_v60, 0.0 }
0x200b   :  { %4013 = vadd.xlane.f32.xlu1 %v4012_v15  ;;  %v4009_v16 = vsel %vm65_vm0, %v4007_v31, 0.0 }
0x200c   :  { %4010 = vadd.xlane.f32.xlu0 %v4009_v16 }
0x2098   :  { %v4014_v19 = vpop.xlane.xlu1 %4013 }
0x2099   :  { %v4016_v20 = vmul.f32 0.03125, %v4014_v19  ;;  %v4011_v21 = vpop.xlane.xlu0 %4010 }
0x209a   :  { %v4015_v23 = vmul.f32 0.03125, %v4011_v21 }
0x209b   :  { %v4018_v50 = vadd.f32 1e-05, %v4016_v20 }
0x209c   :  { %v4017_v25 = vadd.f32 1e-05, %v4015_v23 }
0x209d   :  { %6953 = vrsqrt.f32 %v4018_v50 }
0x209e   :  { %6955 = vrsqrt.f32 %v4017_v25 }
0x20a7   :  { %v6954_v26 = vpop.eup %6953 }
0x20a8   :  { %v6956_v28 = vpop.eup %6955  ;;  %v4022_v29 = vmul.f32 %v6954_v26, %v4006_v9 }
0x20a9   :  { %v4021_v32 = vmul.f32 %v6956_v28, %v4005_v14 }
0x20aa   :  { %v4024_v52 = vmul.f32 %v4022_v29, %v7452_v40 }
0x20ab   :  { %v4023_v48 = vmul.f32 %v4021_v32, %v7452_v40 }
0x20ac   :  { %v7677_v34 = vadd.f32 %v4024_v52, %v7455_v46 }
0x20ad   :  { %v7674_v33 = vadd.f32 %v4023_v48, %v7455_v46 }
0x20af   :  { %6613 = vmatprep.mubr.msk.f32.mxu1 %vm65_vm0, %v7674_v33 }
0x20b0   :  { %6614 = vmatmul.mubr.msk.f32.vlgmr.msra.gmra.mrb[48].mxu1 %vm65_vm0, %v7677_v34 }
0x20b1   :  { %6618 = vmatprep.mubr.msk.f32.mxu1 %vm7053_vm1, %v7052_v8 }
0x2183   :  { %v6615_v35 = vpop.f32.mrb[48].mxu1 }
0x2184   :  { %v7686_v36 = vadd.f32 %v6615_v35, %v7159_v13  ;;  %v4099_v37 = vpop.f32.mrb[49].mxu1 }
0x2185   :  { %v7689_v39 = vadd.f32 %v4099_v37, %v7159_v13 }
0x2186   :  { %4186 = vrot.lane.b32.xlu1 %v7686_v36, %s7054_s19 }
0x2187   :  { %4109 = vrot.lane.b32.xlu0 %v7689_v39, %s7054_s19 }
0x21f8   :  { %v4187_v44 = vpop.permute.xlu1 %4186 }
0x21f9   :  { %v4110_v42 = vpop.permute.xlu0 %4109 }
0x21fa   :  { %6617 = vmatpush3.xpose.msk.msra.mxu1 %vm150_vm2, %v4110_v42 }
0x21fb   :  { %6621 = vmatprep.subr.mxu1 %v7052_v8 }
0x21fd   :  { %6619 = vmatmul.mubr.msk.f32.vlgmr.msra.gmra.mrb[50].mxu1 %vm150_vm2, %v7689_v39 }
0x21fe   :  { %6622 = vmatpush3.xpose.msk.msra.mxu1 %vm150_vm2, %v4187_v44  ;;  %6623 = vmatprep.mubr.msk.f32.mxu1 %vm7053_vm1, %v7052_v8 }
0x21ff   :  { %6631 = vmatprep.subr.mxu1 %v7052_v8 }
0x2201   :  { %6624 = vmatmul.mubr.msk.f32.vlgmr.msra.gmra.mrb[52].mxu1 %vm150_vm2, %v7686_v36 }
0x2202   :  { %6633 = vmatprep.mubr.msk.f32.mxu1 %vm7053_vm1, %v7052_v8 }
0x22d0   :  { %v4181_v13 = vpop.f32.mrb[50].mxu1 }
0x22d1   :  { %v6620_v45 = vpop.f32.mrb[51].mxu1  ;;  %v4262_v30 = vmul.f32 0.35355338, %v4181_v13 }
0x22d3   :  { %v4264_v3 = vsel %vm150_vm2, %v4262_v30, -inf }
0x22d4   :  { %v4258_v17 = vpop.f32.mrb[52].mxu1 }
0x22d5   :  { %v4263_v47 = vmul.f32 0.35355338, %v4258_v17  ;;  %v6625_v10 = vpop.f32.mrb[53].mxu1 }
0x22d7   :  { %v4267_v54 = vsel %vm150_vm2, %v4263_v47, -inf }
0x22d8   :  { %4268 = vmax.xlane.f32.xlu1 %v4267_v54 }
0x22e9   :  { %4518 = vrot.lane.b32.xlu1 %v7686_v36, %s7057_s21 }
0x22ed   :  { %4516 = vrot.lane.b32.xlu1 %v7686_v36, %s7056_s20 }
0x2365   :  { %v4269_v56 = vpop.xlane.xlu1 %4268 }
0x2366   :  { %v4271_v57 = vsub.f32 %v4263_v47, %v4269_v56 }
0x2368   :  { %v4274_v58 = vmul.f32 1.442695, %v4271_v57 }
0x2369   :  { %v4519_v0 = vpop.permute.xlu1 %4518 }
0x236a   :  { %6957 = vpow2.f32 %v4274_v58 }
0x236d   :  { %v4517_v2 = vpop.permute.xlu1 %4516 }
0x2374   :  { %v6958_v59 = vpop.eup %6957 }
0x2375   :  { %v4279_v62 = vsel %vm150_vm2, %v6958_v59, 0.0 }
0x2376   :  { %4280 = vadd.xlane.f32.xlu0 %v4279_v62 }
0x238c   :  { %4362 = vrot.lane.b32.xlu0 %v7686_v36, %s7055_s5 }
0x23ab   :  { %4265 = vmax.xlane.f32.xlu0 %v4264_v3 }
0x23c1   :  { %4286 = vrot.lane.b32.xlu0 %v7689_v39, %s7055_s5 }
0x23c5   :  { %4438 = vrot.lane.b32.xlu0 %v7689_v39, %s7056_s20 }
0x2403   :  { %v4281_v6 = vpop.xlane.xlu0 %4280 }
0x2404   :  { %6959 = vrcp.f32 %v4281_v6  ;;  %v6997_v6 = vld [vmem:[%s7904_s2 + $0x8] sm:$0xff] }
0x2407   :  { %v4363_v63 = vpop.permute.xlu0 %4362 }
0x2408   :  { %6632 = vmatpush3.msra.mxu1 %v4363_v63 }
0x2409   :  { %6641 = vmatprep.subr.mxu1 %v7052_v8 }
0x240e   :  { %v6960_v55 = vpop.eup %6959 }
0x240f   :  { %v4285_v1 = vmul.f32 %v6960_v55, %v6958_v59 }
0x2411   :  { %6634 = vmatmul.mubr.msk.f32.vlgmr.msra.gmra.mrb[54].mxu1 %vm150_vm2, %v4285_v1 }
0x2412   :  { %6642 = vmatpush3.xpose.msk.msra.mxu1 %vm150_vm2, %v4519_v0  ;;  %6643 = vmatprep.mubr.msk.f32.mxu1 %vm7053_vm1, %v7052_v8 }
0x2413   :  { %6651 = vmatprep.subr.mxu1 %v7052_v8 }
0x2415   :  { %6644 = vmatmul.mubr.msk.f32.vlgmr.msra.gmra.mrb[56].mxu1 %vm150_vm2, %v4517_v2 }
0x2416   :  { %6653 = vmatprep.mubr.msk.f32.mxu1 %vm7053_vm1, %v7052_v8 }
0x2438   :  { %v4266_v4 = vpop.xlane.xlu0 %4265 }
0x2439   :  { %v4270_v7 = vsub.f32 %v4262_v30, %v4266_v4 }
0x243b   :  { %v4272_v5 = vmul.f32 1.442695, %v4270_v7 }
0x243c   :  { %v4287_v12 = vpop.permute.xlu0 %4286 }
0x243d   :  { %6961 = vpow2.f32 %v4272_v5  ;;  %6627 = vmatpush3.msra.mxu0 %v4287_v12 }
0x243e   :  { %6636 = vmatprep.subr.mxu0 %v7052_v8 }
0x2440   :  { %v4439_v20 = vpop.permute.xlu0 %4438 }
0x2447   :  { %v6962_v41 = vpop.eup %6961 }
0x2448   :  { %v4276_v9 = vsel %vm150_vm2, %v6962_v41, 0.0 }
0x2449   :  { %4277 = vadd.xlane.f32.xlu1 %v4276_v9  ;;  %v6998_v9 = vld [vmem:[%s7904_s2] sm:$0xff] }
0x245a   :  { %4440 = vrot.lane.b32.xlu1 %v7689_v39, %s7057_s21 }
0x24d6   :  { %v4278_v14 = vpop.xlane.xlu1 %4277 }
0x24d7   :  { %6963 = vrcp.f32 %v4278_v14 }
0x24da   :  { %v4441_v15 = vpop.permute.xlu1 %4440 }
0x24e1   :  { %v6964_v60 = vpop.eup %6963 }
0x24e2   :  { %v4284_v31 = vmul.f32 %v6964_v60, %v6962_v41 }
0x24e4   :  { %6629 = vmatmul.mubr.msk.f32.vlgmr.msra.gmra.mrb[32].mxu0 %vm150_vm2, %v4284_v31  ;;  %v7734_v16 = vpop.f32.mrb[54].mxu1 }
0x24e5   :  { %6637 = vmatpush3.xpose.msk.msra.mxu0 %vm150_vm2, %v4441_v15  ;;  %v6635_v19 = vpop.f32.mrb[55].mxu1  ;;  %6638 = vmatprep.mubr.msk.f32.mxu0 %vm7053_vm1, %v7052_v8 }
0x24e6   :  { %6646 = vmatprep.subr.mxu0 %v7052_v8 }
0x24e8   :  { %6639 = vmatmul.mubr.msk.f32.vlgmr.msra.gmra.mrb[34].mxu0 %vm150_vm2, %v4439_v20  ;;  %v4590_v21 = vpop.f32.mrb[56].mxu1 }
0x24e9   :  { %v4595_v23 = vmul.f32 0.35355338, %v4590_v21  ;;  %v6645_v50 = vpop.f32.mrb[57].mxu1  ;;  %6648 = vmatprep.mubr.msk.f32.mxu0 %vm7053_vm1, %v7052_v8 }
0x24eb   :  { %v4599_v25 = vsel %vm150_vm2, %v4595_v23, -inf }
0x24ec   :  { %4600 = vmax.xlane.f32.xlu1 %v4599_v25 }
0x24fd   :  { %4934 = vrot.lane.b32.xlu1 %v7689_v39, %s7058_s22 }
0x2501   :  { %4932 = vrot.lane.b32.xlu1 %v7689_v39, %s7060_s24 }
0x2505   :  { %5010 = vrot.lane.b32.xlu1 %v7686_v36, %s7060_s24 }
0x2579   :  { %v4601_v26 = vpop.xlane.xlu1 %4600 }
0x257a   :  { %v4603_v28 = vsub.f32 %v4595_v23, %v4601_v26 }
0x257c   :  { %v4606_v29 = vmul.f32 1.442695, %v4603_v28 }
0x257d   :  { %v4935_v47 = vpop.permute.xlu1 %4934 }
0x257e   :  { %6965 = vpow2.f32 %v4606_v29 }
0x2581   :  { %v4933_v56 = vpop.permute.xlu1 %4932 }
0x2585   :  { %v5011_v58 = vpop.permute.xlu1 %5010 }
0x2588   :  { %v6966_v32 = vpop.eup %6965 }
0x2589   :  { %v4611_v52 = vsel %vm150_vm2, %v6966_v32, 0.0 }
0x258a   :  { %4612 = vadd.xlane.f32.xlu0 %v4611_v52 }
0x25a0   :  { %4694 = vrot.lane.b32.xlu0 %v7686_v36, %s7059_s23 }
0x25a4   :  { %5012 = vrot.lane.b32.xlu0 %v7686_v36, %s7058_s22 }
0x25b7   :  { %v7755_v48 = vpop.f32.mrb[32].mxu0 }
0x25b8   :  { %v6630_v35 = vpop.f32.mrb[33].mxu0 }
0x25bb   :  { %v4512_v37 = vpop.f32.mrb[34].mxu0 }
0x25bc   :  { %v6640_v42 = vpop.f32.mrb[35].mxu0  ;;  %v4594_v44 = vmul.f32 0.35355338, %v4512_v37 }
0x25be   :  { %v4596_v13 = vsel %vm150_vm2, %v4594_v44, -inf }
0x25c3   :  { %4597 = vmax.xlane.f32.xlu0 %v4596_v13 }
0x25d9   :  { %4618 = vrot.lane.b32.xlu0 %v7689_v39, %s7059_s23 }
0x25dd   :  { %5112 = vrot.lane.b32.xlu0 %v7689_v39, %s7061_s25 }
0x25e1   :  { %5349 = vrot.lane.b32.xlu0 %v7689_v39, %s7062_s26 }
0x25e5   :  { %5427 = vrot.lane.b32.xlu0 %v7686_v36, %s7062_s26 }
0x25e9   :  { %5347 = vrot.lane.b32.xlu0 %v7689_v39, %s7063_s27 }
0x25ed   :  { %5425 = vrot.lane.b32.xlu0 %v7686_v36, %s7063_s27 }
0x2617   :  { %v4613_v45 = vpop.xlane.xlu0 %4612 }
0x2618   :  { %6967 = vrcp.f32 %v4613_v45 }
0x261b   :  { %v4695_v17 = vpop.permute.xlu0 %4694 }
0x261c   :  { %6652 = vmatpush3.msra.mxu1 %v4695_v17 }
0x261d   :  { %6666 = vmatprep.subr.mxu1 %v7052_v8 }
0x261f   :  { %v5013_v57 = vpop.permute.xlu0 %5012 }
0x2622   :  { %v6968_v10 = vpop.eup %6967 }
0x2623   :  { %v4617_v54 = vmul.f32 %v6968_v10, %v6966_v32 }
0x2625   :  { %6654 = vmatmul.mubr.msk.f32.vlgmr.msra.gmra.mrb[58].mxu1 %vm150_vm2, %v4617_v54 }
0x2626   :  { %6667 = vmatpush3.xpose.msk.msra.mxu1 %vm150_vm2, %v4935_v47  ;;  %6668 = vmatprep.mubr.msk.f32.mxu1 %vm7053_vm1, %v7052_v8 }
0x2627   :  { %6671 = vmatprep.subr.mxu1 %v7052_v8 }
0x2629   :  { %6669 = vmatmul.mubr.msk.f32.vlgmr.msra.gmra.mrb[60].mxu1 %vm150_vm2, %v4933_v56 }
0x262a   :  { %6672 = vmatpush3.xpose.msk.msra.mxu1 %vm150_vm2, %v5013_v57  ;;  %6673 = vmatprep.mubr.msk.f32.mxu1 %vm7053_vm1, %v7052_v8 }
0x262b   :  { %6681 = vmatprep.subr.mxu1 %v7052_v8 }
0x262d   :  { %6674 = vmatmul.mubr.msk.f32.vlgmr.msra.gmra.mrb[62].mxu1 %vm150_vm2, %v5011_v58 }
0x262e   :  { %6683 = vmatprep.mubr.msk.f32.mxu1 %vm7053_vm1, %v7052_v8 }
0x2650   :  { %v4598_v59 = vpop.xlane.xlu0 %4597 }
0x2651   :  { %v4602_v62 = vsub.f32 %v4594_v44, %v4598_v59  ;;  %v6999_v44 = vld [vmem:[%s7904_s2 + $0x10] sm:$0xff] }
0x2653   :  { %v4604_v30 = vmul.f32 1.442695, %v4602_v62 }
0x2654   :  { %v4619_v3 = vpop.permute.xlu0 %4618 }
0x2655   :  { %6969 = vpow2.f32 %v4604_v30  ;;  %6647 = vmatpush3.msra.mxu0 %v4619_v3 }
0x2656   :  { %6656 = vmatprep.subr.mxu0 %v6997_v6 }
0x2658   :  { %v5113_v42 = vpop.permute.xlu0 %5112 }
0x265c   :  { %v5350_v17 = vpop.permute.xlu0 %5349 }
0x265f   :  { %v6970_v63 = vpop.eup %6969 }
0x2660   :  { %v4608_v55 = vsel %vm150_vm2, %v6970_v63, 0.0  ;;  %v5428_v54 = vpop.permute.xlu0 %5427 }
0x2661   :  { %4609 = vadd.xlane.f32.xlu1 %v4608_v55 }
0x2664   :  { %v5348_v57 = vpop.permute.xlu0 %5347 }
0x2668   :  { %v5426_v3 = vpop.permute.xlu0 %5425 }
0x26ee   :  { %v4610_v0 = vpop.xlane.xlu1 %4609 }
0x26ef   :  { %6971 = vrcp.f32 %v4610_v0 }
0x26f8   :  { %v4766_v1 = vpop.f32.mrb[58].mxu1 }
0x26f9   :  { %v6972_v2 = vpop.eup %6971  ;;  %v6655_v4 = vpop.f32.mrb[59].mxu1 }
0x26fa   :  { %v4616_v7 = vmul.f32 %v6972_v2, %v6970_v63 }
0x26fc   :  { %6649 = vmatmul.mubr.msk.f32.vlgmr.msra.gmra.mrb[36].mxu0 %vm150_vm2, %v4616_v7  ;;  %v5006_v5 = vpop.f32.mrb[60].mxu1 }
0x26fd   :  { %v5088_v12 = vmul.f32 0.35355338, %v5006_v5  ;;  %v6670_v41 = vpop.f32.mrb[61].mxu1  ;;  %6657 = vmatpush3.msra.mxu0 %v6997_v6 }
0x26fe   :  { %6661 = vmatprep.subr.mxu0 %v6998_v9 }
0x26ff   :  { %v5090_v14 = vsel %vm150_vm2, %v5088_v12, -inf }
0x2700   :  { %5091 = vmax.xlane.f32.xlu1 %v5090_v14  ;;  %v5084_v60 = vpop.f32.mrb[62].mxu1 }
0x2701   :  { %v5089_v31 = vmul.f32 0.35355338, %v5084_v60  ;;  %v6675_v15 = vpop.f32.mrb[63].mxu1 }
0x2703   :  { %v5093_v19 = vsel %vm150_vm2, %v5089_v31, -inf }
0x2704   :  { %5094 = vmax.xlane.f32.xlu1 %v5093_v19 }
0x278d   :  { %v5092_v20 = vpop.xlane.xlu1 %5091 }
0x278e   :  { %v5096_v21 = vsub.f32 %v5088_v12, %v5092_v20 }
0x2790   :  { %v5098_v23 = vmul.f32 1.442695, %v5096_v21 }
0x2791   :  { %v5095_v50 = vpop.xlane.xlu1 %5094 }
0x2792   :  { %6973 = vpow2.f32 %v5098_v23  ;;  %v5097_v25 = vsub.f32 %v5089_v31, %v5095_v50 }
0x2794   :  { %v5100_v26 = vmul.f32 1.442695, %v5097_v25 }
0x2796   :  { %6975 = vpow2.f32 %v5100_v26  ;;  %v7000_v26 = vld [vmem:[%s7904_s2 + $0x18] sm:$0xff]  ;;  %s7065_s2 = smov [#allocation5]  }
0x279c   :  { %v6974_v28 = vpop.eup %6973 }
0x279d   :  { %v5102_v29 = vsel %vm150_vm2, %v6974_v28, 0.0 }
0x279e   :  { %5103 = vadd.xlane.f32.xlu1 %v5102_v29 }
0x27a0   :  { %v6976_v32 = vpop.eup %6975 }
0x27a1   :  { %v5105_v52 = vsel %vm150_vm2, %v6976_v32, 0.0 }
0x27a2   :  { %5106 = vadd.xlane.f32.xlu1 %v5105_v52 }
0x27b3   :  { %5188 = vrot.lane.b32.xlu1 %v7686_v36, %s7061_s25  ;;  %s5999_s25 = sshll.u32 %s7065_s2, 4  ;;  %s6000_s25 = int_to_ptr.vmem [resolvable:$true] %s5999_s25 }
0x27b4   :  { %s7023_s26 = scalar_lea.vmem %s6000_s25, 256  ;;  %p7028_p9 = scmp.lt.s32.totalorder %s6000_s25, %s6000_s25 }
0x27b5   :  { %p7024_p8 = scmp.ne.s32.totalorder %s6000_s25, %s7023_s26  ;;  %p7029_p10 = scmp.lt.s32.totalorder %s7023_s26, %s7023_s26 }
0x27b7   :  { %p7030_p11 = por %p7029_p10, %p7028_p9 }
0x27b9   :  { %p7031_p12 = pnand %p7030_p11, %p7024_p8 }
0x27cf   :  { %v4690_v35 = vpop.f32.mrb[36].mxu0 }
0x27d0   :  { %v6650_v37 = vpop.f32.mrb[37].mxu0  ;;  %6658 = vmatprep.mubr.msk.f32.mxu0 %vm150_vm2, %v4690_v35 }
0x27d1   :  { %6659 = vmatmul.mubr.msk.f32.vlgmr.msra.gmra.mrb[38].mxu0 %vm150_vm2, %v4766_v1 }
0x27d2   :  { %6663 = vmatprep.mubr.msk.f32.mxu0 %vm150_vm2, %v7755_v48  ;;  %6662 = vmatpush3.msra.mxu0 %v6998_v9 }
0x27d3   :  { %6676 = vmatprep.subr.mxu0 %v7052_v8 }
0x27d9   :  { %6664 = vmatmul.mubr.msk.f32.vlgmr.msra.gmra.mrb[38].mxu0 %vm150_vm2, %v7734_v16 }
0x27da   :  { %6677 = vmatpush3.msra.mxu0 %v5113_v42  ;;  %6678 = vmatprep.mubr.msk.f32.mxu0 %vm7053_vm1, %v7052_v8 }
0x27db   :  { %6686 = vmatprep.subr.mxu0 %v6999_v44 }
0x282b   :  { %v5104_v13 = vpop.xlane.xlu1 %5103 }
0x282c   :  { %6977 = vrcp.f32 %v5104_v13 }
0x282f   :  { %v5107_v45 = vpop.xlane.xlu1 %5106 }
0x2830   :  { %6979 = vrcp.f32 %v5107_v45 }
0x2833   :  { %v5189_v48 = vpop.permute.xlu1 %5188 }
0x2834   :  { %6682 = vmatpush3.msra.mxu1 %v5189_v48 }
0x2835   :  { %6691 = vmatprep.subr.mxu1 %v7052_v8 }
0x2836   :  { %v6978_v47 = vpop.eup %6977 }
0x2837   :  { %v5110_v16 = vmul.f32 %v6978_v47, %v6974_v28 }
0x2839   :  { %6679 = vmatmul.mubr.msk.f32.vlgmr.msra.gmra.mrb[40].mxu0 %vm150_vm2, %v5110_v16 }
0x283a   :  { %v6980_v10 = vpop.eup %6979  ;;  %6687 = vmatpush3.msra.mxu0 %v6999_v44 }
0x283b   :  { %v5111_v56 = vmul.f32 %v6980_v10, %v6976_v32  ;;  %6696 = vmatprep.subr.mxu0 %v7052_v8 }
0x283d   :  { %6684 = vmatmul.mubr.msk.f32.vlgmr.msra.gmra.mrb[64].mxu1 %vm150_vm2, %v5111_v56 }
0x283e   :  { %6692 = vmatpush3.xpose.msk.msra.mxu1 %vm150_vm2, %v5350_v17  ;;  %6693 = vmatprep.mubr.msk.f32.mxu1 %vm7053_vm1, %v7052_v8 }
0x283f   :  { %6701 = vmatprep.subr.mxu1 %v7052_v8 }
0x2841   :  { %6694 = vmatmul.mubr.msk.f32.vlgmr.msra.gmra.mrb[66].mxu1 %vm150_vm2, %v5348_v57 }
0x2842   :  { %6703 = vmatprep.mubr.msk.f32.mxu1 %vm7053_vm1, %v7052_v8 }
0x290c   :  { %v5184_v58 = vpop.f32.mrb[40].mxu0 }
0x290d   :  { %v6680_v59 = vpop.f32.mrb[41].mxu0  ;;  %6688 = vmatprep.mubr.msk.f32.mxu0 %vm150_vm2, %v5184_v58 }
0x2910   :  { %v5260_v62 = vpop.f32.mrb[64].mxu1 }
0x2911   :  { %v6685_v30 = vpop.f32.mrb[65].mxu1  ;;  %6689 = vmatmul.mubr.msk.f32.vlgmr.msra.gmra.mrb[38].mxu0 %vm150_vm2, %v5260_v62 }
0x2912   :  { %6697 = vmatpush3.xpose.msk.msra.mxu0 %vm150_vm2, %v5428_v54  ;;  %6698 = vmatprep.mubr.msk.f32.mxu0 %vm7053_vm1, %v7052_v8 }
0x2913   :  { %6706 = vmatprep.subr.mxu0 %v7052_v8 }
0x2914   :  { %v5421_v6 = vpop.f32.mrb[66].mxu1 }
0x2915   :  { %v5503_v63 = vmul.f32 0.35355338, %v5421_v6  ;;  %v6695_v55 = vpop.f32.mrb[67].mxu1  ;;  %6699 = vmatmul.mubr.msk.f32.vlgmr.msra.gmra.mrb[42].mxu0 %vm150_vm2, %v5426_v3 }
0x2916   :  { %6708 = vmatprep.mubr.msk.f32.mxu0 %vm7053_vm1, %v7052_v8 }
0x2917   :  { %v5505_v0 = vsel %vm150_vm2, %v5503_v63, -inf }
0x2918   :  { %5506 = vmax.xlane.f32.xlu1 %v5505_v0 }
0x29a5   :  { %v5507_v1 = vpop.xlane.xlu1 %5506 }
0x29a6   :  { %v5511_v2 = vsub.f32 %v5503_v63, %v5507_v1 }
0x29a8   :  { %v5513_v4 = vmul.f32 1.442695, %v5511_v2 }
0x29aa   :  { %6981 = vpow2.f32 %v5513_v4 }
0x29b4   :  { %v6982_v9 = vpop.eup %6981 }
0x29b5   :  { %v5517_v14 = vsel %vm150_vm2, %v6982_v9, 0.0 }
0x29e8   :  { %v5499_v7 = vpop.f32.mrb[42].mxu0 }
0x29e9   :  { %v5504_v5 = vmul.f32 0.35355338, %v5499_v7  ;;  %v6700_v12 = vpop.f32.mrb[43].mxu0 }
0x29eb   :  { %v5508_v41 = vsel %vm150_vm2, %v5504_v5, -inf }
0x29ec   :  { %5509 = vmax.xlane.f32.xlu0 %v5508_v41 }
0x29f0   :  { %5518 = vadd.xlane.f32.xlu0 %v5517_v14 }
0x2a06   :  { %5527 = vrot.lane.b32.xlu0 %v7689_v39, %s7064_s12 }
0x2a79   :  { %v5510_v8 = vpop.xlane.xlu0 %5509 }
0x2a7a   :  { %v5512_v60 = vsub.f32 %v5504_v5, %v5510_v8 }
0x2a7c   :  { %v5515_v31 = vmul.f32 1.442695, %v5512_v60 }
0x2a7d   :  { %v5519_v15 = vpop.xlane.xlu0 %5518 }
0x2a7e   :  { %6983 = vpow2.f32 %v5515_v31 }
0x2a7f   :  { %6985 = vrcp.f32 %v5519_v15 }
0x2a81   :  { %v5528_v19 = vpop.permute.xlu0 %5527 }
0x2a82   :  { %6702 = vmatpush3.msra.mxu1 %v5528_v19 }
0x2a83   :  { %6819 = vmatprep.subr.bf16.mxu1 %v7355_v11 }
0x2a88   :  { %v6984_v20 = vpop.eup %6983 }
0x2a89   :  { %v6986_v21 = vpop.eup %6985  ;;  %v5520_v23 = vsel %vm150_vm2, %v6984_v20, 0.0 }
0x2a8a   :  { %v5525_v50 = vmul.f32 %v6986_v21, %v6982_v9  ;;  %5521 = vadd.xlane.f32.xlu1 %v5520_v23 }
0x2a8c   :  { %6704 = vmatmul.mubr.msk.f32.vlgmr.msra.gmra.mrb[68].mxu1 %vm150_vm2, %v5525_v50 }
0x2a8d   :  { %6821 = vmatpush3.bf16.msra.mxu1 %v7355_v11 }
0x2a8e   :  { %6823 = vmatprep.subr.bf16.mxu1 %v7364_v18 }
0x2a91   :  { %6825 = vmatpush3.bf16.msra.mxu1 %v7364_v18 }
0x2a9b   :  { %5603 = vrot.lane.b32.xlu1 %v7686_v36, %s7064_s12 }
0x2b17   :  { %v5522_v39 = vpop.xlane.xlu1 %5521 }
0x2b18   :  { %6987 = vrcp.f32 %v5522_v39 }
0x2b1b   :  { %v5604_v25 = vpop.permute.xlu1 %5603 }
0x2b1c   :  { %6707 = vmatpush3.msra.mxu0 %v5604_v25 }
0x2b1d   :  { %6711 = vmatprep.subr.mxu0 %v7000_v26 }
0x2b22   :  { %v6988_v28 = vpop.eup %6987 }
0x2b23   :  { %v5526_v29 = vmul.f32 %v6988_v28, %v6984_v20 }
0x2b25   :  { %6709 = vmatmul.mubr.msk.f32.vlgmr.msra.gmra.mrb[44].mxu0 %vm150_vm2, %v5526_v29 }
0x2b26   :  { %6712 = vmatpush3.msra.mxu0 %v7000_v26 }
0x2b27   :  { %6827 = vmatprep.subr.bf16.mxu0 %v7379_v22 }
0x2b5f   :  { %v5599_v11 = vpop.f32.mrb[68].mxu1 }
0x2b60   :  { %v6705_v18 = vpop.f32.mrb[69].mxu1  ;;  %6713 = vmatprep.mubr.msk.f32.mxu0 %vm150_vm2, %v5599_v11 }
0x2bf8   :  { %v5675_v36 = vpop.f32.mrb[44].mxu0 }
0x2bf9   :  { %v6710_v32 = vpop.f32.mrb[45].mxu0  ;;  %6714 = vmatmul.mubr.msk.f32.vlgmr.msra.gmra.mrb[38].mxu0 %vm150_vm2, %v5675_v36 }
0x2bfa   :  { %6829 = vmatpush3.bf16.msra.mxu0 %v7379_v22 }
0x2bfb   :  { %6831 = vmatprep.subr.bf16.mxu0 %v7384_v24 }
0x2bfe   :  { %6833 = vmatpush3.bf16.msra.mxu0 %v7384_v24 }
0x2bff   :  { %6835 = vmatprep.subr.bf16.mxu0 %v7395_v27 }
0x2c02   :  { %6837 = vmatpush3.bf16.msra.mxu0 %v7395_v27 }
0x2c03   :  { %6839 = vmatprep.subr.bf16.mxu0 %v7424_v51 }
0x2c06   :  { %6841 = vmatpush3.bf16.msra.mxu0 %v7424_v51 }
0x2ccc   :  { %v6715_v52 = vpop.f32.mrb[38].mxu0 }
0x2ccd   :  { %v5763_v35 = vadd.f32 %v6715_v52, %v7339_v49  ;;  %v5751_v37 = vpop.f32.mrb[39].mxu0 }
0x2cce   :  { %v5762_v42 = vadd.f32 %v5751_v37, %v7339_v49 }
0x2ccf   :  { %v5765_v22 = vadd.f32 %v5763_v35, %v7677_v34 }
0x2cd0   :  { %v5764_v44 = vadd.f32 %v5762_v42, %v7674_v33 }
0x2cd1   :  { %v5769_v24 = vsel %vm65_vm0, %v5765_v22, 0.0 }
0x2cd2   :  { %5770 = vadd.xlane.f32.xlu0 %v5769_v24  ;;  %v5766_v13 = vsel %vm65_vm0, %v5764_v44, 0.0 }
0x2cd3   :  { %5767 = vadd.xlane.f32.xlu1 %v5766_v13 }
0x2d5f   :  { %v5771_v27 = vpop.xlane.xlu0 %5770 }
0x2d60   :  { %v5773_v45 = vmul.f32 0.03125, %v5771_v27  ;;  %v5768_v48 = vpop.xlane.xlu1 %5767 }
0x2d61   :  { %v5772_v51 = vmul.f32 0.03125, %v5768_v48 }
0x2d62   :  { %v5775_v17 = vsub.f32 %v5765_v22, %v5773_v45 }
0x2d63   :  { %v5774_v47 = vsub.f32 %v5764_v44, %v5772_v51 }
0x2d64   :  { %v5777_v16 = vmul.f32 %v5775_v17, %v5775_v17 }
0x2d65   :  { %v5776_v10 = vmul.f32 %v5774_v47, %v5774_v47 }
0x2d66   :  { %v5781_v49 = vsel %vm65_vm0, %v5777_v16, 0.0 }
0x2d67   :  { %5782 = vadd.xlane.f32.xlu1 %v5781_v49  ;;  %v5778_v34 = vsel %vm65_vm0, %v5776_v10, 0.0 }
0x2d68   :  { %5779 = vadd.xlane.f32.xlu0 %v5778_v34 }
0x2df4   :  { %v5783_v33 = vpop.xlane.xlu1 %5782 }
0x2df5   :  { %v5785_v54 = vmul.f32 0.03125, %v5783_v33  ;;  %v5780_v56 = vpop.xlane.xlu0 %5779 }
0x2df6   :  { %v5784_v57 = vmul.f32 0.03125, %v5780_v56 }
0x2df7   :  { %v5787_v58 = vadd.f32 1e-05, %v5785_v54 }
0x2df8   :  { %v5786_v59 = vadd.f32 1e-05, %v5784_v57 }
0x2df9   :  { %6989 = vrsqrt.f32 %v5787_v58 }
0x2dfa   :  { %6991 = vrsqrt.f32 %v5786_v59 }
0x2e03   :  { %v6990_v62 = vpop.eup %6989 }
0x2e04   :  { %v6992_v30 = vpop.eup %6991  ;;  %v5791_v3 = vmul.f32 %v6990_v62, %v5775_v17 }
0x2e05   :  { %v5790_v6 = vmul.f32 %v6992_v30, %v5774_v47 }
0x2e06   :  { %v5793_v63 = vmul.f32 %v5791_v3, %v7403_v38 }
0x2e07   :  { %v5792_v55 = vmul.f32 %v5790_v6, %v7403_v38 }
0x2e08   :  { %v5795_v1 = vadd.f32 %v5793_v63, %v7406_v43 }
0x2e09   :  { %v5794_v0 = vadd.f32 %v5792_v55, %v7406_v43 }
0x2e0b   :  { %6724 = vmatprep.mubr.msk.f32.mxu1 %vm65_vm0, %v5794_v0 }
0x2e0c   :  { %6725 = vmatmul.mubr.msk.f32.vlgmr.msra.gmra.mrb[70].mxu1 %vm65_vm0, %v5795_v1 }
0x2edf   :  { %v6726_v2 = vpop.f32.mrb[70].mxu1 }
0x2ee0   :  { %v5874_v4 = vadd.f32 %v6726_v2, %v7431_v53  ;;  %v5868_v7 = vpop.f32.mrb[71].mxu1 }
0x2ee1   :  { %v5869_v5 = vadd.f32 %v5868_v7, %v7431_v53 }
0x2ee2   :  { %v5878_v41 = vmax.f32 %v5874_v4, 0.0 }
0x2ee3   :  { %v5877_v12 = vmax.f32 %v5869_v5, 0.0 }
0x2ee5   :  { %6743 = vmatprep.mubr.msk.f32.mxu0 %vm1940_vm3, %v5877_v12 }
0x2ee6   :  { %6744 = vmatmul.mubr.msk.f32.vlgmr.msra.gmra.mrb[46].mxu0 %vm1940_vm3, %v5878_v41 }
0x2fb9   :  { %v6745_v38 = vpop.f32.mrb[46].mxu0 }
0x2fba   :  { %v5957_v9 = vadd.f32 %v6745_v38, %v7441_v61  ;;  %v5951_v43 = vpop.f32.mrb[47].mxu0 }
0x2fbb   :  { %v5952_v14 = vadd.f32 %v5951_v43, %v7441_v61 }
0x2fbc   :  { %v5961_v8 = vadd.f32 %v5957_v9, %v5795_v1 }
0x2fbd   :  { %v5960_v60 = vadd.f32 %v5952_v14, %v5794_v0 }
0x2fbe   :  { %v5965_v31 = vsel %vm65_vm0, %v5961_v8, 0.0 }
0x2fbf   :  { %5966 = vadd.xlane.f32.xlu1 %v5965_v31  ;;  %v5962_v15 = vsel %vm65_vm0, %v5960_v60, 0.0 }
0x2fc0   :  { %5963 = vadd.xlane.f32.xlu0 %v5962_v15 }
0x304c   :  { %v5967_v53 = vpop.xlane.xlu1 %5966 }
0x304d   :  { %v5969_v19 = vmul.f32 0.03125, %v5967_v53  ;;  %v5964_v20 = vpop.xlane.xlu0 %5963 }
0x304e   :  { %v5968_v21 = vmul.f32 0.03125, %v5964_v20 }
0x304f   :  { %v5971_v23 = vsub.f32 %v5961_v8, %v5969_v19 }
0x3050   :  { %v5970_v50 = vsub.f32 %v5960_v60, %v5968_v21 }
0x3051   :  { %v5973_v39 = vmul.f32 %v5971_v23, %v5971_v23 }
0x3052   :  { %v5972_v25 = vmul.f32 %v5970_v50, %v5970_v50 }
0x3053   :  { %v5977_v26 = vsel %vm65_vm0, %v5973_v39, 0.0 }
0x3054   :  { %5978 = vadd.xlane.f32.xlu1 %v5977_v26  ;;  %v5974_v61 = vsel %vm65_vm0, %v5972_v25, 0.0 }
0x3055   :  { %5975 = vadd.xlane.f32.xlu0 %v5974_v61 }
0x30e1   :  { %v5979_v28 = vpop.xlane.xlu1 %5978 }
0x30e2   :  { %v5981_v29 = vmul.f32 0.03125, %v5979_v28  ;;  %v5976_v11 = vpop.xlane.xlu0 %5975 }
0x30e3   :  { %v5980_v18 = vmul.f32 0.03125, %v5976_v11 }
0x30e4   :  { %v5983_v36 = vadd.f32 1e-05, %v5981_v29 }
0x30e5   :  { %v5982_v32 = vadd.f32 1e-05, %v5980_v18 }
0x30e6   :  { %6993 = vrsqrt.f32 %v5983_v36 }
0x30e7   :  { %6995 = vrsqrt.f32 %v5982_v32 }
0x30f0   :  { %v6994_v52 = vpop.eup %6993 }
0x30f1   :  { %v6996_v35 = vpop.eup %6995  ;;  %v5987_v37 = vmul.f32 %v6994_v52, %v5971_v23 }
0x30f2   :  { %v5986_v42 = vmul.f32 %v6996_v35, %v5970_v50 }
0x30f3   :  { %v5989_v22 = vmul.f32 %v5987_v37, %v7452_v40 }
0x30f4   :  { %v5988_v44 = vmul.f32 %v5986_v42, %v7452_v40 }
0x30f5   :  { %v5991_v24 = vadd.f32 %v5989_v22, %v7455_v46 }
0x30f6   :  { %v5990_v13 = vadd.f32 %v5988_v44, %v7455_v46 }
0x30f7   :  { %5993 = vst.msk [vmem:[#allocation5 + $0x8] sm:$0xff] %vm65_vm0, %v5991_v24 }
0x30f8   :  { %5992 = vst.msk [vmem:[#allocation5] sm:$0xff] %vm65_vm0, %v5990_v13 }
0x30f9   :  { %7034 = shalt.err (!%p7031_p12)
}
0x30fa   :  { %s7035_s9 = scalar_lea.hbm %s7908_s6, 256 }
0x30fb   :  { %p7036_p13 = scmp.ne.s32.totalorder %s7908_s6, %s7035_s9  ;;  %p7039_p0 = scmp.lt.u32.totalorder %s7035_s9, %s7908_s6 }
0x30fd   :  { %p7041_p1 = pnand %p7039_p0, %p7036_p13 }
0x30ff   :  { %7044 = shalt.err (!%p7041_p1)
}
0x3100   :  { %6005 = dma.vmem_to_hbm [thread:$0]  %s6000_s25, 256, %s7908_s6, [#allocation4], %s7050_s7, %s7050_s7, %s7051_s8  }
0x3101   :  { %7047 = dma.done.wait [#allocation4], 256  }
0x3102   :  { %7048 = vsyncadd [#allocation4], 4294967040 }
0x3103   :  { %6009 = vsyncpa [#allocation3], 1 }
0x3104   :  { %6010 = vsyncpa [#allocation4], 1 }

</bundles_post_ra>
